<compile_context>
chip_gen: v5e
topology: v5e:2x2
jax: 0.10.0
libtpu: 0.0.40
codegen_flags: <defaults>
</compile_context>

<pallas_src>
import jax
import jax.numpy as jnp
from jax import lax
from jax.experimental import pallas as pl
from jax.experimental.pallas import tpu as pltpu


# ----------------------- exact-ish GELU (erf-based, like nn.GELU()) -----------------------
# A&S 7.1.26 polynomial erf, |err| < 1.5e-7; known to lower cleanly in Mosaic.
def _erf(x):
    p = 0.3275911
    a1, a2, a3, a4, a5 = 0.254829592, -0.284496736, 1.421413741, -1.453152027, 1.061405429
    s = jnp.where(x >= 0.0, 1.0, -1.0)
    ax = jnp.abs(x)
    t = 1.0 / (1.0 + p * ax)
    poly = ((((a5 * t + a4) * t + a3) * t + a2) * t + a1) * t
    return s * (1.0 - poly * jnp.exp(-ax * ax))


def _gelu(x):
    return 0.5 * x * (1.0 + _erf(x * 0.7071067811865476))


# ------------------------------------ fused kernel -------------------------------------
def _fused_kernel(pose_ref, w1_ref, b1_ref, w2rep_ref, b2rep_ref, mask_ref,
                  aw_ref, bw_ref, blsel_ref, blb_ref, sels_ref, selb_ref,
                  x_ref, out_ref):
    C = aw_ref.shape[1]            # 256 (hard-coded by w_lin = Linear(., 256*16))
    K = bw_ref.shape[0]            # 16
    O = selb_ref.shape[1] // C     # out_len

    # ---- pose hyper-network (tiny; recomputed per grid step on purpose) ----
    h1 = _gelu(jnp.dot(pose_ref[...], w1_ref[...],
                       preferred_element_type=jnp.float32) + b1_ref[...])          # (1, J)
    # layer 2 with "repeat each h[j] K times" folded into the weights at init:
    h_rep = _gelu(jnp.dot(h1, w2rep_ref[...],
                          preferred_element_type=jnp.float32) + b2rep_ref[...])    # (1, J*K)

    # kron(h, I_K) via the precomputed 0/1 mask (resident, never rebuilt):
    hmat = mask_ref[...] * h_rep                                                   # (K, J*K)
    # generated weight W (16, 256) == w_lin(h).reshape(16, 256)   (exact 256 lanes)
    w_gen = jnp.dot(hmat, aw_ref[...],
                    preferred_element_type=jnp.float32) + bw_ref[...]              # (K, C)
    # generated bias b (1, 16) == b_lin(h)
    b_gen = jnp.dot(h_rep, blsel_ref[...],
                    preferred_element_type=jnp.float32) + blb_ref[...]             # (1, K)

    # ---- selector: one dense MXU pass against kron(I_C, sel_w^T), lane-dense GELU ----
    xb = x_ref[0]                                                                  # (TB, C*L)
    z = _gelu(jnp.dot(xb, sels_ref[...],
                      preferred_element_type=jnp.float32) + selb_ref[...])         # (TB, O*C)

    # ---- generated linear: contract C on the lane axis of BOTH operands (q @ k^T style) ----
    outs = []
    for o in range(O):                                   # static loop; O == 1 by default
        z_o = z[:, o * C:(o + 1) * C]                                              # (TB, C)
        out_o = lax.dot_general(z_o, w_gen, (((1,), (1,)), ((), ())),
                                preferred_element_type=jnp.float32) + b_gen        # (TB, K)
        outs.append(out_o)
    full = outs[0] if O == 1 else jnp.concatenate(outs, axis=1)                    # (TB, O*K)
    out_ref[0] = full.astype(out_ref.dtype)


# ------------------------------------ params --------------------------------------------
def init_params(key, in_len=16, out_len=1, node_pos_ffn_dim=16):
    keys = jax.random.split(key, 10)
    J, K, C, L, O = node_pos_ffn_dim, 16, 256, in_len, out_len

    def lin(kw, kb, fan_in, fan_out):
        bound = 1.0 / (fan_in ** 0.5)
        w = jax.random.uniform(kw, (fan_out, fan_in), jnp.float32, -bound, bound)
        b = jax.random.uniform(kb, (fan_out,), jnp.float32, -bound, bound)
        return w, b

    sel_w, sel_b = lin(keys[0], keys[1], L, O)        # (O, L), (O,)
    p1_w, p1_b = lin(keys[2], keys[3], 7, J)          # (J, 7)
    p2_w, p2_b = lin(keys[4], keys[5], J, J)          # (J, J)
    wl_w, wl_b = lin(keys[6], keys[7], J, C * K)      # (C*K, J)
    bl_w, bl_b = lin(keys[8], keys[9], J, K)          # (K, J)

    # pose FFN (row orientation); fold the lane-repeat into layer 2 (elementwise GELU commutes).
    pose_w1 = p1_w.T                                  # (7, J)
    pose_b1 = p1_b.reshape(1, J)
    w2rep = jnp.repeat(p2_w.T, K, axis=1)             # (J, J*K)
    b2rep = jnp.repeat(p2_b.reshape(1, J), K, axis=1) # (1, J*K)

    # kron 0/1 selection mask:  mask[k, j*K + k'] = (k' == k)
    mask = (jnp.arange(J * K)[None, :] % K == jnp.arange(K)[:, None]).astype(jnp.float32)

    # w_lin permuted so  (mask * h_rep) @ aw + bw == w_lin(h).reshape(16, 256)
    aw = wl_w.reshape(K, C, J).transpose(2, 0, 1).reshape(J * K, C)   # (J*K, C)
    bw = wl_b.reshape(K, C)                                           # (K, C)

    # b_lin expressed against h_rep (pick the k'==0 copy of each h[j]):
    blsel = jnp.zeros((J, K, K), jnp.float32).at[:, 0, :].set(bl_w.T).reshape(J * K, K)
    blb = bl_b.reshape(1, K)

    # selector as kron(I_C, sel_w^T): sels[c*L + l, o*C + c'] = sel_w[o, l] * (c == c')
    sels = jnp.einsum('ol,cd->clod', sel_w,
                      jnp.eye(C, dtype=jnp.float32)).reshape(C * L, O * C)
    selb = jnp.repeat(sel_b, C).reshape(1, O * C)

    return dict(
        pose_w1=pose_w1, pose_b1=pose_b1, w2rep=w2rep, b2rep=b2rep,
        mask=mask, aw=aw, bw=bw, blsel=blsel, blb=blb,
        sels=sels, selb=selb,
        min=jnp.array([-2776.4158, -2485.51226, 0.49277], jnp.float32) / 1000.0,
        max=jnp.array([5021.02426, 3147.80981, 1621.69398], jnp.float32) / 1000.0,
    )


def _euler_zyx_to_quat_xyzw(roll, pitch, yaw):
    cr, sr = jnp.cos(roll * 0.5), jnp.sin(roll * 0.5)
    cp, sp = jnp.cos(pitch * 0.5), jnp.sin(pitch * 0.5)
    cy, sy = jnp.cos(yaw * 0.5), jnp.sin(yaw * 0.5)
    qw = cr * cp * cy + sr * sp * sy
    qx = sr * cp * cy - cr * sp * sy
    qy = cr * sp * cy + sr * cp * sy
    qz = cr * cp * sy - sr * sp * cy
    return jnp.stack([qx, qy, qz, qw])


# ------------------------------------ forward --------------------------------------------
def node_pose_adapter_forward(x, node_pos, params, *, tb_max=128):
    """x: (B, C, H, W) float32 (NCHW, like the PyTorch module); node_pos: (1, 9)."""
    B, C, H, W = x.shape
    L = H * W
    CL = C * L
    assert C == 256, "w_lin hard-codes 256 input channels for the generated weight"
    assert params['sels'].shape[0] == CL, "selector kron built for a different in_len"
    OC = params['sels'].shape[1]
    O = OC // C
    K = 16

    x2 = x.reshape(B, CL).astype(jnp.float32)        # free reshape, native NCHW order

    # --- pose preprocessing (plain-JAX scalar glue: normalization + euler->quat) ---
    p9 = node_pos.reshape(-1, 9).astype(jnp.float32)[0]
    mn, mx = params['min'], params['max']
    xyz_n = (p9[:3] - mn) / (mx - mn)
    quat = _euler_zyx_to_quat_xyzw(p9[6], p9[7], p9[8])
    pose_feat = jnp.concatenate([xyz_n, quat]).reshape(1, 7)          # (1, 7)

    # --- batch tiling: TB rows per grid step; pad B up to a multiple of TB ---
    TB = min(B, tb_max)
    nb = -(-B // TB)
    Bp = nb * TB
    if Bp != B:
        x2 = jnp.concatenate([x2, jnp.zeros((Bp - B, CL), jnp.float32)], axis=0)
    x3 = x2.reshape(nb, TB, CL)

    out3 = pl.pallas_call(
        _fused_kernel,
        out_shape=jax.ShapeDtypeStruct((nb, TB, O * K), jnp.float32),
        grid=(nb,),
        in_specs=[
            pl.BlockSpec((1, 7), lambda i: (0, 0)),                    # pose features
            pl.BlockSpec(params['pose_w1'].shape, lambda i: (0, 0)),   # pose_ffn W1
            pl.BlockSpec(params['pose_b1'].shape, lambda i: (0, 0)),   # pose_ffn b1
            pl.BlockSpec(params['w2rep'].shape, lambda i: (0, 0)),     # pose_ffn W2 (repeat-folded)
            pl.BlockSpec(params['b2rep'].shape, lambda i: (0, 0)),     # pose_ffn b2 (repeat-folded)
            pl.BlockSpec(params['mask'].shape, lambda i: (0, 0)),      # kron 0/1 mask
            pl.BlockSpec(params['aw'].shape, lambda i: (0, 0)),        # w_lin weights (permuted)
            pl.BlockSpec(params['bw'].shape, lambda i: (0, 0)),        # w_lin bias (16, 256)
            pl.BlockSpec(params['blsel'].shape, lambda i: (0, 0)),     # b_lin weights (selected)
            pl.BlockSpec(params['blb'].shape, lambda i: (0, 0)),       # b_lin bias
            pl.BlockSpec(params['sels'].shape, lambda i: (0, 0)),      # kron(I_C, sel_w^T)
            pl.BlockSpec(params['selb'].shape, lambda i: (0, 0)),      # selector bias (1, O*C)
            pl.BlockSpec((1, TB, CL), lambda i: (i, 0, 0)),            # x, lane-dense (TB, C*L)
        ],
        out_specs=pl.BlockSpec((1, TB, O * K), lambda i: (i, 0, 0)),
        compiler_params=pltpu.CompilerParams(
            dimension_semantics=("parallel",),
            vmem_limit_bytes=32 * 1024 * 1024),                        # safe on v5e/v6e/v7x
    )(pose_feat,
      params['pose_w1'], params['pose_b1'],
      params['w2rep'], params['b2rep'], params['mask'],
      params['aw'], params['bw'],
      params['blsel'], params['blb'],
      params['sels'], params['selb'],
      x3)

    # (nb, TB, O*K) -> (Bp, O, K) -> drop pad rows -> (B*O, 1, K); all free reshapes/slices.
    return out3.reshape(Bp, O, K)[:B].reshape(B * O, 1, K)


if __name__ == "__main__":
    key = jax.random.PRNGKey(0)
    k_x, k_pose, k_params = jax.random.split(key, 3)

    B, C, H, W = 2, 256, 4, 4            # in_len = H*W = 16 (small demo shapes)
    in_len, out_len = H * W, 1

    x = jax.random.normal(k_x, (B, C, H, W), jnp.float32)
    node_pos = jax.random.normal(k_pose, (1, 9), jnp.float32)

    params = init_params(k_params, in_len=in_len, out_len=out_len, node_pos_ffn_dim=16)

    out = node_pose_adapter_forward(x, node_pos, params)
    jax.block_until_ready(out)
    assert out.shape == (B * out_len, 1, 16), out.shape
    print("KERNEL_OK")
</pallas_src>

<mosaic_0001>
module attributes {stable_mosaic.version = 11 : i64} {
  func.func @_fused_kernel(%arg0: i32, %arg1: memref<1x7xf32, #tpu.memory_space<vmem>>, %arg2: memref<7x16xf32, #tpu.memory_space<vmem>>, %arg3: memref<1x16xf32, #tpu.memory_space<vmem>>, %arg4: memref<16x256xf32, #tpu.memory_space<vmem>>, %arg5: memref<1x256xf32, #tpu.memory_space<vmem>>, %arg6: memref<16x256xf32, #tpu.memory_space<vmem>>, %arg7: memref<256x256xf32, #tpu.memory_space<vmem>>, %arg8: memref<16x256xf32, #tpu.memory_space<vmem>>, %arg9: memref<256x16xf32, #tpu.memory_space<vmem>>, %arg10: memref<1x16xf32, #tpu.memory_space<vmem>>, %arg11: memref<4096x256xf32, #tpu.memory_space<vmem>>, %arg12: memref<1x256xf32, #tpu.memory_space<vmem>>, %arg13: memref<1x2x4096xf32, #tpu.memory_space<vmem>>, %arg14: memref<1x2x16xf32, #tpu.memory_space<vmem>>) attributes {dimension_semantics = [#tpu.dimension_semantics<parallel>], iteration_bounds = array<i64: 1>, scalar_prefetch = 0 : i64, scratch_operands = 0 : i64, tpu.core_type = #tpu.core_type<tc>, window_params = [{pipeline_mode = #tpu.pipeline_mode<synchronous>, transform_indices = @transform_0, window_bounds = array<i64: 1, 7>}, {pipeline_mode = #tpu.pipeline_mode<synchronous>, transform_indices = @transform_1, window_bounds = array<i64: 7, 16>}, {pipeline_mode = #tpu.pipeline_mode<synchronous>, transform_indices = @transform_2, window_bounds = array<i64: 1, 16>}, {pipeline_mode = #tpu.pipeline_mode<synchronous>, transform_indices = @transform_3, window_bounds = array<i64: 16, 256>}, {pipeline_mode = #tpu.pipeline_mode<synchronous>, transform_indices = @transform_4, window_bounds = array<i64: 1, 256>}, {pipeline_mode = #tpu.pipeline_mode<synchronous>, transform_indices = @transform_5, window_bounds = array<i64: 16, 256>}, {pipeline_mode = #tpu.pipeline_mode<synchronous>, transform_indices = @transform_6, window_bounds = array<i64: 256, 256>}, {pipeline_mode = #tpu.pipeline_mode<synchronous>, transform_indices = @transform_7, window_bounds = array<i64: 16, 256>}, {pipeline_mode = #tpu.pipeline_mode<synchronous>, transform_indices = @transform_8, window_bounds = array<i64: 256, 16>}, {pipeline_mode = #tpu.pipeline_mode<synchronous>, transform_indices = @transform_9, window_bounds = array<i64: 1, 16>}, {pipeline_mode = #tpu.pipeline_mode<synchronous>, transform_indices = @transform_10, window_bounds = array<i64: 4096, 256>}, {pipeline_mode = #tpu.pipeline_mode<synchronous>, transform_indices = @transform_11, window_bounds = array<i64: 1, 256>}, {transform_indices = @transform_12, window_bounds = array<i64: 1, 2, 4096>}, {transform_indices = @transform_13, window_bounds = array<i64: 1, 2, 16>}]} {
    %c0 = arith.constant 0 : index
    %c0_0 = arith.constant 0 : index
    %0 = vector.load %arg1[%c0, %c0_0] : memref<1x7xf32, #tpu.memory_space<vmem>>, vector<1x7xf32>
    %c0_1 = arith.constant 0 : index
    %c0_2 = arith.constant 0 : index
    %1 = vector.load %arg2[%c0_1, %c0_2] : memref<7x16xf32, #tpu.memory_space<vmem>>, vector<7x16xf32>
    %cst = arith.constant dense<0.000000e+00> : vector<1x16xf32>
    %2 = tpu.matmul %0, %1, %cst {dimension_numbers = #tpu.dot_dimension_numbers<[1], [0], [0], [1], [0, 0, 1, 1], [], []>} : vector<1x7xf32>, vector<7x16xf32>, vector<1x16xf32> -> vector<1x16xf32>
    %c0_3 = arith.constant 0 : index
    %c0_4 = arith.constant 0 : index
    %3 = vector.load %arg3[%c0_3, %c0_4] : memref<1x16xf32, #tpu.memory_space<vmem>>, vector<1x16xf32>
    %4 = arith.addf %2, %3 : vector<1x16xf32>
    %cst_5 = arith.constant 5.000000e-01 : f32
    %5 = vector.broadcast %cst_5 : f32 to vector<1x16xf32>
    %6 = arith.mulf %5, %4 : vector<1x16xf32>
    %cst_6 = arith.constant 0.707106769 : f32
    %7 = vector.broadcast %cst_6 : f32 to vector<1x16xf32>
    %8 = arith.mulf %4, %7 : vector<1x16xf32>
    %cst_7 = arith.constant 0.000000e+00 : f32
    %9 = vector.broadcast %cst_7 : f32 to vector<1x16xf32>
    %10 = arith.cmpf oge, %8, %9 : vector<1x16xf32>
    %cst_8 = arith.constant 1.000000e+00 : f32
    %cst_9 = arith.constant -1.000000e+00 : f32
    %11 = vector.broadcast %cst_8 : f32 to vector<1x16xf32>
    %12 = vector.broadcast %cst_9 : f32 to vector<1x16xf32>
    %13 = arith.select %10, %11, %12 : vector<1x16xi1>, vector<1x16xf32>
    %14 = math.absf %8 : vector<1x16xf32>
    %cst_10 = arith.constant 0.327591091 : f32
    %15 = vector.broadcast %cst_10 : f32 to vector<1x16xf32>
    %16 = arith.mulf %15, %14 : vector<1x16xf32>
    %cst_11 = arith.constant 1.000000e+00 : f32
    %17 = vector.broadcast %cst_11 : f32 to vector<1x16xf32>
    %18 = arith.addf %17, %16 : vector<1x16xf32>
    %cst_12 = arith.constant 1.000000e+00 : f32
    %19 = vector.broadcast %cst_12 : f32 to vector<1x16xf32>
    %20 = arith.divf %19, %18 : vector<1x16xf32>
    %cst_13 = arith.constant 1.06140542 : f32
    %21 = vector.broadcast %cst_13 : f32 to vector<1x16xf32>
    %22 = arith.mulf %21, %20 : vector<1x16xf32>
    %cst_14 = arith.constant -1.45315206 : f32
    %23 = vector.broadcast %cst_14 : f32 to vector<1x16xf32>
    %24 = arith.addf %22, %23 : vector<1x16xf32>
    %25 = arith.mulf %24, %20 : vector<1x16xf32>
    %cst_15 = arith.constant 1.42141378 : f32
    %26 = vector.broadcast %cst_15 : f32 to vector<1x16xf32>
    %27 = arith.addf %25, %26 : vector<1x16xf32>
    %28 = arith.mulf %27, %20 : vector<1x16xf32>
    %cst_16 = arith.constant -0.284496725 : f32
    %29 = vector.broadcast %cst_16 : f32 to vector<1x16xf32>
    %30 = arith.addf %28, %29 : vector<1x16xf32>
    %31 = arith.mulf %30, %20 : vector<1x16xf32>
    %cst_17 = arith.constant 0.254829586 : f32
    %32 = vector.broadcast %cst_17 : f32 to vector<1x16xf32>
    %33 = arith.addf %31, %32 : vector<1x16xf32>
    %34 = arith.mulf %33, %20 : vector<1x16xf32>
    %cst_18 = arith.constant 0.000000e+00 : f32
    %35 = vector.broadcast %cst_18 : f32 to vector<1x16xf32>
    %36 = arith.subf %35, %14 : vector<1x16xf32>
    %37 = arith.mulf %36, %14 : vector<1x16xf32>
    %38 = math.exp %37 : vector<1x16xf32>
    %39 = arith.mulf %34, %38 : vector<1x16xf32>
    %cst_19 = arith.constant 1.000000e+00 : f32
    %40 = vector.broadcast %cst_19 : f32 to vector<1x16xf32>
    %41 = arith.subf %40, %39 : vector<1x16xf32>
    %42 = arith.mulf %13, %41 : vector<1x16xf32>
    %cst_20 = arith.constant 1.000000e+00 : f32
    %43 = vector.broadcast %cst_20 : f32 to vector<1x16xf32>
    %44 = arith.addf %43, %42 : vector<1x16xf32>
    %45 = arith.mulf %6, %44 : vector<1x16xf32>
    %c0_21 = arith.constant 0 : index
    %c0_22 = arith.constant 0 : index
    %46 = vector.load %arg4[%c0_21, %c0_22] : memref<16x256xf32, #tpu.memory_space<vmem>>, vector<16x256xf32>
    %cst_23 = arith.constant dense<0.000000e+00> : vector<1x256xf32>
    %47 = tpu.matmul %45, %46, %cst_23 {dimension_numbers = #tpu.dot_dimension_numbers<[1], [0], [0], [1], [0, 0, 1, 1], [], []>} : vector<1x16xf32>, vector<16x256xf32>, vector<1x256xf32> -> vector<1x256xf32>
    %c0_24 = arith.constant 0 : index
    %c0_25 = arith.constant 0 : index
    %48 = vector.load %arg5[%c0_24, %c0_25] : memref<1x256xf32, #tpu.memory_space<vmem>>, vector<1x256xf32>
    %49 = arith.addf %47, %48 : vector<1x256xf32>
    %cst_26 = arith.constant 5.000000e-01 : f32
    %50 = vector.broadcast %cst_26 : f32 to vector<1x256xf32>
    %51 = arith.mulf %50, %49 : vector<1x256xf32>
    %cst_27 = arith.constant 0.707106769 : f32
    %52 = vector.broadcast %cst_27 : f32 to vector<1x256xf32>
    %53 = arith.mulf %49, %52 : vector<1x256xf32>
    %cst_28 = arith.constant 0.000000e+00 : f32
    %54 = vector.broadcast %cst_28 : f32 to vector<1x256xf32>
    %55 = arith.cmpf oge, %53, %54 : vector<1x256xf32>
    %cst_29 = arith.constant 1.000000e+00 : f32
    %cst_30 = arith.constant -1.000000e+00 : f32
    %56 = vector.broadcast %cst_29 : f32 to vector<1x256xf32>
    %57 = vector.broadcast %cst_30 : f32 to vector<1x256xf32>
    %58 = arith.select %55, %56, %57 : vector<1x256xi1>, vector<1x256xf32>
    %59 = math.absf %53 : vector<1x256xf32>
    %cst_31 = arith.constant 0.327591091 : f32
    %60 = vector.broadcast %cst_31 : f32 to vector<1x256xf32>
    %61 = arith.mulf %60, %59 : vector<1x256xf32>
    %cst_32 = arith.constant 1.000000e+00 : f32
    %62 = vector.broadcast %cst_32 : f32 to vector<1x256xf32>
    %63 = arith.addf %62, %61 : vector<1x256xf32>
    %cst_33 = arith.constant 1.000000e+00 : f32
    %64 = vector.broadcast %cst_33 : f32 to vector<1x256xf32>
    %65 = arith.divf %64, %63 : vector<1x256xf32>
    %cst_34 = arith.constant 1.06140542 : f32
    %66 = vector.broadcast %cst_34 : f32 to vector<1x256xf32>
    %67 = arith.mulf %66, %65 : vector<1x256xf32>
    %cst_35 = arith.constant -1.45315206 : f32
    %68 = vector.broadcast %cst_35 : f32 to vector<1x256xf32>
    %69 = arith.addf %67, %68 : vector<1x256xf32>
    %70 = arith.mulf %69, %65 : vector<1x256xf32>
    %cst_36 = arith.constant 1.42141378 : f32
    %71 = vector.broadcast %cst_36 : f32 to vector<1x256xf32>
    %72 = arith.addf %70, %71 : vector<1x256xf32>
    %73 = arith.mulf %72, %65 : vector<1x256xf32>
    %cst_37 = arith.constant -0.284496725 : f32
    %74 = vector.broadcast %cst_37 : f32 to vector<1x256xf32>
    %75 = arith.addf %73, %74 : vector<1x256xf32>
    %76 = arith.mulf %75, %65 : vector<1x256xf32>
    %cst_38 = arith.constant 0.254829586 : f32
    %77 = vector.broadcast %cst_38 : f32 to vector<1x256xf32>
    %78 = arith.addf %76, %77 : vector<1x256xf32>
    %79 = arith.mulf %78, %65 : vector<1x256xf32>
    %cst_39 = arith.constant 0.000000e+00 : f32
    %80 = vector.broadcast %cst_39 : f32 to vector<1x256xf32>
    %81 = arith.subf %80, %59 : vector<1x256xf32>
    %82 = arith.mulf %81, %59 : vector<1x256xf32>
    %83 = math.exp %82 : vector<1x256xf32>
    %84 = arith.mulf %79, %83 : vector<1x256xf32>
    %cst_40 = arith.constant 1.000000e+00 : f32
    %85 = vector.broadcast %cst_40 : f32 to vector<1x256xf32>
    %86 = arith.subf %85, %84 : vector<1x256xf32>
    %87 = arith.mulf %58, %86 : vector<1x256xf32>
    %cst_41 = arith.constant 1.000000e+00 : f32
    %88 = vector.broadcast %cst_41 : f32 to vector<1x256xf32>
    %89 = arith.addf %88, %87 : vector<1x256xf32>
    %90 = arith.mulf %51, %89 : vector<1x256xf32>
    %c0_42 = arith.constant 0 : index
    %c0_43 = arith.constant 0 : index
    %91 = vector.load %arg6[%c0_42, %c0_43] : memref<16x256xf32, #tpu.memory_space<vmem>>, vector<16x256xf32>
    %92 = vector.broadcast %90 : vector<1x256xf32> to vector<16x256xf32>
    %93 = arith.mulf %91, %92 : vector<16x256xf32>
    %c0_44 = arith.constant 0 : index
    %c0_45 = arith.constant 0 : index
    %94 = vector.load %arg7[%c0_44, %c0_45] : memref<256x256xf32, #tpu.memory_space<vmem>>, vector<256x256xf32>
    %cst_46 = arith.constant dense<0.000000e+00> : vector<16x256xf32>
    %95 = tpu.matmul %93, %94, %cst_46 {dimension_numbers = #tpu.dot_dimension_numbers<[1], [0], [0], [1], [0, 0, 1, 1], [], []>} : vector<16x256xf32>, vector<256x256xf32>, vector<16x256xf32> -> vector<16x256xf32>
    %c0_47 = arith.constant 0 : index
    %c0_48 = arith.constant 0 : index
    %96 = vector.load %arg8[%c0_47, %c0_48] : memref<16x256xf32, #tpu.memory_space<vmem>>, vector<16x256xf32>
    %97 = arith.addf %95, %96 : vector<16x256xf32>
    %c0_49 = arith.constant 0 : index
    %c0_50 = arith.constant 0 : index
    %98 = vector.load %arg9[%c0_49, %c0_50] : memref<256x16xf32, #tpu.memory_space<vmem>>, vector<256x16xf32>
    %cst_51 = arith.constant dense<0.000000e+00> : vector<1x16xf32>
    %99 = tpu.matmul %90, %98, %cst_51 {dimension_numbers = #tpu.dot_dimension_numbers<[1], [0], [0], [1], [0, 0, 1, 1], [], []>} : vector<1x256xf32>, vector<256x16xf32>, vector<1x16xf32> -> vector<1x16xf32>
    %c0_52 = arith.constant 0 : index
    %c0_53 = arith.constant 0 : index
    %100 = vector.load %arg10[%c0_52, %c0_53] : memref<1x16xf32, #tpu.memory_space<vmem>>, vector<1x16xf32>
    %101 = arith.addf %99, %100 : vector<1x16xf32>
    %c0_54 = arith.constant 0 : index
    %c0_55 = arith.constant 0 : index
    %c0_56 = arith.constant 0 : index
    %102 = vector.load %arg13[%c0_54, %c0_55, %c0_56] : memref<1x2x4096xf32, #tpu.memory_space<vmem>>, vector<1x2x4096xf32>
    %103 = vector.shape_cast %102 : vector<1x2x4096xf32> to vector<2x4096xf32>
    %c0_57 = arith.constant 0 : index
    %c0_58 = arith.constant 0 : index
    %104 = vector.load %arg11[%c0_57, %c0_58] : memref<4096x256xf32, #tpu.memory_space<vmem>>, vector<4096x256xf32>
    %cst_59 = arith.constant dense<0.000000e+00> : vector<2x256xf32>
    %105 = tpu.matmul %103, %104, %cst_59 {dimension_numbers = #tpu.dot_dimension_numbers<[1], [0], [0], [1], [0, 0, 1, 1], [], []>} : vector<2x4096xf32>, vector<4096x256xf32>, vector<2x256xf32> -> vector<2x256xf32>
    %c0_60 = arith.constant 0 : index
    %c0_61 = arith.constant 0 : index
    %106 = vector.load %arg12[%c0_60, %c0_61] : memref<1x256xf32, #tpu.memory_space<vmem>>, vector<1x256xf32>
    %107 = vector.broadcast %106 : vector<1x256xf32> to vector<2x256xf32>
    %108 = arith.addf %105, %107 : vector<2x256xf32>
    %cst_62 = arith.constant 5.000000e-01 : f32
    %109 = vector.broadcast %cst_62 : f32 to vector<2x256xf32>
    %110 = arith.mulf %109, %108 : vector<2x256xf32>
    %cst_63 = arith.constant 0.707106769 : f32
    %111 = vector.broadcast %cst_63 : f32 to vector<2x256xf32>
    %112 = arith.mulf %108, %111 : vector<2x256xf32>
    %cst_64 = arith.constant 0.000000e+00 : f32
    %113 = vector.broadcast %cst_64 : f32 to vector<2x256xf32>
    %114 = arith.cmpf oge, %112, %113 : vector<2x256xf32>
    %cst_65 = arith.constant 1.000000e+00 : f32
    %cst_66 = arith.constant -1.000000e+00 : f32
    %115 = vector.broadcast %cst_65 : f32 to vector<2x256xf32>
    %116 = vector.broadcast %cst_66 : f32 to vector<2x256xf32>
    %117 = arith.select %114, %115, %116 : vector<2x256xi1>, vector<2x256xf32>
    %118 = math.absf %112 : vector<2x256xf32>
    %cst_67 = arith.constant 0.327591091 : f32
    %119 = vector.broadcast %cst_67 : f32 to vector<2x256xf32>
    %120 = arith.mulf %119, %118 : vector<2x256xf32>
    %cst_68 = arith.constant 1.000000e+00 : f32
    %121 = vector.broadcast %cst_68 : f32 to vector<2x256xf32>
    %122 = arith.addf %121, %120 : vector<2x256xf32>
    %cst_69 = arith.constant 1.000000e+00 : f32
    %123 = vector.broadcast %cst_69 : f32 to vector<2x256xf32>
    %124 = arith.divf %123, %122 : vector<2x256xf32>
    %cst_70 = arith.constant 1.06140542 : f32
    %125 = vector.broadcast %cst_70 : f32 to vector<2x256xf32>
    %126 = arith.mulf %125, %124 : vector<2x256xf32>
    %cst_71 = arith.constant -1.45315206 : f32
    %127 = vector.broadcast %cst_71 : f32 to vector<2x256xf32>
    %128 = arith.addf %126, %127 : vector<2x256xf32>
    %129 = arith.mulf %128, %124 : vector<2x256xf32>
    %cst_72 = arith.constant 1.42141378 : f32
    %130 = vector.broadcast %cst_72 : f32 to vector<2x256xf32>
    %131 = arith.addf %129, %130 : vector<2x256xf32>
    %132 = arith.mulf %131, %124 : vector<2x256xf32>
    %cst_73 = arith.constant -0.284496725 : f32
    %133 = vector.broadcast %cst_73 : f32 to vector<2x256xf32>
    %134 = arith.addf %132, %133 : vector<2x256xf32>
    %135 = arith.mulf %134, %124 : vector<2x256xf32>
    %cst_74 = arith.constant 0.254829586 : f32
    %136 = vector.broadcast %cst_74 : f32 to vector<2x256xf32>
    %137 = arith.addf %135, %136 : vector<2x256xf32>
    %138 = arith.mulf %137, %124 : vector<2x256xf32>
    %cst_75 = arith.constant 0.000000e+00 : f32
    %139 = vector.broadcast %cst_75 : f32 to vector<2x256xf32>
    %140 = arith.subf %139, %118 : vector<2x256xf32>
    %141 = arith.mulf %140, %118 : vector<2x256xf32>
    %142 = math.exp %141 : vector<2x256xf32>
    %143 = arith.mulf %138, %142 : vector<2x256xf32>
    %cst_76 = arith.constant 1.000000e+00 : f32
    %144 = vector.broadcast %cst_76 : f32 to vector<2x256xf32>
    %145 = arith.subf %144, %143 : vector<2x256xf32>
    %146 = arith.mulf %117, %145 : vector<2x256xf32>
    %cst_77 = arith.constant 1.000000e+00 : f32
    %147 = vector.broadcast %cst_77 : f32 to vector<2x256xf32>
    %148 = arith.addf %147, %146 : vector<2x256xf32>
    %149 = arith.mulf %110, %148 : vector<2x256xf32>
    %cst_78 = arith.constant dense<0.000000e+00> : vector<2x16xf32>
    %150 = tpu.matmul %149, %97, %cst_78 {dimension_numbers = #tpu.dot_dimension_numbers<[1], [1], [0], [0], [0, 0, 1, 0], [], []>} : vector<2x256xf32>, vector<16x256xf32>, vector<2x16xf32> -> vector<2x16xf32>
    %151 = vector.broadcast %101 : vector<1x16xf32> to vector<2x16xf32>
    %152 = arith.addf %150, %151 : vector<2x16xf32>
    %c0_79 = arith.constant 0 : index
    %c0_80 = arith.constant 0 : index
    %c0_81 = arith.constant 0 : index
    %153 = vector.load %arg14[%c0_79, %c0_80, %c0_81] : memref<1x2x16xf32, #tpu.memory_space<vmem>>, vector<1x2x16xf32>
    %154 = vector.shape_cast %153 : vector<1x2x16xf32> to vector<2x16xf32>
    %155 = vector.shape_cast %152 : vector<2x16xf32> to vector<1x2x16xf32>
    tpu.vector_store %arg14[%c0_79, %c0_80, %c0_81], %155 {strides = array<i32>} : memref<1x2x16xf32, #tpu.memory_space<vmem>>, vector<1x2x16xf32>,
    return
  }
  func.func @transform_0(%arg0: i32) -> (i32, i32) {
    %c0_i32 = arith.constant 0 : i32
    %c0_i32_0 = arith.constant 0 : i32
    %c0_i32_1 = arith.constant 0 : i32
    return %c0_i32, %c0_i32_0 : i32, i32
  }
  func.func @transform_1(%arg0: i32) -> (i32, i32) {
    %c0_i32 = arith.constant 0 : i32
    %c0_i32_0 = arith.constant 0 : i32
    %c0_i32_1 = arith.constant 0 : i32
    return %c0_i32, %c0_i32_0 : i32, i32
  }
  func.func @transform_2(%arg0: i32) -> (i32, i32) {
    %c0_i32 = arith.constant 0 : i32
    %c0_i32_0 = arith.constant 0 : i32
    %c0_i32_1 = arith.constant 0 : i32
    return %c0_i32, %c0_i32_0 : i32, i32
  }
  func.func @transform_3(%arg0: i32) -> (i32, i32) {
    %c0_i32 = arith.constant 0 : i32
    %c0_i32_0 = arith.constant 0 : i32
    %c0_i32_1 = arith.constant 0 : i32
    return %c0_i32, %c0_i32_0 : i32, i32
  }
  func.func @transform_4(%arg0: i32) -> (i32, i32) {
    %c0_i32 = arith.constant 0 : i32
    %c0_i32_0 = arith.constant 0 : i32
    %c0_i32_1 = arith.constant 0 : i32
    return %c0_i32, %c0_i32_0 : i32, i32
  }
  func.func @transform_5(%arg0: i32) -> (i32, i32) {
    %c0_i32 = arith.constant 0 : i32
    %c0_i32_0 = arith.constant 0 : i32
    %c0_i32_1 = arith.constant 0 : i32
    return %c0_i32, %c0_i32_0 : i32, i32
  }
  func.func @transform_6(%arg0: i32) -> (i32, i32) {
    %c0_i32 = arith.constant 0 : i32
    %c0_i32_0 = arith.constant 0 : i32
    %c0_i32_1 = arith.constant 0 : i32
    return %c0_i32, %c0_i32_0 : i32, i32
  }
  func.func @transform_7(%arg0: i32) -> (i32, i32) {
    %c0_i32 = arith.constant 0 : i32
    %c0_i32_0 = arith.constant 0 : i32
    %c0_i32_1 = arith.constant 0 : i32
    return %c0_i32, %c0_i32_0 : i32, i32
  }
  func.func @transform_8(%arg0: i32) -> (i32, i32) {
    %c0_i32 = arith.constant 0 : i32
    %c0_i32_0 = arith.constant 0 : i32
    %c0_i32_1 = arith.constant 0 : i32
    return %c0_i32, %c0_i32_0 : i32, i32
  }
  func.func @transform_9(%arg0: i32) -> (i32, i32) {
    %c0_i32 = arith.constant 0 : i32
    %c0_i32_0 = arith.constant 0 : i32
    %c0_i32_1 = arith.constant 0 : i32
    return %c0_i32, %c0_i32_0 : i32, i32
  }
  func.func @transform_10(%arg0: i32) -> (i32, i32) {
    %c0_i32 = arith.constant 0 : i32
    %c0_i32_0 = arith.constant 0 : i32
    %c0_i32_1 = arith.constant 0 : i32
    return %c0_i32, %c0_i32_0 : i32, i32
  }
  func.func @transform_11(%arg0: i32) -> (i32, i32) {
    %c0_i32 = arith.constant 0 : i32
    %c0_i32_0 = arith.constant 0 : i32
    %c0_i32_1 = arith.constant 0 : i32
    return %c0_i32, %c0_i32_0 : i32, i32
  }
  func.func @transform_12(%arg0: i32) -> (i32, i32, i32) {
    %c0_i32 = arith.constant 0 : i32
    %c0_i32_0 = arith.constant 0 : i32
    %c0_i32_1 = arith.constant 0 : i32
    return %arg0, %c0_i32, %c0_i32_0 : i32, i32, i32
  }
  func.func @transform_13(%arg0: i32) -> (i32, i32, i32) {
    %c0_i32 = arith.constant 0 : i32
    %c0_i32_0 = arith.constant 0 : i32
    %c0_i32_1 = arith.constant 0 : i32
    return %arg0, %c0_i32, %c0_i32_0 : i32, i32, i32
  }
}

</mosaic_0001>

<bundles_post_ra>
// kernel: tpu_custom_call.1
= control target key start
LH: loop header
LB: loop body
LE: loop exit
PB: predicated region body
PF: predicated region fallthrough
CT: control target
= control target key end

     0   :  { %18 = vsyncpa [#allocation3], 0  ;;  %s4051_s0 = inlined_call_operand.hbm [shape: f32[1,7], index: 0, kind: input, shape index: {}]   ;;  %s4052_s1 = inlined_call_operand.hbm [shape: f32[7,16], index: 1, kind: input, shape index: {}]   ;;  %s4053_s2 = inlined_call_operand.hbm [shape: f32[1,16], index: 2, kind: input, shape index: {}]   ;;  %s4054_s3 = inlined_call_operand.hbm [shape: f32[16,256], index: 3, kind: input, shape index: {}]   ;;  %s4055_s4 = inlined_call_operand.hbm [shape: f32[1,256], index: 4, kind: input, shape index: {}]   ;;  %s4056_s5 = inlined_call_operand.hbm [shape: f32[16,256], index: 5, kind: input, shape index: {}]   ;;  %s4057_s6 = inlined_call_operand.hbm [shape: f32[256,256], index: 6, kind: input, shape index: {}]   ;;  %s4058_s7 = inlined_call_operand.hbm [shape: f32[16,256], index: 7, kind: input, shape index: {}]   ;;  %s4059_s8 = inlined_call_operand.vmem [shape: f32[256,16], index: 8, kind: input, shape index: {}]   ;;  %s4060_s9 = inlined_call_operand.hbm [shape: f32[1,16], index: 9, kind: input, shape index: {}]   ;;  %s4061_s10 = inlined_call_operand.hbm [shape: f32[4096,256], index: 10, kind: input, shape index: {}]   ;;  %s4062_s11 = inlined_call_operand.hbm [shape: f32[1,256], index: 11, kind: input, shape index: {}]   ;;  %s4063_s12 = inlined_call_operand.hbm [shape: f32[1,2,4096], index: 12, kind: input, shape index: {}]   ;;  %s4064_s13 = inlined_call_operand.hbm [shape: f32[1,2,16], index: 13, kind: output, shape index: {}]  }
   0x1   :  { %19 = vsyncpa [#allocation6], 0 }
   0x2   :  { %20 = vsyncpa [#allocation9], 0 }
   0x3   :  { %21 = vsyncpa [#allocation12], 0 }
   0x4   :  { %22 = vsyncpa [#allocation15], 0 }
   0x5   :  { %23 = vsyncpa [#allocation18], 0 }
   0x6   :  { %24 = vsyncpa [#allocation21], 0  ;;  %s42_s27 = sshll.u32 %s4052_s1, 4  ;;  %s43_s27 = int_to_ptr.hbm [resolvable:$true] %s42_s27 }
   0x7   :  { %25 = vsyncpa [#allocation4], 0  ;;  %s3588_s28 = smov [#allocation5]   ;;  %s63_s15 = sshll.u32 %s4054_s3, 4  ;;  %s64_s15 = int_to_ptr.hbm [resolvable:$true] %s63_s15 }
   0x8   :  { %s44_s29 = sshll.u32 %s3588_s28, 4  ;;  %s3589_s16 = smov [#allocation8]   ;;  %s45_s29 = int_to_ptr.vmem [resolvable:$true] %s44_s29 }
   0x9   :  { %47 = dma.hbm_to_vmem [thread:$0]  %s43_s27, 128, %s45_s29, [#allocation6]  }
   0xa   :  { %s65_s17 = sshll.u32 %s3589_s16, 4  ;;  %s3590_s18 = smov 256   ;;  %s66_s17 = int_to_ptr.vmem [resolvable:$true] %s65_s17 }
   0xb   :  { %s3591_s19 = smov 16   ;;  %s87_s21 = sshll.u32 %s4056_s5, 4  ;;  %s88_s21 = int_to_ptr.hbm [resolvable:$true] %s87_s21 }
   0xc   :  { %71 = dma.hbm_to_vmem [thread:$0]  %s64_s15, 512, %s66_s17, [#allocation9], %s3590_s18, %s3590_s18, %s3591_s19  }
   0xd   :  { %s3592_s22 = smov [#allocation11]   ;;  %s113_s25 = sshll.u32 %s4058_s7, 4  ;;  %s114_s25 = int_to_ptr.hbm [resolvable:$true] %s113_s25 }
   0xe   :  { %s89_s23 = sshll.u32 %s3592_s22, 4  ;;  %s3593_s26 = smov [#allocation14]   ;;  %s90_s23 = int_to_ptr.vmem [resolvable:$true] %s89_s23 }
   0xf   :  { %95 = dma.hbm_to_vmem [thread:$0]  %s88_s21, 512, %s90_s23, [#allocation12], %s3590_s18, %s3590_s18, %s3591_s19  }
  0x10   :  { %s115_s27 = sshll.u32 %s3593_s26, 4  ;;  %s139_s30 = sshll.u32 %s4061_s10, 4  ;;  %s116_s27 = int_to_ptr.vmem [resolvable:$true] %s115_s27  ;;  %s140_s30 = int_to_ptr.hbm [resolvable:$true] %s139_s30 }
  0x11   :  { %121 = dma.hbm_to_vmem [thread:$0]  %s114_s25, 512, %s116_s27, [#allocation15], %s3590_s18, %s3590_s18, %s3591_s19  }
  0x12   :  { %s31_s7 = sshll.u32 %s4051_s0, 4  ;;  %s3594_s15 = smov [#allocation17]   ;;  %s32_s7 = int_to_ptr.hbm [resolvable:$true] %s31_s7 }
  0x13   :  { %s141_s16 = sshll.u32 %s3594_s15, 4  ;;  %s3595_s17 = smov [#allocation2]   ;;  %s142_s16 = int_to_ptr.vmem [resolvable:$true] %s141_s16 }
  0x14   :  { %147 = dma.hbm_to_vmem [thread:$0]  %s140_s30, 131072, %s142_s16, [#allocation18], %s3590_s18, %s3590_s18, %s3591_s19  }
  0x15   :  { %s33_s10 = sshll.u32 %s3595_s17, 4  ;;  %s53_s21 = sshll.u32 %s4053_s2, 4  ;;  %s34_s10 = int_to_ptr.vmem [resolvable:$true] %s33_s10  ;;  %s54_s21 = int_to_ptr.hbm [resolvable:$true] %s53_s21 }
  0x16   :  { %36 = dma.hbm_to_vmem [thread:$0]  %s32_s7, 16, %s34_s10, [#allocation3]  }
  0x17   :  { %s77_s0 = sshll.u32 %s4055_s4, 4  ;;  %s3596_s3 = smov [#allocation7]   ;;  %s78_s0 = int_to_ptr.hbm [resolvable:$true] %s77_s0 }
  0x18   :  { %s55_s24 = sshll.u32 %s3596_s3, 4  ;;  %s3597_s25 = smov [#allocation10]   ;;  %s56_s24 = int_to_ptr.vmem [resolvable:$true] %s55_s24 }
  0x19   :  { %58 = dma.hbm_to_vmem [thread:$0]  %s54_s21, 16, %s56_s24, [#allocation6]  }
  0x1a   :  { %s79_s26 = sshll.u32 %s3597_s25, 4  ;;  %s100_s29 = sshll.u32 %s4057_s6, 4  ;;  %s80_s26 = int_to_ptr.vmem [resolvable:$true] %s79_s26  ;;  %s101_s29 = int_to_ptr.hbm [resolvable:$true] %s100_s29 }
  0x1b   :  { %82 = dma.hbm_to_vmem [thread:$0]  %s78_s0, 32, %s80_s26, [#allocation9]  }
  0x1c   :  { %s129_s5 = sshll.u32 %s4060_s9, 4  ;;  %s3598_s14 = smov [#allocation13]   ;;  %s130_s5 = int_to_ptr.hbm [resolvable:$true] %s129_s5 }
  0x1d   :  { %s102_s4 = sshll.u32 %s3598_s14, 4  ;;  %s3599_s7 = smov [#allocation16]   ;;  %s103_s4 = int_to_ptr.vmem [resolvable:$true] %s102_s4 }
  0x1e   :  { %108 = dma.hbm_to_vmem [thread:$0]  %s101_s29, 8192, %s103_s4, [#allocation12], %s3590_s18, %s3590_s18, %s3591_s19  }
  0x1f   :  { %s131_s15 = sshll.u32 %s3599_s7, 4  ;;  %s153_s6 = sshll.u32 %s4062_s11, 4  ;;  %s132_s15 = int_to_ptr.vmem [resolvable:$true] %s131_s15  ;;  %s154_s6 = int_to_ptr.hbm [resolvable:$true] %s153_s6 }
  0x20   :  { %134 = dma.hbm_to_vmem [thread:$0]  %s130_s5, 16, %s132_s15, [#allocation15]  }
  0x21   :  { %s164_s9 = sshll.u32 %s4063_s12, 4  ;;  %s3600_s20 = smov [#allocation19]   ;;  %s165_s9 = int_to_ptr.hbm [resolvable:$true] %s164_s9 }
  0x22   :  { %s155_s21 = sshll.u32 %s3600_s20, 4  ;;  %s3601_s22 = smov [#allocation20]   ;;  %s156_s21 = int_to_ptr.vmem [resolvable:$true] %s155_s21 }
  0x23   :  { %158 = dma.hbm_to_vmem [thread:$0]  %s154_s6, 32, %s156_s21, [#allocation18]  }
  0x24   :  { %s166_s18 = sshll.u32 %s3601_s22, 4  ;;  %s167_s18 = int_to_ptr.vmem [resolvable:$true] %s166_s18 }
  0x25   :  { %169 = dma.hbm_to_vmem [thread:$0]  %s165_s9, 1024, %s167_s18, [#allocation21]  }
  0x26   :  { %3572 = dma.done.wait [#allocation3], 16  }
  0x27   :  { %3573 = vsyncadd [#allocation3], 4294967280 }
  0x28   :  { %3574 = dma.done.wait [#allocation6], 144  }
  0x29   :  { %3575 = vsyncadd [#allocation6], 4294967152 }
  0x2a   :  { %3576 = dma.done.wait [#allocation9], 544  }
  0x2b   :  { %3577 = vsyncadd [#allocation9], 4294966752 }
  0x2c   :  { %3578 = dma.done.wait [#allocation12], 8704  }
  0x2d   :  { %3579 = vsyncadd [#allocation12], 4294958592 }
  0x2e   :  { %3580 = dma.done.wait [#allocation15], 528  }
  0x2f   :  { %3581 = vsyncadd [#allocation15], 4294966768 }
  0x30   :  { %3582 = dma.done.wait [#allocation18], 131104  }
  0x31   :  { %3583 = vsyncadd [#allocation18], 4294836192 }
  0x32   :  { %3584 = dma.done.wait [#allocation21], 1024  }
  0x33   :  { %3585 = vsyncadd [#allocation21], 4294966272  ;;  %vm225_vm0 = vcmask 1046528   ;;  %vm221_vm1 = vcmask 56320   ;;  %v219_v0 = vld [vmem:[#allocation5] sm:$0x7f] }
  0x34   :  { %v218_v1 = vld [vmem:[#allocation2] sm:$0x1]  ;;  %3211 = vmatpush.msk.msra.mxu1 %vm225_vm0, %v219_v0  ;;  %v220_v2 = vld [vmem:[#allocation7] sm:$0x1]  ;;  %v289_v17 = vld [vmem:[#allocation8] sm:$0xff]  ;;  %v3602_v40 = vmov -1.0  }
  0x35   :  { %3212 = vmatmul.msk.f32.vlgmr.msra.gmra.mxu1 %vm221_vm1, %v218_v1  ;;  %v291_v13 = vld [vmem:[#allocation8 + $0x10] sm:$0xff]  ;;  %v292_v14 = vld [vmem:[#allocation8 + $0x18] sm:$0xff]  ;;  %v290_v18 = vld [vmem:[#allocation8 + $0x8] sm:$0xff]  ;;  %vm299_vm7 = vcmask 130048   ;;  %s3195_s27 = sshll.u32 %s4064_s13, 4  ;;  %s3196_s27 = int_to_ptr.hbm [resolvable:$true] %s3195_s27 }
  0x36   :  { %317 = vmatpush.msrb.mxu1 %v291_v13  ;;  %337 = vmatpush.msra.mxu2 %v292_v14  ;;  %v463_v20 = vld [vmem:[#allocation13 + $0xf0] sm:$0xff]  ;;  %v464_v21 = vld [vmem:[#allocation13 + $0xf8] sm:$0xff]  ;;  %v461_v46 = vld [vmem:[#allocation13 + $0xe0] sm:$0xff] }
  0x37   :  { %501 = vmatpush.msra.mxu3 %v463_v20  ;;  %v462_v47 = vld [vmem:[#allocation13 + $0xe8] sm:$0xff]  ;;  %v459_v48 = vld [vmem:[#allocation13 + $0xd0] sm:$0xff]  ;;  %v460_v49 = vld [vmem:[#allocation13 + $0xd8] sm:$0xff] }
  0x38   :  { %318 = vmatpush.msrb.mxu1 %v289_v17  ;;  %338 = vmatpush.msra.mxu2 %v290_v18  ;;  %v457_v50 = vld [vmem:[#allocation13 + $0xc0] sm:$0xff]  ;;  %v458_v51 = vld [vmem:[#allocation13 + $0xc8] sm:$0xff]  ;;  %v496_v52 = vld [vmem:[#allocation13 + $0x1f8] sm:$0xff] }
  0x39   :  { %502 = vmatpush.msra.mxu3 %v461_v46  ;;  %v455_v53 = vld [vmem:[#allocation13 + $0xb0] sm:$0xff]  ;;  %v456_v55 = vld [vmem:[#allocation13 + $0xb8] sm:$0xff]  ;;  %v494_v56 = vld [vmem:[#allocation13 + $0x1e8] sm:$0xff] }
  0x3a   :  { %547 = vmatpush.msra.mxu1 %v464_v21  ;;  %570 = vmatpush.msrb.mxu2 %v496_v52  ;;  %v495_v54 = vld [vmem:[#allocation13 + $0x1f0] sm:$0xff]  ;;  %v453_v57 = vld [vmem:[#allocation13 + $0xa0] sm:$0xff]  ;;  %v454_v59 = vld [vmem:[#allocation13 + $0xa8] sm:$0xff] }
  0x3b   :  { %503 = vmatpush.msra.mxu3 %v459_v48  ;;  %524 = vmatpush.msra.mxu0 %v495_v54  ;;  %v493_v58 = vld [vmem:[#allocation13 + $0x1e0] sm:$0xff]  ;;  %v492_v60 = vld [vmem:[#allocation13 + $0x1d8] sm:$0xff]  ;;  %v451_v61 = vld [vmem:[#allocation13 + $0x90] sm:$0xff] }
  0x3c   :  { %548 = vmatpush.msra.mxu1 %v462_v47  ;;  %571 = vmatpush.msrb.mxu2 %v494_v56  ;;  %v491_v62 = vld [vmem:[#allocation13 + $0x1d0] sm:$0xff]  ;;  %v452_v63 = vld [vmem:[#allocation13 + $0x98] sm:$0xff]  ;;  %v490_v0 = vld [vmem:[#allocation13 + $0x1c8] sm:$0xff] }
  0x3d   :  { %504 = vmatpush.msra.mxu3 %v457_v50  ;;  %525 = vmatpush.msra.mxu0 %v493_v58  ;;  %v449_v1 = vld [vmem:[#allocation13 + $0x80] sm:$0xff]  ;;  %v443_v13 = vld [vmem:[#allocation13 + $0x50] sm:$0xff]  ;;  %v480_v20 = vld [vmem:[#allocation13 + $0x178] sm:$0xff] }
  0x3e   :  { %549 = vmatpush.msra.mxu1 %v460_v49  ;;  %572 = vmatpush.msrb.mxu2 %v492_v60  ;;  %v483_v14 = vld [vmem:[#allocation13 + $0x190] sm:$0xff]  ;;  %v441_v17 = vld [vmem:[#allocation13 + $0x40] sm:$0xff]  ;;  %v468_v49 = vld [vmem:[#allocation13 + $0x118] sm:$0xff] }
  0x3f   :  { %505 = vmatpush.msra.mxu3 %v455_v53  ;;  %526 = vmatpush.msra.mxu0 %v491_v62  ;;  %v481_v18 = vld [vmem:[#allocation13 + $0x180] sm:$0xff]  ;;  %v439_v21 = vld [vmem:[#allocation13 + $0x30] sm:$0xff] }
  0x40   :  { %550 = vmatpush.msra.mxu1 %v458_v51  ;;  %573 = vmatpush.msrb.mxu2 %v490_v0  ;;  %v702_v46 = vld [vmem:[#allocation17 + $0xe0] sm:$0xff]  ;;  %v606_v50 = vld [vmem:[%s4059_s8 + $0x68] sm:$0xff]  ;;  %v605_v56 = vld [vmem:[%s4059_s8 + $0x60] sm:$0xff] }
  0x41   :  { %506 = vmatpush.msra.mxu3 %v453_v57  ;;  %v469_v48 = vld [vmem:[#allocation13 + $0x120] sm:$0xff]  ;;  %v700_v51 = vld [vmem:[#allocation17 + $0xd0] sm:$0xff] }
  0x42   :  { %551 = vmatpush.msra.mxu1 %v456_v55  ;;  %v467_v54 = vld [vmem:[#allocation13 + $0x110] sm:$0xff]  ;;  %v466_v55 = vld [vmem:[#allocation13 + $0x108] sm:$0xff]  ;;  %v465_v60 = vld [vmem:[#allocation13 + $0x100] sm:$0xff] }
  0x43   :  { %507 = vmatpush.msra.mxu3 %v451_v61  ;;  %v698_v57 = vld [vmem:[#allocation17 + $0xc0] sm:$0xff]  ;;  %v736_v58 = vld [vmem:[#allocation17 + $0x1f0] sm:$0xff] }
  0x44   :  { %552 = vmatpush.msra.mxu1 %v454_v59  ;;  %v604_v62 = vld [vmem:[%s4059_s8 + $0x58] sm:$0xff]  ;;  %v696_v0 = vld [vmem:[#allocation17 + $0xb0] sm:$0xff] }
  0x45   :  { %508 = vmatpush.msra.mxu3 %v449_v1 }
  0x46   :  { %553 = vmatpush.msra.mxu1 %v452_v63  ;;  %v624_v63 = vld [vmem:[%s4059_s8 + $0xf8] sm:$0xff] }
  0xb2   :  { %v246_v3 = vpop.f32.mrf.mxu1 }
  0xb3   :  { %v247_v4 = vadd.f32 %v246_v3, %v220_v2  ;;  %v489_v2 = vld [vmem:[#allocation13 + $0x1c0] sm:$0xff]  ;;  %v450_v3 = vld [vmem:[#allocation13 + $0x88] sm:$0xff] }
  0xb4   :  { %527 = vmatpush.msra.mxu0 %v489_v2  ;;  %554 = vmatpush.msra.mxu1 %v450_v3  ;;  %v734_v3 = vld [vmem:[#allocation17 + $0x1e0] sm:$0xff] }
  0xb5   :  { %v250_v5 = vmul.f32 0.70710677, %v247_v4  ;;  %v249_v43 = vmul.f32 0.5, %v247_v4  ;;  %v488_v4 = vld [vmem:[#allocation13 + $0x1b8] sm:$0xff] }
  0xb6   :  { %574 = vmatpush.msrb.mxu2 %v488_v4  ;;  %v603_v4 = vld [vmem:[%s4059_s8 + $0x50] sm:$0xff] }
  0xb7   :  { %v253_v6 = vand.u32 2147483647, %v250_v5  ;;  %vm251_vm6 = vcmp.ge.f32.partialorder %v250_v5, 0.0  ;;  %v447_v5 = vld [vmem:[#allocation13 + $0x70] sm:$0xff] }
  0xb8   :  { %v252_v41 = vsel %vm251_vm6, 1.0, %v3602_v40  ;;  %509 = vmatpush.msra.mxu3 %v447_v5  ;;  %v623_v5 = vld [vmem:[%s4059_s8 + $0xf0] sm:$0xff] }
  0xb9   :  { %v254_v7 = vmul.f32 0.3275911, %v253_v6  ;;  %v280_v25 = vsub.f32 0.0, %v253_v6 }
  0xbb   :  { %v255_v8 = vadd.f32 1.0, %v254_v7  ;;  %v281_v28 = vmul.f32 %v280_v25, %v253_v6  ;;  %v487_v6 = vld [vmem:[#allocation13 + $0x1b0] sm:$0xff]  ;;  %v448_v7 = vld [vmem:[#allocation13 + $0x78] sm:$0xff]  ;;  %v437_v25 = vld [vmem:[#allocation13 + $0x20] sm:$0xff] }
  0xbc   :  { %528 = vmatpush.msra.mxu0 %v487_v6  ;;  %555 = vmatpush.msra.mxu1 %v448_v7  ;;  %v694_v6 = vld [vmem:[#allocation17 + $0xa0] sm:$0xff] }
  0xbd   :  { %3231 = vrcp.f32 %v255_v8  ;;  %v267_v12 = vand.u32 2147483648, %v255_v8  ;;  %v265_v16 = vand.u32 2147483647, %v255_v8  ;;  %vm261_vm3 = vweird.f32 %v255_v8 }
  0xbe   :  { %v282_v31 = vmul.f32 1.442695, %v281_v28  ;;  %v3726_v28 = vld [vmem:[#allocation10] sm:$0x3] }
  0xbf   :  { %v268_v22 = vor.u32 1.1754944e-38, %v267_v12  ;;  %vm266_vm5 = vcmp.eq.f32.partialorder %v265_v16, 8.507059e+37  ;;  %v484_v12 = vld [vmem:[#allocation13 + $0x198] sm:$0xff]  ;;  %v482_v16 = vld [vmem:[#allocation13 + $0x188] sm:$0xff]  ;;  %v296_v53 = vperm.slane %v3726_v28, 1 }
  0xc0   :  { %3233 = vpow2.f32 %v282_v31  ;;  %v475_v31 = vld [vmem:[#allocation13 + $0x150] sm:$0xff] }
  0xc3   :  { %v3232_v9 = vpop.eup %3231 }
  0xc4   :  { %v257_v10 = vmul.f32 %v3232_v9, %v255_v8  ;;  %vm262_vm2 = vweird.f32 %v3232_v9  ;;  %v486_v8 = vld [vmem:[#allocation13 + $0x1a8] sm:$0xff] }
  0xc5   :  { %vm263_vm4 = vmor %vm261_vm3, %vm262_vm2  ;;  %575 = vmatpush.msrb.mxu2 %v486_v8 }
  0xc6   :  { %v258_v11 = vsub.f32 1.0, %v257_v10  ;;  %v3234_v37 = vpop.eup %3233  ;;  %v485_v10 = vld [vmem:[#allocation13 + $0x1a0] sm:$0xff] }
  0xc7   :  { %529 = vmatpush.msra.mxu0 %v485_v10  ;;  %576 = vmatpush.msrb.mxu2 %v484_v12  ;;  %v602_v10 = vld [vmem:[%s4059_s8 + $0x48] sm:$0xff] }
  0xc8   :  { %v259_v15 = vmul.f32 %v3232_v9, %v258_v11  ;;  %v446_v11 = vld [vmem:[#allocation13 + $0x68] sm:$0xff]  ;;  %v692_v12 = vld [vmem:[#allocation17 + $0x90] sm:$0xff] }
  0xc9   :  { %556 = vmatpush.msra.mxu1 %v446_v11  ;;  %530 = vmatpush.msra.mxu0 %v483_v14  ;;  %v622_v11 = vld [vmem:[%s4059_s8 + $0xe8] sm:$0xff] }
  0xca   :  { %v260_v19 = vadd.f32 %v3232_v9, %v259_v15  ;;  %v444_v15 = vld [vmem:[#allocation13 + $0x58] sm:$0xff]  ;;  %577 = vmatpush.msrb.mxu2 %v482_v16  ;;  %v621_v16 = vld [vmem:[%s4059_s8 + $0xe0] sm:$0xff] }
  0xcb   :  { %557 = vmatpush.msra.mxu1 %v444_v15  ;;  %531 = vmatpush.msra.mxu0 %v481_v18  ;;  %v601_v15 = vld [vmem:[%s4059_s8 + $0x40] sm:$0xff]  ;;  %v728_v18 = vld [vmem:[#allocation17 + $0x1b0] sm:$0xff] }
  0xcc   :  { %v264_v23 = vsel %vm263_vm4, %v3232_v9, %v260_v19  ;;  %v445_v9 = vld [vmem:[#allocation13 + $0x60] sm:$0xff]  ;;  %v442_v19 = vld [vmem:[#allocation13 + $0x48] sm:$0xff]  ;;  %578 = vmatpush.msrb.mxu2 %v480_v20 }
  0xcd   :  { %v269_v24 = vsel %vm266_vm5, %v268_v22, %v264_v23  ;;  %510 = vmatpush.msra.mxu3 %v445_v9  ;;  %558 = vmatpush.msra.mxu1 %v442_v19  ;;  %v479_v22 = vld [vmem:[#allocation13 + $0x170] sm:$0xff]  ;;  %v440_v23 = vld [vmem:[#allocation13 + $0x38] sm:$0xff]  ;;  %v600_v20 = vld [vmem:[%s4059_s8 + $0x38] sm:$0xff] }
  0xce   :  { %v271_v26 = vmul.f32 1.0614054, %v269_v24  ;;  %532 = vmatpush.msra.mxu0 %v479_v22  ;;  %v732_v9 = vld [vmem:[#allocation17 + $0x1d0] sm:$0xff] }
  0xcf   :  { %511 = vmatpush.msra.mxu3 %v443_v13  ;;  %559 = vmatpush.msra.mxu1 %v440_v23  ;;  %v730_v13 = vld [vmem:[#allocation17 + $0x1c0] sm:$0xff]  ;;  %v688_v22 = vld [vmem:[#allocation17 + $0x70] sm:$0xff] }
  0xd0   :  { %v272_v27 = vadd.f32 -1.4531521, %v271_v26  ;;  %v477_v26 = vld [vmem:[#allocation13 + $0x160] sm:$0xff] }
  0xd1   :  { %512 = vmatpush.msra.mxu3 %v441_v17  ;;  %533 = vmatpush.msra.mxu0 %v477_v26  ;;  %v690_v17 = vld [vmem:[#allocation17 + $0x80] sm:$0xff]  ;;  %v619_v26 = vld [vmem:[%s4059_s8 + $0xd0] sm:$0xff] }
  0xd2   :  { %v273_v29 = vmul.f32 %v272_v27, %v269_v24  ;;  %v438_v27 = vld [vmem:[#allocation13 + $0x28] sm:$0xff] }
  0xd3   :  { %513 = vmatpush.msra.mxu3 %v439_v21  ;;  %560 = vmatpush.msra.mxu1 %v438_v27  ;;  %v620_v21 = vld [vmem:[%s4059_s8 + $0xd8] sm:$0xff] }
  0xd4   :  { %v274_v30 = vadd.f32 1.4214138, %v273_v29  ;;  %v476_v29 = vld [vmem:[#allocation13 + $0x158] sm:$0xff]  ;;  %534 = vmatpush.msra.mxu0 %v475_v31  ;;  %v726_v23 = vld [vmem:[#allocation17 + $0x1a0] sm:$0xff] }
  0xd5   :  { %514 = vmatpush.msra.mxu3 %v437_v25  ;;  %v599_v25 = vld [vmem:[%s4059_s8 + $0x30] sm:$0xff]  ;;  %v686_v27 = vld [vmem:[#allocation17 + $0x60] sm:$0xff]  ;;  %v598_v31 = vld [vmem:[%s4059_s8 + $0x28] sm:$0xff] }
  0xd6   :  { %v275_v32 = vmul.f32 %v274_v30, %v269_v24  ;;  %v435_v30 = vld [vmem:[#allocation13 + $0x10] sm:$0xff] }
  0xd7   :  { %515 = vmatpush.msra.mxu3 %v435_v30 }
  0xd8   :  { %v276_v33 = vadd.f32 -0.28449672, %v275_v32  ;;  %v436_v32 = vld [vmem:[#allocation13 + $0x18] sm:$0xff] }
  0xd9   :  { %561 = vmatpush.msra.mxu1 %v436_v32  ;;  %v618_v32 = vld [vmem:[%s4059_s8 + $0xc8] sm:$0xff] }
  0xda   :  { %v277_v34 = vmul.f32 %v276_v33, %v269_v24  ;;  %v474_v33 = vld [vmem:[#allocation13 + $0x148] sm:$0xff] }
  0xdc   :  { %v278_v35 = vadd.f32 0.2548296, %v277_v34  ;;  %v295_v34 = vperm.slane %v3726_v28, 0 }
  0xde   :  { %v279_v36 = vmul.f32 %v278_v35, %v269_v24  ;;  %v478_v24 = vld [vmem:[#allocation13 + $0x168] sm:$0xff]  ;;  %v433_v35 = vld [vmem:[#allocation13] sm:$0xff] }
  0xdf   :  { %579 = vmatpush.msrb.mxu2 %v478_v24  ;;  %516 = vmatpush.msra.mxu3 %v433_v35 }
  0xe0   :  { %v284_v38 = vmul.f32 %v3234_v37, %v279_v36  ;;  %v473_v36 = vld [vmem:[#allocation13 + $0x140] sm:$0xff]  ;;  %v434_v37 = vld [vmem:[#allocation13 + $0x8] sm:$0xff] }
  0xe1   :  { %580 = vmatpush.msrb.mxu2 %v476_v29  ;;  %535 = vmatpush.msra.mxu0 %v473_v36  ;;  %v724_v29 = vld [vmem:[#allocation17 + $0x190] sm:$0xff]  ;;  %v597_v36 = vld [vmem:[%s4059_s8 + $0x20] sm:$0xff] }
  0xe2   :  { %v285_v39 = vsub.f32 1.0, %v284_v38  ;;  %v472_v38 = vld [vmem:[#allocation13 + $0x138] sm:$0xff]  ;;  %562 = vmatpush.msra.mxu1 %v434_v37  ;;  %v617_v37 = vld [vmem:[%s4059_s8 + $0xc0] sm:$0xff] }
  0xe3   :  { %581 = vmatpush.msrb.mxu2 %v474_v33  ;;  %v684_v33 = vld [vmem:[#allocation17 + $0x50] sm:$0xff] }
  0xe4   :  { %v286_v42 = vmul.f32 %v285_v39, %v252_v41  ;;  %v608_v39 = vld [vmem:[%s4059_s8 + $0x78] sm:$0xff]  ;;  %v704_v41 = vld [vmem:[#allocation17 + $0xf0] sm:$0xff] }
  0xe5   :  { %582 = vmatpush.msrb.mxu2 %v472_v38  ;;  %626 = vmatpush.msrb.mxu3 %v608_v39  ;;  %v682_v38 = vld [vmem:[#allocation17 + $0x40] sm:$0xff] }
  0xe6   :  { %v287_v44 = vadd.f32 1.0, %v286_v42  ;;  %v471_v42 = vld [vmem:[#allocation13 + $0x130] sm:$0xff] }
  0xe7   :  { %536 = vmatpush.msra.mxu0 %v471_v42 }
  0xe8   :  { %v288_v45 = vmul.f32 %v287_v44, %v249_v43  ;;  %v470_v43 = vld [vmem:[#allocation13 + $0x128] sm:$0xff] }
  0xe9   :  { %583 = vmatpush.msrb.mxu2 %v470_v43  ;;  %537 = vmatpush.msra.mxu0 %v469_v48  ;;  %v718_v48 = vld [vmem:[#allocation17 + $0x160] sm:$0xff] }
  0xea   :  { %3213 = vmatmul.msk.f32.vlgmr.msrb.gmra.mxu1 %vm299_vm7, %v288_v45  ;;  %3214 = vmatmul.msk.f32.vlgmr.msra.gmra.mxu2 %vm299_vm7, %v288_v45  ;;  %v607_v45 = vld [vmem:[%s4059_s8 + $0x70] sm:$0xff] }
  0xeb   :  { %1785 = vmatpush.msrb.mxu1 %v704_v41  ;;  %627 = vmatpush.msrb.mxu3 %v607_v45  ;;  %v720_v41 = vld [vmem:[#allocation17 + $0x170] sm:$0xff]  ;;  %v616_v45 = vld [vmem:[%s4059_s8 + $0xb8] sm:$0xff] }
  0xec   :  { %584 = vmatpush.msrb.mxu2 %v468_v49  ;;  %538 = vmatpush.msra.mxu0 %v467_v54  ;;  %v678_v54 = vld [vmem:[#allocation17 + $0x20] sm:$0xff] }
  0xed   :  { %1786 = vmatpush.msrb.mxu1 %v702_v46  ;;  %628 = vmatpush.msrb.mxu3 %v606_v50  ;;  %v680_v46 = vld [vmem:[#allocation17 + $0x30] sm:$0xff] }
  0xee   :  { %585 = vmatpush.msrb.mxu2 %v466_v55  ;;  %539 = vmatpush.msra.mxu0 %v465_v60  ;;  %v594_v60 = vld [vmem:[%s4059_s8 + $0x8] sm:$0xff] }
  0xef   :  { %1787 = vmatpush.msrb.mxu1 %v700_v51  ;;  %629 = vmatpush.msrb.mxu3 %v605_v56  ;;  %v595_v51 = vld [vmem:[%s4059_s8 + $0x10] sm:$0xff] }
  0xf0   :  { %1805 = vmatpush.msra.mxu2 %v736_v58  ;;  %646 = vmatpush.msrb.mxu0 %v624_v63 }
  0xf1   :  { %1788 = vmatpush.msrb.mxu1 %v698_v57  ;;  %630 = vmatpush.msrb.mxu3 %v604_v62  ;;  %v716_v57 = vld [vmem:[#allocation17 + $0x150] sm:$0xff] }
  0xf2   :  { %1806 = vmatpush.msra.mxu2 %v734_v3  ;;  %647 = vmatpush.msrb.mxu0 %v623_v5  ;;  %v714_v3 = vld [vmem:[#allocation17 + $0x140] sm:$0xff] }
  0xf3   :  { %1789 = vmatpush.msrb.mxu1 %v696_v0  ;;  %631 = vmatpush.msrb.mxu3 %v603_v4 }
  0xf4   :  { %1807 = vmatpush.msra.mxu2 %v732_v9  ;;  %648 = vmatpush.msrb.mxu0 %v622_v11  ;;  %v674_v9 = vld [vmem:[#allocation17] sm:$0xff] }
  0xf5   :  { %1790 = vmatpush.msrb.mxu1 %v694_v6  ;;  %632 = vmatpush.msrb.mxu3 %v602_v10  ;;  %v593_v6 = vld [vmem:[%s4059_s8] sm:$0xff] }
  0xf6   :  { %1808 = vmatpush.msra.mxu2 %v730_v13  ;;  %649 = vmatpush.msrb.mxu0 %v621_v16  ;;  %v710_v16 = vld [vmem:[#allocation17 + $0x120] sm:$0xff] }
  0xf7   :  { %1791 = vmatpush.msrb.mxu1 %v692_v12  ;;  %633 = vmatpush.msrb.mxu3 %v601_v15  ;;  %v712_v12 = vld [vmem:[#allocation17 + $0x130] sm:$0xff]  ;;  %v612_v15 = vld [vmem:[%s4059_s8 + $0x98] sm:$0xff] }
  0xf8   :  { %1809 = vmatpush.msra.mxu2 %v728_v18  ;;  %650 = vmatpush.msrb.mxu0 %v620_v21 }
  0xf9   :  { %1792 = vmatpush.msrb.mxu1 %v690_v17  ;;  %634 = vmatpush.msrb.mxu3 %v600_v20 }
  0xfa   :  { %1810 = vmatpush.msra.mxu2 %v726_v23  ;;  %651 = vmatpush.msrb.mxu0 %v619_v26  ;;  %v610_v23 = vld [vmem:[%s4059_s8 + $0x88] sm:$0xff] }
  0xfb   :  { %1793 = vmatpush.msrb.mxu1 %v688_v22  ;;  %635 = vmatpush.msrb.mxu3 %v599_v25  ;;  %v708_v22 = vld [vmem:[#allocation17 + $0x110] sm:$0xff] }
  0xfc   :  { %1811 = vmatpush.msra.mxu2 %v724_v29  ;;  %652 = vmatpush.msrb.mxu0 %v618_v32  ;;  %v609_v32 = vld [vmem:[%s4059_s8 + $0x80] sm:$0xff] }
  0xfd   :  { %1794 = vmatpush.msrb.mxu1 %v686_v27  ;;  %636 = vmatpush.msrb.mxu3 %v598_v31  ;;  %v706_v27 = vld [vmem:[#allocation17 + $0x100] sm:$0xff] }
  0xfe   :  { %653 = vmatpush.msrb.mxu0 %v617_v37 }
  0xff   :  { %1795 = vmatpush.msrb.mxu1 %v684_v33  ;;  %637 = vmatpush.msrb.mxu3 %v597_v36 }
 0x100   :  { %654 = vmatpush.msrb.mxu0 %v616_v45 }
 0x101   :  { %1796 = vmatpush.msrb.mxu1 %v682_v38 }
 0x103   :  { %1797 = vmatpush.msrb.mxu1 %v680_v46 }
 0x105   :  { %1798 = vmatpush.msrb.mxu1 %v678_v54 }
 0x167   :  { %v320_v44 = vpop.f32.mrf.mxu1 }
 0x168   :  { %v3735_v47 = vadd.f32 %v320_v44, %v295_v34  ;;  %v722_v34 = vld [vmem:[#allocation17 + $0x180] sm:$0xff] }
 0x169   :  { %1812 = vmatpush.msra.mxu2 %v722_v34  ;;  %v596_v44 = vld [vmem:[%s4059_s8 + $0x18] sm:$0xff] }
 0x16a   :  { %v3741_v52 = vmul.f32 0.70710677, %v3735_v47  ;;  %638 = vmatpush.msrb.mxu3 %v596_v44  ;;  %v343_v54 = vmul.f32 0.5, %v3735_v47 }
 0x16b   :  { %1813 = vmatpush.msra.mxu2 %v720_v41 }
 0x16c   :  { %v3748_v59 = vand.u32 2147483647, %v3741_v52  ;;  %639 = vmatpush.msrb.mxu3 %v595_v51  ;;  %vm347_vm0 = vcmp.ge.f32.partialorder %v3741_v52, 0.0  ;;  %v423_v52 = vld [vmem:[#allocation11] sm:$0xff] }
 0x16d   :  { %v340_v61 = vpop.f32.mrf.mxu2  ;;  %1814 = vmatpush.msra.mxu2 %v718_v48 }
 0x16e   :  { %v353_v1 = vmul.f32 0.3275911, %v3748_v59  ;;  %v3757_v2 = vadd.f32 %v340_v61, %v296_v53  ;;  %v615_v53 = vld [vmem:[%s4059_s8 + $0xb0] sm:$0xff]  ;;  %v614_v61 = vld [vmem:[%s4059_s8 + $0xa8] sm:$0xff]  ;;  %v405_v63 = vsub.f32 0.0, %v3748_v59  ;;  %640 = vmatpush.msrb.mxu3 %v594_v60 }
 0x16f   :  { %655 = vmatpush.msrb.mxu0 %v615_v53  ;;  %1815 = vmatpush.msra.mxu2 %v716_v57 }
 0x170   :  { %v3765_v7 = vadd.f32 1.0, %v353_v1  ;;  %v3768_v8 = vmul.f32 0.70710677, %v3757_v2  ;;  %v676_v1 = vld [vmem:[#allocation17 + $0x10] sm:$0xff]  ;;  %641 = vmatpush.msrb.mxu3 %v593_v6  ;;  %v407_v17 = vmul.f32 %v405_v63, %v3748_v59  ;;  %v344_v47 = vmul.f32 0.5, %v3757_v2 }
 0x171   :  { %656 = vmatpush.msrb.mxu0 %v614_v61  ;;  %1799 = vmatpush.msrb.mxu1 %v676_v1  ;;  %v768_v1 = vld [vmem:[#allocation17 + $0x2f0] sm:$0xff] }
 0x172   :  { %3235 = vrcp.f32 %v3765_v7  ;;  %v3778_v14 = vand.u32 2147483647, %v3768_v8  ;;  %v368_v39 = vand.u32 2147483648, %v3765_v7  ;;  %v366_v43 = vand.u32 2147483647, %v3765_v7  ;;  %1816 = vmatpush.msra.mxu2 %v714_v3  ;;  %v832_v3 = vld [vmem:[#allocation17 + $0x4f0] sm:$0xff] }
 0x173   :  { %vm362_vm9 = vweird.f32 %v3765_v7  ;;  %1800 = vmatpush.msrb.mxu1 %v674_v9  ;;  %vm348_vm1 = vcmp.ge.f32.partialorder %v3768_v8, 0.0  ;;  %v766_v8 = vld [vmem:[#allocation17 + $0x2e0] sm:$0xff]  ;;  %v828_v9 = vld [vmem:[#allocation17 + $0x4d0] sm:$0xff] }
 0x174   :  { %v354_v19 = vmul.f32 0.3275911, %v3778_v14  ;;  %v369_v55 = vor.u32 1.1754944e-38, %v368_v39  ;;  %vm367_vm11 = vcmp.eq.f32.partialorder %v366_v43, 8.507059e+37  ;;  %1817 = vmatpush.msra.mxu2 %v712_v12  ;;  %v406_v26 = vsub.f32 0.0, %v3778_v14  ;;  %v425_v12 = vld [vmem:[#allocation11 + $0x10] sm:$0xff] }
 0x175   :  { %v350_v60 = vsel %vm348_vm1, 1.0, %v3602_v40 }
 0x176   :  { %v3793_v24 = vadd.f32 1.0, %v354_v19  ;;  %v611_v19 = vld [vmem:[%s4059_s8 + $0x90] sm:$0xff]  ;;  %1818 = vmatpush.msra.mxu2 %v710_v16  ;;  %v408_v34 = vmul.f32 %v406_v26, %v3778_v14  ;;  %v349_v14 = vsel %vm347_vm0, 1.0, %v3602_v40  ;;  %v864_v16 = vld [vmem:[#allocation17 + $0x5f0] sm:$0xff] }
 0x177   :  { %v426_v26 = vld [vmem:[#allocation11 + $0x18] sm:$0xff] }
 0x178   :  { %v3236_v28 = vpop.eup %3235  ;;  %3237 = vrcp.f32 %v3793_v24  ;;  %v383_v5 = vand.u32 2147483648, %v3793_v24  ;;  %v381_v11 = vand.u32 2147483647, %v3793_v24  ;;  %vm377_vm13 = vweird.f32 %v3793_v24  ;;  %1819 = vmatpush.msra.mxu2 %v708_v22  ;;  %v758_v22 = vld [vmem:[#allocation17 + $0x2a0] sm:$0xff] }
 0x179   :  { %v358_v30 = vmul.f32 %v3236_v28, %v3765_v7  ;;  %vm363_vm8 = vweird.f32 %v3236_v28  ;;  %v613_v7 = vld [vmem:[%s4059_s8 + $0xa0] sm:$0xff]  ;;  %v411_v39 = vmul.f32 1.442695, %v408_v34  ;;  %v856_v34 = vld [vmem:[#allocation17 + $0x5b0] sm:$0xff]  ;;  %s3603_s8 = smov [#allocation22]  }
 0x17a   :  { %vm364_vm10 = vmor %vm362_vm9, %vm363_vm8  ;;  %657 = vmatpush.msrb.mxu0 %v613_v7  ;;  %v384_v21 = vor.u32 1.1754944e-38, %v383_v5  ;;  %vm382_vm15 = vcmp.eq.f32.partialorder %v381_v11, 8.507059e+37  ;;  %1820 = vmatpush.msra.mxu2 %v706_v27  ;;  %v830_v5 = vld [vmem:[#allocation17 + $0x4e0] sm:$0xff]  ;;  %v764_v7 = vld [vmem:[#allocation17 + $0x2d0] sm:$0xff]  ;;  %s3193_s24 = sshll.u32 %s3603_s8, 4  ;;  %s3194_s24 = int_to_ptr.vmem [resolvable:$true] %s3193_s24 }
 0x17b   :  { %v359_v35 = vsub.f32 1.0, %v358_v30  ;;  %v796_v27 = vld [vmem:[#allocation17 + $0x3d0] sm:$0xff] }
 0x17c   :  { %658 = vmatpush.msrb.mxu0 %v612_v15  ;;  %v826_v15 = vld [vmem:[#allocation17 + $0x4c0] sm:$0xff] }
 0x17d   :  { %v360_v42 = vmul.f32 %v3236_v28, %v359_v35 }
 0x17e   :  { %v3823_v49 = vpop.eup %3237  ;;  %659 = vmatpush.msrb.mxu0 %v611_v19  ;;  %v800_v19 = vld [vmem:[#allocation17 + $0x3f0] sm:$0xff] }
 0x17f   :  { %v361_v50 = vadd.f32 %v3236_v28, %v360_v42  ;;  %v373_v56 = vmul.f32 %v3823_v49, %v3793_v24  ;;  %vm378_vm12 = vweird.f32 %v3823_v49 }
 0x180   :  { %vm379_vm14 = vmor %vm377_vm13, %vm378_vm12  ;;  %660 = vmatpush.msrb.mxu0 %v610_v23  ;;  %v822_v23 = vld [vmem:[#allocation17 + $0x4a0] sm:$0xff]  ;;  %vm3186_vm12 = vcmask 123904  }
 0x181   :  { %v365_v58 = vsel %vm364_vm10, %v3236_v28, %v361_v50  ;;  %v374_v0 = vsub.f32 1.0, %v373_v56  ;;  %v409_v28 = vmul.f32 1.442695, %v407_v17 }
 0x182   :  { %v3841_v62 = vsel %vm367_vm11, %v369_v55, %v365_v58  ;;  %661 = vmatpush.msrb.mxu0 %v609_v32  ;;  %v794_v32 = vld [vmem:[#allocation17 + $0x3c0] sm:$0xff] }
 0x183   :  { %v387_v4 = vmul.f32 1.0614054, %v3841_v62  ;;  %v375_v10 = vmul.f32 %v3823_v49, %v374_v0  ;;  %3239 = vpow2.f32 %v409_v28  ;;  %v820_v28 = vld [vmem:[#allocation17 + $0x490] sm:$0xff] }
 0x184   :  { %3241 = vpow2.f32 %v411_v39  ;;  %v750_v39 = vld [vmem:[#allocation17 + $0x260] sm:$0xff] }
 0x185   :  { %v389_v13 = vadd.f32 -1.4531521, %v387_v4  ;;  %v376_v18 = vadd.f32 %v3823_v49, %v375_v10  ;;  %v424_v10 = vld [vmem:[#allocation11 + $0x8] sm:$0xff] }
 0x187   :  { %v391_v20 = vmul.f32 %v389_v13, %v3841_v62  ;;  %v380_v59 = vsel %vm379_vm14, %v3823_v49, %v376_v18  ;;  %v762_v13 = vld [vmem:[#allocation17 + $0x2c0] sm:$0xff]  ;;  %v760_v18 = vld [vmem:[#allocation17 + $0x2b0] sm:$0xff] }
 0x188   :  { %v385_v25 = vsel %vm382_vm15, %v384_v21, %v380_v59  ;;  %v862_v21 = vld [vmem:[#allocation17 + $0x5e0] sm:$0xff] }
 0x189   :  { %v393_v24 = vadd.f32 1.4214138, %v391_v20  ;;  %v388_v29 = vmul.f32 1.0614054, %v385_v25  ;;  %v3240_v43 = vpop.eup %3239  ;;  %v824_v20 = vld [vmem:[#allocation17 + $0x4b0] sm:$0xff]  ;;  %v798_v59 = vld [vmem:[#allocation17 + $0x3e0] sm:$0xff] }
 0x18a   :  { %v3242_v53 = vpop.eup %3241 }
 0x18b   :  { %v395_v30 = vmul.f32 %v393_v24, %v3841_v62  ;;  %v390_v31 = vadd.f32 -1.4531521, %v388_v29  ;;  %v860_v24 = vld [vmem:[#allocation17 + $0x5d0] sm:$0xff]  ;;  %v858_v29 = vld [vmem:[#allocation17 + $0x5c0] sm:$0xff] }
 0x18d   :  { %v397_v33 = vadd.f32 -0.28449672, %v395_v30  ;;  %v392_v35 = vmul.f32 %v390_v31, %v385_v25  ;;  %v754_v31 = vld [vmem:[#allocation17 + $0x280] sm:$0xff] }
 0x18f   :  { %v399_v36 = vmul.f32 %v397_v33, %v3841_v62  ;;  %v394_v37 = vadd.f32 1.4214138, %v392_v35  ;;  %v818_v33 = vld [vmem:[#allocation17 + $0x480] sm:$0xff]  ;;  %v752_v35 = vld [vmem:[#allocation17 + $0x270] sm:$0xff] }
 0x191   :  { %v401_v38 = vadd.f32 0.2548296, %v399_v36  ;;  %v396_v41 = vmul.f32 %v394_v37, %v385_v25  ;;  %v792_v36 = vld [vmem:[#allocation17 + $0x3b0] sm:$0xff] }
 0x192   :  { %v816_v37 = vld [vmem:[#allocation17 + $0x470] sm:$0xff] }
 0x193   :  { %v403_v42 = vmul.f32 %v401_v38, %v3841_v62  ;;  %v398_v44 = vadd.f32 -0.28449672, %v396_v41  ;;  %v666_v62 = vld [vmem:[#allocation20] sm:$0xff] }
 0x194   :  { %1712 = vst [vmem:[#allocation1] ss:$4 sm:$0xff] %v666_v62  ;;  %v854_v38 = vld [vmem:[#allocation17 + $0x5a0] sm:$0xff]  ;;  %v667_v62 = vld [vmem:[#allocation20 + $0x8] sm:$0xff] }
 0x195   :  { %v413_v45 = vmul.f32 %v3240_v43, %v403_v42  ;;  %v400_v46 = vmul.f32 %v398_v44, %v385_v25  ;;  %v790_v41 = vld [vmem:[#allocation17 + $0x3a0] sm:$0xff]  ;;  %v852_v43 = vld [vmem:[#allocation17 + $0x590] sm:$0xff]  ;;  %1714 = vst [vmem:[#allocation1 + $0x20] ss:$4 sm:$0xff] %v667_v62 }
 0x196   :  { %v814_v42 = vld [vmem:[#allocation17 + $0x460] sm:$0xff]  ;;  %v748_v44 = vld [vmem:[#allocation17 + $0x250] sm:$0xff] }
 0x197   :  { %v415_v48 = vsub.f32 1.0, %v413_v45  ;;  %v402_v49 = vadd.f32 0.2548296, %v400_v46  ;;  %v788_v45 = vld [vmem:[#allocation17 + $0x390] sm:$0xff]  ;;  %v914_v62 = vld [vmem:[#allocation17 + $0x780] sm:$0xff] }
 0x198   :  { %v812_v46 = vld [vmem:[#allocation17 + $0x450] sm:$0xff] }
 0x199   :  { %v417_v50 = vmul.f32 %v415_v48, %v349_v14  ;;  %v404_v51 = vmul.f32 %v402_v49, %v385_v25  ;;  %v756_v25 = vld [vmem:[#allocation17 + $0x290] sm:$0xff]  ;;  %v850_v48 = vld [vmem:[#allocation17 + $0x580] sm:$0xff] }
 0x19a   :  { %v746_v14 = vld [vmem:[#allocation17 + $0x240] sm:$0xff] }
 0x19b   :  { %v419_v55 = vadd.f32 1.0, %v417_v50  ;;  %v414_v56 = vmul.f32 %v3242_v53, %v404_v51  ;;  %v786_v49 = vld [vmem:[#allocation17 + $0x380] sm:$0xff]  ;;  %v848_v51 = vld [vmem:[#allocation17 + $0x570] sm:$0xff] }
 0x19c   :  { %v810_v50 = vld [vmem:[#allocation17 + $0x440] sm:$0xff]  ;;  %v744_v53 = vld [vmem:[#allocation17 + $0x230] sm:$0xff] }
 0x19d   :  { %v3883_v57 = vmul.f32 %v419_v55, %v343_v54  ;;  %v416_v58 = vsub.f32 1.0, %v414_v56  ;;  %v784_v54 = vld [vmem:[#allocation17 + $0x370] sm:$0xff]  ;;  %v846_v56 = vld [vmem:[#allocation17 + $0x560] sm:$0xff] }
 0x19e   :  { %v808_v55 = vld [vmem:[#allocation17 + $0x430] sm:$0xff] }
 0x19f   :  { %v427_v61 = vperm.slane %v3883_v57, 0  ;;  %v418_v63 = vmul.f32 %v416_v58, %v350_v60  ;;  %v782_v58 = vld [vmem:[#allocation17 + $0x360] sm:$0xff]  ;;  %v844_v60 = vld [vmem:[#allocation17 + $0x550] sm:$0xff] }
 0x1a1   :  { %v429_v0 = vmul.f32 %v427_v61, %v423_v52  ;;  %v420_v4 = vadd.f32 1.0, %v418_v63  ;;  %v431_v17 = vmul.f32 %v427_v61, %v425_v12  ;;  %v806_v52 = vld [vmem:[#allocation17 + $0x420] sm:$0xff]  ;;  %v740_v61 = vld [vmem:[#allocation17 + $0x210] sm:$0xff] }
 0x1a2   :  { %v780_v63 = vld [vmem:[#allocation17 + $0x350] sm:$0xff]  ;;  %v958_v12 = vld [vmem:[#allocation17 + $0x8e0] sm:$0xff] }
 0x1a3   :  { %517 = vmatmul.f32.vlgmr.msra.gmra.mxu3 %v429_v0  ;;  %563 = vmatmul.f32.vlgmr.msra.gmra.mxu1 %v429_v0  ;;  %v3888_v6 = vmul.f32 %v420_v4, %v344_v47  ;;  %v804_v0 = vld [vmem:[#allocation17 + $0x410] sm:$0xff]  ;;  %v778_v47 = vld [vmem:[#allocation17 + $0x340] sm:$0xff] }
 0x1a4   :  { %1825 = vmatpush.msra.mxu3 %v768_v1  ;;  %1865 = vmatpush.msra.mxu1 %v832_v3  ;;  %v842_v1 = vld [vmem:[#allocation17 + $0x540] sm:$0xff] }
 0x1a5   :  { %v428_v11 = vperm.slane %v3888_v6, 0  ;;  %v738_v3 = vld [vmem:[#allocation17 + $0x200] sm:$0xff] }
 0x1a6   :  { %1826 = vmatpush.msra.mxu3 %v766_v8  ;;  %1866 = vmatpush.msra.mxu1 %v830_v5  ;;  %v802_v4 = vld [vmem:[#allocation17 + $0x400] sm:$0xff]  ;;  %v840_v8 = vld [vmem:[#allocation17 + $0x530] sm:$0xff]  ;;  %v3893_v5 = vld.sshfl [vmem:[#allocation1] sm:$0xff pattern:$0x73625140] }
 0x1a7   :  { %v430_v2 = vmul.f32 %v428_v11, %v424_v10  ;;  %v432_v30 = vmul.f32 %v428_v11, %v426_v26  ;;  %v838_v10 = vld [vmem:[#allocation17 + $0x520] sm:$0xff] }
 0x1a8   :  { %1827 = vmatpush.msra.mxu3 %v764_v7  ;;  %1867 = vmatpush.msra.mxu1 %v828_v9  ;;  %v960_v7 = vld [vmem:[#allocation17 + $0x8f0] sm:$0xff]  ;;  %v894_v11 = vld [vmem:[#allocation17 + $0x6e0] sm:$0xff] }
 0x1a9   :  { %540 = vmatmul.f32.vlgmr.msra.gmra.mxu0 %v430_v2  ;;  %586 = vmatmul.f32.vlgmr.msrb.gmra.mxu2 %v430_v2  ;;  %v776_v9 = vld [vmem:[#allocation17 + $0x330] sm:$0xff]  ;;  %v774_v2 = vld [vmem:[#allocation17 + $0x320] sm:$0xff] }
 0x1aa   :  { %1828 = vmatpush.msra.mxu3 %v762_v13  ;;  %1868 = vmatpush.msra.mxu1 %v826_v15  ;;  %v836_v13 = vld [vmem:[#allocation17 + $0x510] sm:$0xff]  ;;  %v990_v26 = vld [vmem:[#allocation17 + $0x9e0] sm:$0xff] }
 0x1ab   :  { %1885 = vmatpush.msrb.mxu2 %v864_v16  ;;  %520 = vmatmul.f32.gmra.mxu3 %v431_v17  ;;  %v892_v15 = vld [vmem:[#allocation17 + $0x6d0] sm:$0xff] }
 0x1ac   :  { %566 = vmatmul.f32.gmra.mxu1 %v431_v17  ;;  %1829 = vmatpush.msra.mxu3 %v760_v18  ;;  %v956_v16 = vld [vmem:[#allocation17 + $0x8d0] sm:$0xff]  ;;  %v834_v18 = vld [vmem:[#allocation17 + $0x500] sm:$0xff] }
 0x1ad   :  { %1845 = vmatpush.msra.mxu0 %v800_v19  ;;  %1869 = vmatpush.msra.mxu1 %v824_v20  ;;  %v772_v17 = vld [vmem:[#allocation17 + $0x310] sm:$0xff]  ;;  %v890_v20 = vld [vmem:[#allocation17 + $0x6c0] sm:$0xff] }
 0x1ae   :  { %1886 = vmatpush.msrb.mxu2 %v862_v21  ;;  %1830 = vmatpush.msra.mxu3 %v758_v22  ;;  %v3896_v19 = vld.sshfl [vmem:[#allocation1 + $0x8] sm:$0xff pattern:$0x73625140]  ;;  %v954_v21 = vld [vmem:[#allocation17 + $0x8c0] sm:$0xff] }
 0x1af   :  { %1846 = vmatpush.msra.mxu0 %v798_v59  ;;  %1870 = vmatpush.msra.mxu1 %v822_v23  ;;  %v992_v22 = vld [vmem:[#allocation17 + $0x9f0] sm:$0xff]  ;;  %v770_v59 = vld [vmem:[#allocation17 + $0x300] sm:$0xff] }
 0x1b0   :  { %1887 = vmatpush.msrb.mxu2 %v860_v24  ;;  %1831 = vmatpush.msra.mxu3 %v756_v25  ;;  %v888_v23 = vld [vmem:[#allocation17 + $0x6b0] sm:$0xff] }
 0x1b1   :  { %1847 = vmatpush.msra.mxu0 %v796_v27  ;;  %1871 = vmatpush.msra.mxu1 %v820_v28  ;;  %v928_v24 = vld [vmem:[#allocation17 + $0x7f0] sm:$0xff]  ;;  %v886_v27 = vld [vmem:[#allocation17 + $0x6a0] sm:$0xff] }
 0x1b2   :  { %1888 = vmatpush.msrb.mxu2 %v858_v29  ;;  %543 = vmatmul.f32.gmra.mxu0 %v432_v30  ;;  %v952_v25 = vld [vmem:[#allocation17 + $0x8b0] sm:$0xff]  ;;  %v926_v28 = vld [vmem:[#allocation17 + $0x7e0] sm:$0xff]  ;;  %v3899_v29 = vld.sshfl [vmem:[#allocation1 + $0x10] sm:$0xff pattern:$0x73625140] }
 0x1b3   :  { %589 = vmatmul.f32.gmra.mxu2 %v432_v30  ;;  %1832 = vmatpush.msra.mxu3 %v754_v31  ;;  %v950_v30 = vld [vmem:[#allocation17 + $0x8a0] sm:$0xff]  ;;  %v668_v31 = vld [vmem:[#allocation20 + $0x10] sm:$0xff] }
 0x1b4   :  { %1848 = vmatpush.msra.mxu0 %v794_v32  ;;  %1872 = vmatpush.msra.mxu1 %v818_v33  ;;  %v3901_v32 = vld.sshfl [vmem:[#allocation1 + $0x18] sm:$0xff pattern:$0x73625140]  ;;  %v988_v33 = vld [vmem:[#allocation17 + $0x9d0] sm:$0xff] }
 0x1b5   :  { %1889 = vmatpush.msrb.mxu2 %v856_v34  ;;  %642 = vmatmul.f32.vlgmr.msrb.gmra.mxu3 %v3883_v57  ;;  %v742_v57 = vld [vmem:[#allocation17 + $0x220] sm:$0xff]  ;;  %v884_v34 = vld [vmem:[#allocation17 + $0x690] sm:$0xff]  ;;  %1723 = vst [vmem:[#allocation1] ss:$4 sm:$0xff] %v668_v31 }
 0x1b6   :  { %1833 = vmatpush.msra.mxu3 %v752_v35  ;;  %1849 = vmatpush.msra.mxu0 %v792_v36  ;;  %v924_v35 = vld [vmem:[#allocation17 + $0x7d0] sm:$0xff]  ;;  %v1018_v31 = vld [vmem:[#allocation17 + $0xac0] sm:$0xff] }
 0x1b7   :  { %1873 = vmatpush.msra.mxu1 %v816_v37  ;;  %1890 = vmatpush.msrb.mxu2 %v854_v38  ;;  %v948_v36 = vld [vmem:[#allocation17 + $0x890] sm:$0xff]  ;;  %v986_v37 = vld [vmem:[#allocation17 + $0x9c0] sm:$0xff] }
 0x1b8   :  { %1834 = vmatpush.msra.mxu3 %v750_v39  ;;  %1850 = vmatpush.msra.mxu0 %v790_v41  ;;  %v882_v38 = vld [vmem:[#allocation17 + $0x680] sm:$0xff] }
 0x1b9   :  { %1874 = vmatpush.msra.mxu1 %v814_v42  ;;  %1891 = vmatpush.msrb.mxu2 %v852_v43  ;;  %v922_v39 = vld [vmem:[#allocation17 + $0x7c0] sm:$0xff]  ;;  %v984_v42 = vld [vmem:[#allocation17 + $0x9b0] sm:$0xff] }
 0x1ba   :  { %1835 = vmatpush.msra.mxu3 %v748_v44  ;;  %1851 = vmatpush.msra.mxu0 %v788_v45  ;;  %v946_v41 = vld [vmem:[#allocation17 + $0x880] sm:$0xff]  ;;  %v880_v43 = vld [vmem:[#allocation17 + $0x670] sm:$0xff] }
 0x1bb   :  { %1875 = vmatpush.msra.mxu1 %v812_v46  ;;  %1892 = vmatpush.msrb.mxu2 %v850_v48  ;;  %v920_v44 = vld [vmem:[#allocation17 + $0x7b0] sm:$0xff]  ;;  %v982_v46 = vld [vmem:[#allocation17 + $0x9a0] sm:$0xff] }
 0x1bc   :  { %662 = vmatmul.f32.vlgmr.msrb.gmra.mxu0 %v3888_v6  ;;  %1836 = vmatpush.msra.mxu3 %v746_v14  ;;  %v896_v6 = vld [vmem:[#allocation17 + $0x6f0] sm:$0xff]  ;;  %v878_v48 = vld [vmem:[#allocation17 + $0x660] sm:$0xff] }
 0x1bd   :  { %1852 = vmatpush.msra.mxu0 %v786_v49  ;;  %1876 = vmatpush.msra.mxu1 %v810_v50  ;;  %v944_v45 = vld [vmem:[#allocation17 + $0x870] sm:$0xff]  ;;  %v918_v14 = vld [vmem:[#allocation17 + $0x7a0] sm:$0xff] }
 0x1be   :  { %1893 = vmatpush.msrb.mxu2 %v848_v51  ;;  %1837 = vmatpush.msra.mxu3 %v744_v53  ;;  %v942_v49 = vld [vmem:[#allocation17 + $0x860] sm:$0xff]  ;;  %v980_v50 = vld [vmem:[#allocation17 + $0x990] sm:$0xff] }
 0x1bf   :  { %1853 = vmatpush.msra.mxu0 %v784_v54  ;;  %1877 = vmatpush.msra.mxu1 %v808_v55  ;;  %v876_v51 = vld [vmem:[#allocation17 + $0x650] sm:$0xff]  ;;  %v978_v55 = vld [vmem:[#allocation17 + $0x980] sm:$0xff] }
 0x1c0   :  { %1894 = vmatpush.msrb.mxu2 %v846_v56  ;;  %1838 = vmatpush.msra.mxu3 %v742_v57  ;;  %v916_v53 = vld [vmem:[#allocation17 + $0x790] sm:$0xff]  ;;  %v3903_v56 = vld.sshfl [vmem:[#allocation1 + $0x20] sm:$0xff pattern:$0x73625140] }
 0x1c1   :  { %1854 = vmatpush.msra.mxu0 %v782_v58  ;;  %1878 = vmatpush.msra.mxu1 %v806_v52  ;;  %v940_v54 = vld [vmem:[#allocation17 + $0x850] sm:$0xff]  ;;  %v3907_v58 = vld.sshfl [vmem:[#allocation1 + $0x30] sm:$0xff pattern:$0x73625140]  ;;  %v874_v52 = vld [vmem:[#allocation17 + $0x640] sm:$0xff] }
 0x1c2   :  { %1895 = vmatpush.msrb.mxu2 %v844_v60  ;;  %1839 = vmatpush.msra.mxu3 %v740_v61  ;;  %v3905_v57 = vld.sshfl [vmem:[#allocation1 + $0x28] sm:$0xff pattern:$0x73625140]  ;;  %v669_v60 = vld [vmem:[#allocation20 + $0x18] sm:$0xff] }
 0x1c3   :  { %1855 = vmatpush.msra.mxu0 %v780_v63  ;;  %1879 = vmatpush.msra.mxu1 %v804_v0  ;;  %v3909_v61 = vld.sshfl [vmem:[#allocation1 + $0x38] sm:$0xff pattern:$0x73625140]  ;;  %v976_v0 = vld [vmem:[#allocation17 + $0x970] sm:$0xff] }
 0x1c4   :  { %1896 = vmatpush.msrb.mxu2 %v842_v1  ;;  %1840 = vmatpush.msra.mxu3 %v738_v3  ;;  %v938_v63 = vld [vmem:[#allocation17 + $0x840] sm:$0xff]  ;;  %1724 = vst [vmem:[#allocation1 + $0x20] ss:$4 sm:$0xff] %v669_v60  ;;  %v872_v1 = vld [vmem:[#allocation17 + $0x630] sm:$0xff] }
 0x1c5   :  { %1856 = vmatpush.msra.mxu0 %v778_v47  ;;  %1880 = vmatpush.msra.mxu1 %v802_v4  ;;  %v912_v3 = vld [vmem:[#allocation17 + $0x770] sm:$0xff]  ;;  %v974_v4 = vld [vmem:[#allocation17 + $0x960] sm:$0xff] }
 0x1c6   :  { %1897 = vmatpush.msrb.mxu2 %v840_v8  ;;  %1801 = vmatmul.f32.vlgmr.msrb.gmra.mxu1 %v3893_v5  ;;  %v936_v47 = vld [vmem:[#allocation17 + $0x830] sm:$0xff]  ;;  %v870_v8 = vld [vmem:[#allocation17 + $0x620] sm:$0xff] }
 0x1c7   :  { %1905 = vmatpush.msrb.mxu3 %v896_v6  ;;  %1945 = vmatpush.msrb.mxu1 %v960_v7  ;;  %v910_v6 = vld [vmem:[#allocation17 + $0x760] sm:$0xff] }
 0x1c8   :  { %1857 = vmatpush.msra.mxu0 %v776_v9  ;;  %1898 = vmatpush.msrb.mxu2 %v838_v10  ;;  %v934_v7 = vld [vmem:[#allocation17 + $0x820] sm:$0xff]  ;;  %v972_v9 = vld [vmem:[#allocation17 + $0x950] sm:$0xff] }
 0x1c9   :  { %1906 = vmatpush.msrb.mxu3 %v894_v11  ;;  %1946 = vmatpush.msrb.mxu1 %v958_v12  ;;  %v868_v10 = vld [vmem:[#allocation17 + $0x610] sm:$0xff]  ;;  %v1074_v60 = vld [vmem:[#allocation17 + $0xc80] sm:$0xff] }
 0x1ca   :  { %1858 = vmatpush.msra.mxu0 %v774_v2  ;;  %1899 = vmatpush.msrb.mxu2 %v836_v13  ;;  %v908_v11 = vld [vmem:[#allocation17 + $0x750] sm:$0xff]  ;;  %v970_v2 = vld [vmem:[#allocation17 + $0x940] sm:$0xff] }
 0x1cb   :  { %1907 = vmatpush.msrb.mxu3 %v892_v15  ;;  %1947 = vmatpush.msrb.mxu1 %v956_v16  ;;  %v932_v12 = vld [vmem:[#allocation17 + $0x810] sm:$0xff]  ;;  %v866_v13 = vld [vmem:[#allocation17 + $0x600] sm:$0xff] }
 0x1cc   :  { %1859 = vmatpush.msra.mxu0 %v772_v17  ;;  %1900 = vmatpush.msrb.mxu2 %v834_v18  ;;  %v906_v15 = vld [vmem:[#allocation17 + $0x740] sm:$0xff]  ;;  %v968_v17 = vld [vmem:[#allocation17 + $0x930] sm:$0xff] }
 0x1cd   :  { %1821 = vmatmul.f32.vlgmr.msra.gmra.mxu2 %v3896_v19  ;;  %1908 = vmatpush.msrb.mxu3 %v890_v20  ;;  %v930_v16 = vld [vmem:[#allocation17 + $0x800] sm:$0xff]  ;;  %v1024_v18 = vld [vmem:[#allocation17 + $0xaf0] sm:$0xff] }
 0x1ce   :  { %1948 = vmatpush.msrb.mxu1 %v954_v21  ;;  %1965 = vmatpush.msra.mxu2 %v992_v22  ;;  %v1088_v20 = vld [vmem:[#allocation17 + $0xcf0] sm:$0xff]  ;;  %v966_v22 = vld [vmem:[#allocation17 + $0x920] sm:$0xff] }
 0x1cf   :  { %1860 = vmatpush.msra.mxu0 %v770_v59  ;;  %1909 = vmatpush.msrb.mxu3 %v888_v23  ;;  %v904_v21 = vld [vmem:[#allocation17 + $0x730] sm:$0xff]  ;;  %v1022_v59 = vld [vmem:[#allocation17 + $0xae0] sm:$0xff] }
 0x1d0   :  { %1949 = vmatpush.msrb.mxu1 %v952_v25  ;;  %1966 = vmatpush.msra.mxu2 %v990_v26  ;;  %v1086_v23 = vld [vmem:[#allocation17 + $0xce0] sm:$0xff]  ;;  %v964_v25 = vld [vmem:[#allocation17 + $0x910] sm:$0xff] }
 0x1d1   :  { %1925 = vmatpush.msrb.mxu0 %v928_v24  ;;  %1910 = vmatpush.msrb.mxu3 %v886_v27  ;;  %v902_v24 = vld [vmem:[#allocation17 + $0x720] sm:$0xff]  ;;  %v1020_v26 = vld [vmem:[#allocation17 + $0xad0] sm:$0xff] }
 0x1d2   :  { %1950 = vmatpush.msrb.mxu1 %v950_v30  ;;  %1967 = vmatpush.msra.mxu2 %v988_v33  ;;  %v1084_v27 = vld [vmem:[#allocation17 + $0xcd0] sm:$0xff]  ;;  %v962_v30 = vld [vmem:[#allocation17 + $0x900] sm:$0xff] }
 0x1d3   :  { %1926 = vmatpush.msrb.mxu0 %v926_v28  ;;  %1911 = vmatpush.msrb.mxu3 %v884_v34  ;;  %v900_v28 = vld [vmem:[#allocation17 + $0x710] sm:$0xff]  ;;  %v1082_v33 = vld [vmem:[#allocation17 + $0xcc0] sm:$0xff] }
 0x1d4   :  { %1951 = vmatpush.msrb.mxu1 %v948_v36  ;;  %1968 = vmatpush.msra.mxu2 %v986_v37  ;;  %v1120_v34 = vld [vmem:[#allocation17 + $0xdf0] sm:$0xff] }
 0x1d5   :  { %1927 = vmatpush.msrb.mxu0 %v924_v35  ;;  %1912 = vmatpush.msrb.mxu3 %v882_v38  ;;  %v898_v35 = vld [vmem:[#allocation17 + $0x700] sm:$0xff]  ;;  %v1016_v36 = vld [vmem:[#allocation17 + $0xab0] sm:$0xff] }
 0x1d6   :  { %1952 = vmatpush.msrb.mxu1 %v946_v41  ;;  %1969 = vmatpush.msra.mxu2 %v984_v42  ;;  %v1056_v37 = vld [vmem:[#allocation17 + $0xbf0] sm:$0xff]  ;;  %v1014_v41 = vld [vmem:[#allocation17 + $0xaa0] sm:$0xff] }
 0x1d7   :  { %1928 = vmatpush.msrb.mxu0 %v922_v39  ;;  %1913 = vmatpush.msrb.mxu3 %v880_v43  ;;  %v1080_v38 = vld [vmem:[#allocation17 + $0xcb0] sm:$0xff]  ;;  %v1118_v39 = vld [vmem:[#allocation17 + $0xde0] sm:$0xff] }
 0x1d8   :  { %1953 = vmatpush.msrb.mxu1 %v944_v45  ;;  %1970 = vmatpush.msra.mxu2 %v982_v46  ;;  %v1054_v42 = vld [vmem:[#allocation17 + $0xbe0] sm:$0xff]  ;;  %v1012_v45 = vld [vmem:[#allocation17 + $0xa90] sm:$0xff] }
 0x1d9   :  { %1929 = vmatpush.msrb.mxu0 %v920_v44  ;;  %1914 = vmatpush.msrb.mxu3 %v878_v48  ;;  %v1078_v43 = vld [vmem:[#allocation17 + $0xca0] sm:$0xff]  ;;  %v1116_v44 = vld [vmem:[#allocation17 + $0xdd0] sm:$0xff] }
 0x1da   :  { %1954 = vmatpush.msrb.mxu1 %v942_v49  ;;  %1971 = vmatpush.msra.mxu2 %v980_v50  ;;  %v1052_v46 = vld [vmem:[#allocation17 + $0xbd0] sm:$0xff]  ;;  %v3918_v49 = vld.sshfl [vmem:[#allocation1] sm:$0xff pattern:$0x73625140] }
 0x1db   :  { %1930 = vmatpush.msrb.mxu0 %v918_v14  ;;  %1915 = vmatpush.msrb.mxu3 %v876_v51  ;;  %v1076_v48 = vld [vmem:[#allocation17 + $0xc90] sm:$0xff]  ;;  %v3920_v50 = vld.sshfl [vmem:[#allocation1 + $0x10] sm:$0xff pattern:$0x73625140]  ;;  %v1114_v51 = vld [vmem:[#allocation17 + $0xdc0] sm:$0xff] }
 0x1dc   :  { %1955 = vmatpush.msrb.mxu1 %v940_v54  ;;  %1972 = vmatpush.msra.mxu2 %v978_v55  ;;  %v3916_v14 = vld.sshfl [vmem:[#allocation1 + $0x8] sm:$0xff pattern:$0x73625140]  ;;  %v3922_v54 = vld.sshfl [vmem:[#allocation1 + $0x18] sm:$0xff pattern:$0x73625140] }
 0x1dd   :  { %1931 = vmatpush.msrb.mxu0 %v916_v53  ;;  %1916 = vmatpush.msrb.mxu3 %v874_v52  ;;  %v670_v53 = vld [vmem:[#allocation20 + $0x20] sm:$0xff] }
 0x1de   :  { %1956 = vmatpush.msrb.mxu1 %v938_v63  ;;  %1973 = vmatpush.msra.mxu2 %v976_v0  ;;  %v1010_v55 = vld [vmem:[#allocation17 + $0xa80] sm:$0xff]  ;;  %1733 = vst [vmem:[#allocation1] ss:$4 sm:$0xff] %v670_v53  ;;  %v1008_v63 = vld [vmem:[#allocation17 + $0xa70] sm:$0xff] }
 0x1df   :  { %1932 = vmatpush.msrb.mxu0 %v914_v62  ;;  %1917 = vmatpush.msrb.mxu3 %v872_v1  ;;  %v1050_v52 = vld [vmem:[#allocation17 + $0xbc0] sm:$0xff]  ;;  %v1112_v62 = vld [vmem:[#allocation17 + $0xdb0] sm:$0xff] }
 0x1e0   :  { %1957 = vmatpush.msrb.mxu1 %v936_v47  ;;  %1974 = vmatpush.msra.mxu2 %v974_v4  ;;  %v1048_v0 = vld [vmem:[#allocation17 + $0xbb0] sm:$0xff]  ;;  %v1006_v47 = vld [vmem:[#allocation17 + $0xa60] sm:$0xff] }
 0x1e1   :  { %1933 = vmatpush.msrb.mxu0 %v912_v3  ;;  %1918 = vmatpush.msrb.mxu3 %v870_v8  ;;  %v1072_v1 = vld [vmem:[#allocation17 + $0xc70] sm:$0xff]  ;;  %v1110_v3 = vld [vmem:[#allocation17 + $0xda0] sm:$0xff] }
 0x1e2   :  { %1958 = vmatpush.msrb.mxu1 %v934_v7  ;;  %1975 = vmatpush.msra.mxu2 %v972_v9  ;;  %v1046_v4 = vld [vmem:[#allocation17 + $0xba0] sm:$0xff]  ;;  %v1004_v7 = vld [vmem:[#allocation17 + $0xa50] sm:$0xff] }
 0x1e3   :  { %1934 = vmatpush.msrb.mxu0 %v910_v6  ;;  %1919 = vmatpush.msrb.mxu3 %v868_v10  ;;  %v1070_v8 = vld [vmem:[#allocation17 + $0xc60] sm:$0xff]  ;;  %v1108_v6 = vld [vmem:[#allocation17 + $0xd90] sm:$0xff] }
 0x1e4   :  { %1959 = vmatpush.msrb.mxu1 %v932_v12  ;;  %1976 = vmatpush.msra.mxu2 %v970_v2  ;;  %v1044_v9 = vld [vmem:[#allocation17 + $0xb90] sm:$0xff]  ;;  %v1002_v12 = vld [vmem:[#allocation17 + $0xa40] sm:$0xff] }
 0x1e5   :  { %1935 = vmatpush.msrb.mxu0 %v908_v11  ;;  %1920 = vmatpush.msrb.mxu3 %v866_v13  ;;  %v1068_v10 = vld [vmem:[#allocation17 + $0xc50] sm:$0xff]  ;;  %v1106_v11 = vld [vmem:[#allocation17 + $0xd80] sm:$0xff] }
 0x1e6   :  { %1960 = vmatpush.msrb.mxu1 %v930_v16  ;;  %1977 = vmatpush.msra.mxu2 %v968_v17  ;;  %v1042_v2 = vld [vmem:[#allocation17 + $0xb80] sm:$0xff]  ;;  %v1000_v16 = vld [vmem:[#allocation17 + $0xa30] sm:$0xff] }
 0x1e7   :  { %1936 = vmatpush.msrb.mxu0 %v906_v15  ;;  %1841 = vmatmul.f32.vlgmr.msra.gmra.mxu3 %v3899_v29  ;;  %v1066_v13 = vld [vmem:[#allocation17 + $0xc40] sm:$0xff]  ;;  %v1104_v15 = vld [vmem:[#allocation17 + $0xd70] sm:$0xff] }
 0x1e8   :  { %1881 = vmatmul.f32.vlgmr.msra.gmra.mxu1 %v3903_v56  ;;  %1985 = vmatpush.msra.mxu3 %v1024_v18  ;;  %v1040_v17 = vld [vmem:[#allocation17 + $0xb70] sm:$0xff]  ;;  %v1210_v53 = vld [vmem:[#allocation17 + $0x10c0] sm:$0xff] }
 0x1e9   :  { %2025 = vmatpush.msra.mxu1 %v1088_v20  ;;  %1937 = vmatpush.msrb.mxu0 %v904_v21  ;;  %v1064_v18 = vld [vmem:[#allocation17 + $0xc30] sm:$0xff]  ;;  %v1102_v20 = vld [vmem:[#allocation17 + $0xd60] sm:$0xff] }
 0x1ea   :  { %1978 = vmatpush.msra.mxu2 %v966_v22  ;;  %1986 = vmatpush.msra.mxu3 %v1022_v59  ;;  %v998_v21 = vld [vmem:[#allocation17 + $0xa20] sm:$0xff] }
 0x1eb   :  { %2026 = vmatpush.msra.mxu1 %v1086_v23  ;;  %1938 = vmatpush.msrb.mxu0 %v902_v24  ;;  %v1038_v22 = vld [vmem:[#allocation17 + $0xb60] sm:$0xff]  ;;  %v1100_v23 = vld [vmem:[#allocation17 + $0xd50] sm:$0xff] }
 0x1ec   :  { %1979 = vmatpush.msra.mxu2 %v964_v25  ;;  %1987 = vmatpush.msra.mxu3 %v1020_v26  ;;  %v1062_v59 = vld [vmem:[#allocation17 + $0xc20] sm:$0xff]  ;;  %v996_v24 = vld [vmem:[#allocation17 + $0xa10] sm:$0xff] }
 0x1ed   :  { %2027 = vmatpush.msra.mxu1 %v1084_v27  ;;  %1939 = vmatpush.msrb.mxu0 %v900_v28  ;;  %v1036_v25 = vld [vmem:[#allocation17 + $0xb50] sm:$0xff]  ;;  %v1098_v27 = vld [vmem:[#allocation17 + $0xd40] sm:$0xff] }
 0x1ee   :  { %1980 = vmatpush.msra.mxu2 %v962_v30  ;;  %1988 = vmatpush.msra.mxu3 %v1018_v31  ;;  %v1060_v26 = vld [vmem:[#allocation17 + $0xc10] sm:$0xff]  ;;  %v994_v28 = vld [vmem:[#allocation17 + $0xa00] sm:$0xff] }
 0x1ef   :  { %1901 = vmatmul.f32.vlgmr.msrb.gmra.mxu2 %v3905_v57  ;;  %2028 = vmatpush.msra.mxu1 %v1082_v33  ;;  %v1034_v30 = vld [vmem:[#allocation17 + $0xb40] sm:$0xff]  ;;  %v1096_v33 = vld [vmem:[#allocation17 + $0xd30] sm:$0xff] }
 0x1f0   :  { %2045 = vmatpush.msrb.mxu2 %v1120_v34  ;;  %1940 = vmatpush.msrb.mxu0 %v898_v35  ;;  %v1058_v31 = vld [vmem:[#allocation17 + $0xc00] sm:$0xff]  ;;  %v1152_v34 = vld [vmem:[#allocation17 + $0xef0] sm:$0xff] }
 0x1f1   :  { %1861 = vmatmul.f32.vlgmr.msra.gmra.mxu0 %v3901_v32  ;;  %1921 = vmatmul.f32.vlgmr.msrb.gmra.mxu3 %v3907_v58  ;;  %v1216_v35 = vld [vmem:[#allocation17 + $0x10f0] sm:$0xff] }
 0x1f2   :  { %1989 = vmatpush.msra.mxu3 %v1016_v36  ;;  %2005 = vmatpush.msra.mxu0 %v1056_v37  ;;  %v1032_v36 = vld [vmem:[#allocation17 + $0xb30] sm:$0xff]  ;;  %v1094_v37 = vld [vmem:[#allocation17 + $0xd20] sm:$0xff] }
 0x1f3   :  { %2029 = vmatpush.msra.mxu1 %v1080_v38  ;;  %2046 = vmatpush.msrb.mxu2 %v1118_v39  ;;  %v1150_v38 = vld [vmem:[#allocation17 + $0xee0] sm:$0xff] }
 0x1f4   :  { %1990 = vmatpush.msra.mxu3 %v1014_v41  ;;  %2006 = vmatpush.msra.mxu0 %v1054_v42  ;;  %v1214_v39 = vld [vmem:[#allocation17 + $0x10e0] sm:$0xff]  ;;  %v1092_v42 = vld [vmem:[#allocation17 + $0xd10] sm:$0xff] }
 0x1f5   :  { %2030 = vmatpush.msra.mxu1 %v1078_v43  ;;  %2047 = vmatpush.msrb.mxu2 %v1116_v44  ;;  %v1030_v41 = vld [vmem:[#allocation17 + $0xb20] sm:$0xff]  ;;  %v1148_v43 = vld [vmem:[#allocation17 + $0xed0] sm:$0xff] }
 0x1f6   :  { %1991 = vmatpush.msra.mxu3 %v1012_v45  ;;  %2007 = vmatpush.msra.mxu0 %v1052_v46  ;;  %v1212_v44 = vld [vmem:[#allocation17 + $0x10d0] sm:$0xff]  ;;  %v1090_v46 = vld [vmem:[#allocation17 + $0xd00] sm:$0xff] }
 0x1f7   :  { %2031 = vmatpush.msra.mxu1 %v1076_v48  ;;  %2048 = vmatpush.msrb.mxu2 %v1114_v51  ;;  %v1028_v45 = vld [vmem:[#allocation17 + $0xb10] sm:$0xff]  ;;  %v1146_v51 = vld [vmem:[#allocation17 + $0xec0] sm:$0xff] }
 0x1f8   :  { %1981 = vmatmul.f32.vlgmr.msra.gmra.mxu2 %v3916_v14  ;;  %1992 = vmatpush.msra.mxu3 %v1010_v55  ;;  %v3928_v48 = vld.sshfl [vmem:[#allocation1 + $0x28] sm:$0xff pattern:$0x73625140] }
 0x1f9   :  { %2008 = vmatpush.msra.mxu0 %v1050_v52  ;;  %2032 = vmatpush.msra.mxu1 %v1074_v60  ;;  %v1248_v55 = vld [vmem:[#allocation17 + $0x11f0] sm:$0xff]  ;;  %v1026_v52 = vld [vmem:[#allocation17 + $0xb00] sm:$0xff] }
 0x1fa   :  { %2049 = vmatpush.msrb.mxu2 %v1112_v62  ;;  %1941 = vmatmul.f32.vlgmr.msrb.gmra.mxu0 %v3909_v61  ;;  %v1144_v60 = vld [vmem:[#allocation17 + $0xeb0] sm:$0xff] }
 0x1fb   :  { %1993 = vmatpush.msra.mxu3 %v1008_v63  ;;  %2009 = vmatpush.msra.mxu0 %v1048_v0  ;;  %v1208_v62 = vld [vmem:[#allocation17 + $0x10b0] sm:$0xff]  ;;  %v1246_v0 = vld [vmem:[#allocation17 + $0x11e0] sm:$0xff] }
 0x1fc   :  { %2033 = vmatpush.msra.mxu1 %v1072_v1  ;;  %2050 = vmatpush.msrb.mxu2 %v1110_v3  ;;  %v1184_v63 = vld [vmem:[#allocation17 + $0xff0] sm:$0xff]  ;;  %v3931_v1 = vld.sshfl [vmem:[#allocation1 + $0x20] sm:$0xff pattern:$0x73625140]  ;;  %v1142_v3 = vld [vmem:[#allocation17 + $0xea0] sm:$0xff] }
 0x1fd   :  { %1961 = vmatmul.f32.vlgmr.msrb.gmra.mxu1 %v3918_v49  ;;  %1994 = vmatpush.msra.mxu3 %v1006_v47  ;;  %v1182_v47 = vld [vmem:[#allocation17 + $0xfe0] sm:$0xff] }
 0x1fe   :  { %2010 = vmatpush.msra.mxu0 %v1046_v4  ;;  %2034 = vmatpush.msra.mxu1 %v1070_v8  ;;  %v1206_v4 = vld [vmem:[#allocation17 + $0x10a0] sm:$0xff]  ;;  %v1244_v8 = vld [vmem:[#allocation17 + $0x11d0] sm:$0xff] }
 0x1ff   :  { %2051 = vmatpush.msrb.mxu2 %v1108_v6  ;;  %1995 = vmatpush.msra.mxu3 %v1004_v7  ;;  %v3934_v6 = vld.sshfl [vmem:[#allocation1 + $0x30] sm:$0xff pattern:$0x73625140]  ;;  %v1140_v7 = vld [vmem:[#allocation17 + $0xe90] sm:$0xff] }
 0x200   :  { %2011 = vmatpush.msra.mxu0 %v1044_v9  ;;  %2035 = vmatpush.msra.mxu1 %v1068_v10  ;;  %v671_v9 = vld [vmem:[#allocation20 + $0x28] sm:$0xff]  ;;  %v3936_v10 = vld.sshfl [vmem:[#allocation1 + $0x38] sm:$0xff pattern:$0x73625140] }
 0x201   :  { %2052 = vmatpush.msrb.mxu2 %v1106_v11  ;;  %1996 = vmatpush.msra.mxu3 %v1002_v12  ;;  %v1180_v11 = vld [vmem:[#allocation17 + $0xfd0] sm:$0xff]  ;;  %1734 = vst [vmem:[#allocation1 + $0x20] ss:$4 sm:$0xff] %v671_v9 }
 0x202   :  { %2012 = vmatpush.msra.mxu0 %v1042_v2  ;;  %2036 = vmatpush.msra.mxu1 %v1066_v13  ;;  %v1204_v12 = vld [vmem:[#allocation17 + $0x1090] sm:$0xff]  ;;  %v1242_v2 = vld [vmem:[#allocation17 + $0x11c0] sm:$0xff] }
 0x203   :  { %2053 = vmatpush.msrb.mxu2 %v1104_v15  ;;  %1997 = vmatpush.msra.mxu3 %v1000_v16  ;;  %v1138_v13 = vld [vmem:[#allocation17 + $0xe80] sm:$0xff]  ;;  %v1280_v9 = vld [vmem:[#allocation17 + $0x12f0] sm:$0xff] }
 0x204   :  { %2013 = vmatpush.msra.mxu0 %v1040_v17  ;;  %2037 = vmatpush.msra.mxu1 %v1064_v18  ;;  %v1178_v15 = vld [vmem:[#allocation17 + $0xfc0] sm:$0xff]  ;;  %v1240_v17 = vld [vmem:[#allocation17 + $0x11b0] sm:$0xff] }
 0x205   :  { %2054 = vmatpush.msrb.mxu2 %v1102_v20  ;;  %1998 = vmatpush.msra.mxu3 %v998_v21  ;;  %v1202_v16 = vld [vmem:[#allocation17 + $0x1080] sm:$0xff]  ;;  %v1136_v18 = vld [vmem:[#allocation17 + $0xe70] sm:$0xff] }
 0x206   :  { %2014 = vmatpush.msra.mxu0 %v1038_v22  ;;  %2038 = vmatpush.msra.mxu1 %v1062_v59  ;;  %v1176_v20 = vld [vmem:[#allocation17 + $0xfb0] sm:$0xff]  ;;  %v1238_v22 = vld [vmem:[#allocation17 + $0x11a0] sm:$0xff] }
 0x207   :  { %2055 = vmatpush.msrb.mxu2 %v1100_v23  ;;  %1999 = vmatpush.msra.mxu3 %v996_v24  ;;  %v1200_v21 = vld [vmem:[#allocation17 + $0x1070] sm:$0xff]  ;;  %v1134_v59 = vld [vmem:[#allocation17 + $0xe60] sm:$0xff] }
 0x208   :  { %2015 = vmatpush.msra.mxu0 %v1036_v25  ;;  %2039 = vmatpush.msra.mxu1 %v1060_v26  ;;  %v1174_v23 = vld [vmem:[#allocation17 + $0xfa0] sm:$0xff]  ;;  %v1236_v25 = vld [vmem:[#allocation17 + $0x1190] sm:$0xff] }
 0x209   :  { %2056 = vmatpush.msrb.mxu2 %v1098_v27  ;;  %2000 = vmatpush.msra.mxu3 %v994_v28  ;;  %v1198_v24 = vld [vmem:[#allocation17 + $0x1060] sm:$0xff]  ;;  %v1132_v26 = vld [vmem:[#allocation17 + $0xe50] sm:$0xff] }
 0x20a   :  { %2016 = vmatpush.msra.mxu0 %v1034_v30  ;;  %2040 = vmatpush.msra.mxu1 %v1058_v31  ;;  %v1172_v27 = vld [vmem:[#allocation17 + $0xf90] sm:$0xff]  ;;  %v1234_v30 = vld [vmem:[#allocation17 + $0x1180] sm:$0xff] }
 0x20b   :  { %2057 = vmatpush.msrb.mxu2 %v1096_v33  ;;  %2001 = vmatmul.f32.vlgmr.msra.gmra.mxu3 %v3920_v50  ;;  %v1196_v28 = vld [vmem:[#allocation17 + $0x1050] sm:$0xff]  ;;  %v1130_v31 = vld [vmem:[#allocation17 + $0xe40] sm:$0xff] }
 0x20c   :  { %2065 = vmatpush.msrb.mxu3 %v1152_v34  ;;  %2105 = vmatpush.msrb.mxu1 %v1216_v35  ;;  %v1170_v33 = vld [vmem:[#allocation17 + $0xf80] sm:$0xff]  ;;  %v1232_v35 = vld [vmem:[#allocation17 + $0x1170] sm:$0xff] }
 0x20d   :  { %2017 = vmatpush.msra.mxu0 %v1032_v36  ;;  %2058 = vmatpush.msrb.mxu2 %v1094_v37  ;;  %v1194_v34 = vld [vmem:[#allocation17 + $0x1040] sm:$0xff]  ;;  %v1128_v36 = vld [vmem:[#allocation17 + $0xe30] sm:$0xff] }
 0x20e   :  { %2066 = vmatpush.msrb.mxu3 %v1150_v38  ;;  %2106 = vmatpush.msrb.mxu1 %v1214_v39  ;;  %v1168_v37 = vld [vmem:[#allocation17 + $0xf70] sm:$0xff]  ;;  %v497_v39 = vld [vmem:[#allocation14] sm:$0xff] }
 0x20f   :  { %2018 = vmatpush.msra.mxu0 %v1030_v41  ;;  %2059 = vmatpush.msrb.mxu2 %v1092_v42  ;;  %v1192_v38 = vld [vmem:[#allocation17 + $0x1030] sm:$0xff]  ;;  %v1230_v41 = vld [vmem:[#allocation17 + $0x1160] sm:$0xff] }
 0x210   :  { %2067 = vmatpush.msrb.mxu3 %v1148_v43  ;;  %2107 = vmatpush.msrb.mxu1 %v1212_v44  ;;  %v1126_v42 = vld [vmem:[#allocation17 + $0xe20] sm:$0xff] }
 0x211   :  { %2019 = vmatpush.msra.mxu0 %v1028_v45  ;;  %2060 = vmatpush.msrb.mxu2 %v1090_v46  ;;  %v1166_v43 = vld [vmem:[#allocation17 + $0xf60] sm:$0xff]  ;;  %v1228_v46 = vld [vmem:[#allocation17 + $0x1150] sm:$0xff] }
 0x212   :  { %2061 = vmatmul.f32.vlgmr.msrb.gmra.mxu2 %v3928_v48  ;;  %2068 = vmatpush.msrb.mxu3 %v1146_v51  ;;  %v1190_v44 = vld [vmem:[#allocation17 + $0x1020] sm:$0xff]  ;;  %v1124_v51 = vld [vmem:[#allocation17 + $0xe10] sm:$0xff] }
 0x213   :  { %2108 = vmatpush.msrb.mxu1 %v1210_v53  ;;  %2125 = vmatpush.msra.mxu2 %v1248_v55 }
 0x214   :  { %2020 = vmatpush.msra.mxu0 %v1026_v52  ;;  %2069 = vmatpush.msrb.mxu3 %v1144_v60  ;;  %v1164_v52 = vld [vmem:[#allocation17 + $0xf50] sm:$0xff] }
 0x215   :  { %2021 = vmatmul.f32.vlgmr.msra.gmra.mxu0 %v3922_v54  ;;  %2109 = vmatpush.msrb.mxu1 %v1208_v62  ;;  %v1188_v60 = vld [vmem:[#allocation17 + $0x1010] sm:$0xff]  ;;  %v1226_v62 = vld [vmem:[#allocation17 + $0x1140] sm:$0xff] }
 0x216   :  { %2085 = vmatpush.msrb.mxu0 %v1184_v63  ;;  %2126 = vmatpush.msra.mxu2 %v1246_v0  ;;  %v1122_v63 = vld [vmem:[#allocation17 + $0xe00] sm:$0xff] }
 0x217   :  { %2041 = vmatmul.f32.vlgmr.msra.gmra.mxu1 %v3931_v1  ;;  %2070 = vmatpush.msrb.mxu3 %v1142_v3  ;;  %v498_v0 = vld [vmem:[#allocation14 + $0x8] sm:$0xff] }
 0x218   :  { %2086 = vmatpush.msrb.mxu0 %v1182_v47  ;;  %2110 = vmatpush.msrb.mxu1 %v1206_v4  ;;  %v1162_v4 = vld [vmem:[#allocation17 + $0xf40] sm:$0xff] }
 0x219   :  { %2127 = vmatpush.msra.mxu2 %v1244_v8  ;;  %2071 = vmatpush.msrb.mxu3 %v1140_v7  ;;  %v1186_v8 = vld [vmem:[#allocation17 + $0x1000] sm:$0xff]  ;;  %v1224_v7 = vld [vmem:[#allocation17 + $0x1130] sm:$0xff] }
 0x21a   :  { %2087 = vmatpush.msrb.mxu0 %v1180_v11  ;;  %2111 = vmatpush.msrb.mxu1 %v1204_v12  ;;  %v1344_v11 = vld [vmem:[#allocation17 + $0x14f0] sm:$0xff] }
 0x21b   :  { %2128 = vmatpush.msra.mxu2 %v1242_v2  ;;  %2072 = vmatpush.msrb.mxu3 %v1138_v13  ;;  %v1160_v2 = vld [vmem:[#allocation17 + $0xf30] sm:$0xff]  ;;  %v1222_v13 = vld [vmem:[#allocation17 + $0x1120] sm:$0xff] }
 0x21c   :  { %2088 = vmatpush.msrb.mxu0 %v1178_v15  ;;  %2112 = vmatpush.msrb.mxu1 %v1202_v16  ;;  %v499_v16 = vld [vmem:[#allocation14 + $0x10] sm:$0xff] }
 0x21d   :  { %2129 = vmatpush.msra.mxu2 %v1240_v17  ;;  %2073 = vmatpush.msrb.mxu3 %v1136_v18  ;;  %v1278_v17 = vld [vmem:[#allocation17 + $0x12e0] sm:$0xff] }
 0x21e   :  { %2089 = vmatpush.msrb.mxu0 %v1176_v20  ;;  %2113 = vmatpush.msrb.mxu1 %v1200_v21  ;;  %v1342_v18 = vld [vmem:[#allocation17 + $0x14e0] sm:$0xff] }
 0x21f   :  { %2130 = vmatpush.msra.mxu2 %v1238_v22  ;;  %2074 = vmatpush.msrb.mxu3 %v1134_v59  ;;  %v1158_v21 = vld [vmem:[#allocation17 + $0xf20] sm:$0xff]  ;;  %v1220_v22 = vld [vmem:[#allocation17 + $0x1110] sm:$0xff] }
 0x220   :  { %2090 = vmatpush.msrb.mxu0 %v1174_v23  ;;  %2114 = vmatpush.msrb.mxu1 %v1198_v24  ;;  %v564_v3 = vpop.f32.mrf.mxu1  ;;  %v1276_v23 = vld [vmem:[#allocation17 + $0x12d0] sm:$0xff] }
 0x221   :  { %2131 = vmatpush.msra.mxu2 %v1236_v25  ;;  %2075 = vmatpush.msrb.mxu3 %v1132_v26  ;;  %v565_v12 = vadd.f32 %v564_v3, %v498_v0  ;;  %v1340_v24 = vld [vmem:[#allocation17 + $0x14d0] sm:$0xff] }
 0x222   :  { %2091 = vmatpush.msrb.mxu0 %v1172_v27  ;;  %2115 = vmatpush.msrb.mxu1 %v1196_v28  ;;  %v1156_v26 = vld [vmem:[#allocation17 + $0xf10] sm:$0xff]  ;;  %v1218_v27 = vld [vmem:[#allocation17 + $0x1100] sm:$0xff] }
 0x223   :  { %2132 = vmatpush.msra.mxu2 %v1234_v30  ;;  %2076 = vmatpush.msrb.mxu3 %v1130_v31  ;;  %v3944_v30 = vld.sshfl [vmem:[#allocation1 + $0x8] sm:$0xff pattern:$0x73625140]  ;;  %v1274_v31 = vld [vmem:[#allocation17 + $0x12c0] sm:$0xff] }
 0x224   :  { %2092 = vmatpush.msrb.mxu0 %v1170_v33  ;;  %2116 = vmatpush.msrb.mxu1 %v1194_v34  ;;  %v1338_v34 = vld [vmem:[#allocation17 + $0x14c0] sm:$0xff]  ;;  %v1308_v3 = vld [vmem:[#allocation17 + $0x13d0] sm:$0xff] }
 0x225   :  { %2133 = vmatpush.msra.mxu2 %v1232_v35  ;;  %2077 = vmatpush.msrb.mxu3 %v1128_v36  ;;  %v1376_v35 = vld [vmem:[#allocation17 + $0x15f0] sm:$0xff] }
 0x226   :  { %v518_v45 = vpop.f32.mrf.mxu3  ;;  %2093 = vmatpush.msrb.mxu0 %v1168_v37  ;;  %2117 = vmatpush.msrb.mxu1 %v1192_v38  ;;  %v541_v55 = vpop.f32.mrf.mxu0  ;;  %v500_v36 = vld [vmem:[#allocation14 + $0x18] sm:$0xff]  ;;  %v1154_v38 = vld [vmem:[#allocation17 + $0xf00] sm:$0xff] }
 0x227   :  { %v519_v53 = vadd.f32 %v518_v45, %v497_v39  ;;  %2134 = vmatpush.msra.mxu2 %v1230_v41  ;;  %2078 = vmatpush.msrb.mxu3 %v1126_v42  ;;  %v1272_v39 = vld [vmem:[#allocation17 + $0x12b0] sm:$0xff]  ;;  %v3949_v45 = vld.sshfl [vmem:[#allocation1] sm:$0xff pattern:$0x73625140] }
 0x228   :  { %2094 = vmatpush.msrb.mxu0 %v1166_v43  ;;  %2118 = vmatpush.msrb.mxu1 %v1190_v44  ;;  %v1336_v41 = vld [vmem:[#allocation17 + $0x14b0] sm:$0xff]  ;;  %v1374_v43 = vld [vmem:[#allocation17 + $0x15e0] sm:$0xff] }
 0x229   :  { %v3939_v47 = vadd.f32 %v541_v55, %v519_v53  ;;  %2135 = vmatpush.msra.mxu2 %v1228_v46  ;;  %2079 = vmatpush.msrb.mxu3 %v1124_v51  ;;  %v567_v37 = vpop.f32.mrf.mxu1  ;;  %v1312_v42 = vld [vmem:[#allocation17 + $0x13f0] sm:$0xff]  ;;  %v1270_v46 = vld [vmem:[#allocation17 + $0x12a0] sm:$0xff]  ;;  %v625_v53 = vld [vmem:[#allocation16] sm:$0x1] }
 0x22a   :  { %2095 = vmatpush.msrb.mxu0 %v1164_v52  ;;  %2119 = vmatpush.msrb.mxu1 %v1188_v60  ;;  %v568_v44 = vadd.f32 %v567_v37, %v500_v36  ;;  %v1310_v55 = vld [vmem:[#allocation17 + $0x13e0] sm:$0xff]  ;;  %v1360_v36 = vld [vmem:[#allocation17 + $0x1570] sm:$0xff] }
 0x22b   :  { %2136 = vmatpush.msra.mxu2 %v1226_v62  ;;  %2080 = vmatpush.msrb.mxu3 %v1122_v63  ;;  %v1334_v52 = vld [vmem:[#allocation17 + $0x14a0] sm:$0xff]  ;;  %v1372_v62 = vld [vmem:[#allocation17 + $0x15d0] sm:$0xff] }
 0x22c   :  { %2096 = vmatpush.msrb.mxu0 %v1162_v4  ;;  %2120 = vmatpush.msrb.mxu1 %v1186_v8  ;;  %v587_v15 = vpop.f32.mrf.mxu2  ;;  %v1268_v63 = vld [vmem:[#allocation17 + $0x1290] sm:$0xff] }
 0x22d   :  { %2137 = vmatpush.msra.mxu2 %v1224_v7  ;;  %2081 = vmatmul.f32.vlgmr.msrb.gmra.mxu3 %v3934_v6  ;;  %v3942_v20 = vadd.f32 %v587_v15, %v565_v12  ;;  %v1332_v4 = vld [vmem:[#allocation17 + $0x1490] sm:$0xff]  ;;  %v1370_v7 = vld [vmem:[#allocation17 + $0x15c0] sm:$0xff] }
 0x22e   :  { %2145 = vmatpush.msra.mxu3 %v1280_v9  ;;  %2185 = vmatpush.msra.mxu1 %v1344_v11  ;;  %v521_v59 = vpop.f32.mrf.mxu3  ;;  %v1266_v9 = vld [vmem:[#allocation17 + $0x1280] sm:$0xff]  ;;  %v1368_v15 = vld [vmem:[#allocation17 + $0x15b0] sm:$0xff] }
 0x22f   :  { %2097 = vmatpush.msrb.mxu0 %v1160_v2  ;;  %2138 = vmatpush.msra.mxu2 %v1222_v13  ;;  %v522_v25 = vadd.f32 %v521_v59, %v499_v16  ;;  %v544_v28 = vpop.f32.mrf.mxu0  ;;  %v1306_v12 = vld [vmem:[#allocation17 + $0x13c0] sm:$0xff]  ;;  %v1264_v16 = vld [vmem:[#allocation17 + $0x1270] sm:$0xff] }
 0x230   :  { %2146 = vmatpush.msra.mxu3 %v1278_v17  ;;  %2186 = vmatpush.msra.mxu1 %v1342_v18  ;;  %v1330_v2 = vld [vmem:[#allocation17 + $0x1480] sm:$0xff]  ;;  %v1304_v17 = vld [vmem:[#allocation17 + $0x13b0] sm:$0xff] }
 0x231   :  { %2098 = vmatpush.msrb.mxu0 %v1158_v21  ;;  %2139 = vmatpush.msra.mxu2 %v1220_v22  ;;  %v3946_v33 = vadd.f32 %v544_v28, %v522_v25  ;;  %v1328_v18 = vld [vmem:[#allocation17 + $0x1470] sm:$0xff]  ;;  %v1366_v21 = vld [vmem:[#allocation17 + $0x15a0] sm:$0xff] }
 0x232   :  { %2147 = vmatpush.msra.mxu3 %v1276_v23  ;;  %2187 = vmatpush.msra.mxu1 %v1340_v24  ;;  %v1262_v22 = vld [vmem:[#allocation17 + $0x1260] sm:$0xff]  ;;  %v1364_v24 = vld [vmem:[#allocation17 + $0x1590] sm:$0xff] }
 0x233   :  { %2099 = vmatpush.msrb.mxu0 %v1156_v26  ;;  %2140 = vmatpush.msra.mxu2 %v1218_v27  ;;  %v1302_v59 = vld [vmem:[#allocation17 + $0x13a0] sm:$0xff]  ;;  %v1260_v25 = vld [vmem:[#allocation17 + $0x1250] sm:$0xff] }
 0x234   :  { %2141 = vmatmul.f32.vlgmr.msra.gmra.mxu2 %v3944_v30  ;;  %2148 = vmatpush.msra.mxu3 %v1274_v31  ;;  %v1326_v23 = vld [vmem:[#allocation17 + $0x1460] sm:$0xff]  ;;  %v1300_v26 = vld [vmem:[#allocation17 + $0x1390] sm:$0xff] }
 0x235   :  { %2188 = vmatpush.msra.mxu1 %v1338_v34  ;;  %2205 = vmatpush.msrb.mxu2 %v1376_v35  ;;  %v1324_v27 = vld [vmem:[#allocation17 + $0x1450] sm:$0xff]  ;;  %v1362_v28 = vld [vmem:[#allocation17 + $0x1580] sm:$0xff] }
 0x236   :  { %2100 = vmatpush.msrb.mxu0 %v1154_v38  ;;  %2149 = vmatpush.msra.mxu3 %v1272_v39  ;;  %v590_v51 = vpop.f32.mrf.mxu2  ;;  %v1258_v31 = vld [vmem:[#allocation17 + $0x1240] sm:$0xff]  ;;  %v1256_v37 = vld [vmem:[#allocation17 + $0x1230] sm:$0xff] }
 0x237   :  { %2101 = vmatmul.f32.vlgmr.msrb.gmra.mxu0 %v3936_v10  ;;  %2189 = vmatpush.msra.mxu1 %v1336_v41  ;;  %v3952_v60 = vadd.f32 %v590_v51, %v568_v44  ;;  %v1298_v34 = vld [vmem:[#allocation17 + $0x1380] sm:$0xff]  ;;  %v1296_v38 = vld [vmem:[#allocation17 + $0x1370] sm:$0xff] }
 0x238   :  { %2165 = vmatpush.msra.mxu0 %v1312_v42  ;;  %2206 = vmatpush.msrb.mxu2 %v1374_v43  ;;  %v643_v0 = vpop.f32.mrf.mxu3  ;;  %v1322_v35 = vld [vmem:[#allocation17 + $0x1440] sm:$0xff]  ;;  %v1320_v39 = vld [vmem:[#allocation17 + $0x1430] sm:$0xff] }
 0x239   :  { %2121 = vmatmul.f32.vlgmr.msrb.gmra.mxu1 %v3949_v45  ;;  %2150 = vmatpush.msra.mxu3 %v1270_v46  ;;  %v644_v8 = vadd.f32 %v643_v0, %v625_v53  ;;  %v663_v11 = vpop.f32.mrf.mxu0  ;;  %v1358_v41 = vld [vmem:[#allocation17 + $0x1560] sm:$0xff]  ;;  %v1356_v46 = vld [vmem:[#allocation17 + $0x1550] sm:$0xff] }
 0x23a   :  { %2166 = vmatpush.msra.mxu0 %v1310_v55  ;;  %2190 = vmatpush.msra.mxu1 %v1334_v52  ;;  %v1254_v42 = vld [vmem:[#allocation17 + $0x1220] sm:$0xff]  ;;  %v1252_v51 = vld [vmem:[#allocation17 + $0x1210] sm:$0xff] }
 0x23b   :  { %2207 = vmatpush.msrb.mxu2 %v1372_v62  ;;  %2151 = vmatpush.msra.mxu3 %v1268_v63  ;;  %v3955_v13 = vadd.f32 %v663_v11, %v644_v8  ;;  %v1294_v43 = vld [vmem:[#allocation17 + $0x1360] sm:$0xff]  ;;  %v1292_v53 = vld [vmem:[#allocation17 + $0x1350] sm:$0xff] }
 0x23c   :  { %2167 = vmatpush.msra.mxu0 %v1308_v3  ;;  %2191 = vmatpush.msra.mxu1 %v1332_v4  ;;  %v1318_v44 = vld [vmem:[#allocation17 + $0x1420] sm:$0xff]  ;;  %v1316_v55 = vld [vmem:[#allocation17 + $0x1410] sm:$0xff]  ;;  %v3957_v4 = vld.sshfl [vmem:[#allocation1 + $0x10] sm:$0xff pattern:$0x73625140] }
 0x23d   :  { %2208 = vmatpush.msrb.mxu2 %v1370_v7  ;;  %2152 = vmatpush.msra.mxu3 %v1266_v9  ;;  %v1354_v52 = vld [vmem:[#allocation17 + $0x1540] sm:$0xff]  ;;  %v1352_v3 = vld [vmem:[#allocation17 + $0x1530] sm:$0xff] }
 0x23e   :  { %2168 = vmatpush.msra.mxu0 %v1306_v12  ;;  %2192 = vmatpush.msra.mxu1 %v1330_v2  ;;  %v1250_v62 = vld [vmem:[#allocation17 + $0x1200] sm:$0xff]  ;;  %v1408_v8 = vld [vmem:[#allocation17 + $0x16f0] sm:$0xff] }
 0x23f   :  { %2209 = vmatpush.msrb.mxu2 %v1368_v15  ;;  %2153 = vmatpush.msra.mxu3 %v1264_v16  ;;  %v1290_v63 = vld [vmem:[#allocation17 + $0x1340] sm:$0xff]  ;;  %v1472_v7 = vld [vmem:[#allocation17 + $0x18f0] sm:$0xff] }
 0x240   :  { %2169 = vmatpush.msra.mxu0 %v1304_v17  ;;  %2193 = vmatpush.msra.mxu1 %v1328_v18  ;;  %v1314_v0 = vld [vmem:[#allocation17 + $0x1400] sm:$0xff]  ;;  %v1288_v9 = vld [vmem:[#allocation17 + $0x1330] sm:$0xff] }
 0x241   :  { %2210 = vmatpush.msrb.mxu2 %v1366_v21  ;;  %2154 = vmatpush.msra.mxu3 %v1262_v22  ;;  %v1350_v11 = vld [vmem:[#allocation17 + $0x1520] sm:$0xff]  ;;  %v672_v16 = vld [vmem:[#allocation20 + $0x30] sm:$0xff] }
 0x242   :  { %2170 = vmatpush.msra.mxu0 %v1302_v59  ;;  %2194 = vmatpush.msra.mxu1 %v1326_v23  ;;  %v1406_v12 = vld [vmem:[#allocation17 + $0x16e0] sm:$0xff]  ;;  %v1348_v18 = vld [vmem:[#allocation17 + $0x1510] sm:$0xff] }
 0x243   :  { %2211 = vmatpush.msrb.mxu2 %v1364_v24  ;;  %2155 = vmatpush.msra.mxu3 %v1260_v25  ;;  %v1470_v2 = vld [vmem:[#allocation17 + $0x18e0] sm:$0xff]  ;;  %v1404_v21 = vld [vmem:[#allocation17 + $0x16d0] sm:$0xff] }
 0x244   :  { %2171 = vmatpush.msra.mxu0 %v1300_v26  ;;  %2195 = vmatpush.msra.mxu1 %v1324_v27  ;;  %v3960_v15 = vld.sshfl [vmem:[#allocation1 + $0x18] sm:$0xff pattern:$0x73625140]  ;;  %v1468_v22 = vld [vmem:[#allocation17 + $0x18d0] sm:$0xff] }
 0x245   :  { %2212 = vmatpush.msrb.mxu2 %v1362_v28  ;;  %2156 = vmatpush.msra.mxu3 %v1258_v31  ;;  %v1286_v17 = vld [vmem:[#allocation17 + $0x1320] sm:$0xff]  ;;  %1743 = vst [vmem:[#allocation1] ss:$4 sm:$0xff] %v672_v16  ;;  %v1284_v59 = vld [vmem:[#allocation17 + $0x1310] sm:$0xff] }
 0x246   :  { %2172 = vmatpush.msra.mxu0 %v1298_v34  ;;  %2196 = vmatpush.msra.mxu1 %v1322_v35  ;;  %v1346_v23 = vld [vmem:[#allocation17 + $0x1500] sm:$0xff]  ;;  %v3962_v24 = vld.sshfl [vmem:[#allocation1 + $0x28] sm:$0xff pattern:$0x73625140] }
 0x247   :  { %2213 = vmatpush.msrb.mxu2 %v1360_v36  ;;  %2157 = vmatpush.msra.mxu3 %v1256_v37  ;;  %v1402_v25 = vld [vmem:[#allocation17 + $0x16c0] sm:$0xff]  ;;  %v1504_v27 = vld [vmem:[#allocation17 + $0x19f0] sm:$0xff]  ;;  %v3965_v37 = vld.sshfl [vmem:[#allocation1 + $0x20] sm:$0xff pattern:$0x73625140] }
 0x248   :  { %2173 = vmatpush.msra.mxu0 %v1296_v38  ;;  %2197 = vmatpush.msra.mxu1 %v1320_v39  ;;  %v1466_v26 = vld [vmem:[#allocation17 + $0x18c0] sm:$0xff]  ;;  %v1400_v31 = vld [vmem:[#allocation17 + $0x16b0] sm:$0xff] }
 0x249   :  { %2214 = vmatpush.msrb.mxu2 %v1358_v41  ;;  %2158 = vmatpush.msra.mxu3 %v1254_v42  ;;  %v1282_v28 = vld [vmem:[#allocation17 + $0x1300] sm:$0xff]  ;;  %v1464_v34 = vld [vmem:[#allocation17 + $0x18b0] sm:$0xff] }
 0x24a   :  { %2174 = vmatpush.msra.mxu0 %v1294_v43  ;;  %2198 = vmatpush.msra.mxu1 %v1318_v44  ;;  %v1440_v35 = vld [vmem:[#allocation17 + $0x17f0] sm:$0xff]  ;;  %v1502_v36 = vld [vmem:[#allocation17 + $0x19e0] sm:$0xff] }
 0x24b   :  { %2215 = vmatpush.msrb.mxu2 %v1356_v46  ;;  %2159 = vmatpush.msra.mxu3 %v1252_v51  ;;  %v1398_v38 = vld [vmem:[#allocation17 + $0x16a0] sm:$0xff]  ;;  %v1500_v42 = vld [vmem:[#allocation17 + $0x19d0] sm:$0xff] }
 0x24c   :  { %2175 = vmatpush.msra.mxu0 %v1292_v53  ;;  %2199 = vmatpush.msra.mxu1 %v1316_v55  ;;  %v1438_v39 = vld [vmem:[#allocation17 + $0x17e0] sm:$0xff]  ;;  %v1396_v43 = vld [vmem:[#allocation17 + $0x1690] sm:$0xff] }
 0x24d   :  { %2216 = vmatpush.msrb.mxu2 %v1354_v52  ;;  %2160 = vmatpush.msra.mxu3 %v1250_v62  ;;  %v1462_v41 = vld [vmem:[#allocation17 + $0x18a0] sm:$0xff]  ;;  %v1436_v44 = vld [vmem:[#allocation17 + $0x17d0] sm:$0xff] }
 0x24e   :  { %2176 = vmatpush.msra.mxu0 %v1290_v63  ;;  %2200 = vmatpush.msra.mxu1 %v1314_v0  ;;  %v1460_v46 = vld [vmem:[#allocation17 + $0x1890] sm:$0xff]  ;;  %v1498_v51 = vld [vmem:[#allocation17 + $0x19c0] sm:$0xff] }
 0x24f   :  { %2217 = vmatpush.msrb.mxu2 %v1352_v3  ;;  %2161 = vmatmul.f32.vlgmr.msra.gmra.mxu3 %v3957_v4  ;;  %v1394_v53 = vld [vmem:[#allocation17 + $0x1680] sm:$0xff]  ;;  %v1496_v62 = vld [vmem:[#allocation17 + $0x19b0] sm:$0xff] }
 0x250   :  { %2225 = vmatpush.msrb.mxu3 %v1408_v8  ;;  %2265 = vmatpush.msrb.mxu1 %v1472_v7  ;;  %v1434_v55 = vld [vmem:[#allocation17 + $0x17c0] sm:$0xff]  ;;  %v1392_v63 = vld [vmem:[#allocation17 + $0x1670] sm:$0xff] }
 0x251   :  { %2177 = vmatpush.msra.mxu0 %v1288_v9  ;;  %2218 = vmatpush.msrb.mxu2 %v1350_v11  ;;  %v1458_v52 = vld [vmem:[#allocation17 + $0x1880] sm:$0xff]  ;;  %v1432_v0 = vld [vmem:[#allocation17 + $0x17b0] sm:$0xff] }
 0x252   :  { %2226 = vmatpush.msrb.mxu3 %v1406_v12  ;;  %2266 = vmatpush.msrb.mxu1 %v1470_v2  ;;  %v1456_v3 = vld [vmem:[#allocation17 + $0x1870] sm:$0xff]  ;;  %v1494_v8 = vld [vmem:[#allocation17 + $0x19a0] sm:$0xff] }
 0x253   :  { %2178 = vmatpush.msra.mxu0 %v1286_v17  ;;  %2219 = vmatpush.msrb.mxu2 %v1348_v18  ;;  %v1390_v7 = vld [vmem:[#allocation17 + $0x1660] sm:$0xff]  ;;  %v1492_v12 = vld [vmem:[#allocation17 + $0x1990] sm:$0xff] }
 0x254   :  { %2227 = vmatpush.msrb.mxu3 %v1404_v21  ;;  %2267 = vmatpush.msrb.mxu1 %v1468_v22  ;;  %v1430_v9 = vld [vmem:[#allocation17 + $0x17a0] sm:$0xff]  ;;  %v1388_v2 = vld [vmem:[#allocation17 + $0x1650] sm:$0xff] }
 0x255   :  { %2179 = vmatpush.msra.mxu0 %v1284_v59  ;;  %2220 = vmatpush.msrb.mxu2 %v1346_v23  ;;  %v1454_v11 = vld [vmem:[#allocation17 + $0x1860] sm:$0xff]  ;;  %v1428_v16 = vld [vmem:[#allocation17 + $0x1790] sm:$0xff] }
 0x256   :  { %2221 = vmatmul.f32.vlgmr.msrb.gmra.mxu2 %v3962_v24  ;;  %2228 = vmatpush.msrb.mxu3 %v1402_v25  ;;  %v1452_v17 = vld [vmem:[#allocation17 + $0x1850] sm:$0xff]  ;;  %v1490_v18 = vld [vmem:[#allocation17 + $0x1980] sm:$0xff] }
 0x257   :  { %2268 = vmatpush.msrb.mxu1 %v1466_v26  ;;  %2285 = vmatpush.msra.mxu2 %v1504_v27  ;;  %v1386_v21 = vld [vmem:[#allocation17 + $0x1640] sm:$0xff]  ;;  %v1488_v23 = vld [vmem:[#allocation17 + $0x1970] sm:$0xff] }
 0x258   :  { %2180 = vmatpush.msra.mxu0 %v1282_v28  ;;  %2229 = vmatpush.msrb.mxu3 %v1400_v31  ;;  %v1426_v22 = vld [vmem:[#allocation17 + $0x1780] sm:$0xff]  ;;  %v1384_v25 = vld [vmem:[#allocation17 + $0x1630] sm:$0xff] }
 0x259   :  { %2181 = vmatmul.f32.vlgmr.msra.gmra.mxu0 %v3960_v15  ;;  %2269 = vmatpush.msrb.mxu1 %v1464_v34  ;;  %v1450_v59 = vld [vmem:[#allocation17 + $0x1840] sm:$0xff]  ;;  %v1424_v26 = vld [vmem:[#allocation17 + $0x1770] sm:$0xff] }
 0x25a   :  { %2245 = vmatpush.msrb.mxu0 %v1440_v35  ;;  %2286 = vmatpush.msra.mxu2 %v1502_v36  ;;  %v1448_v27 = vld [vmem:[#allocation17 + $0x1830] sm:$0xff]  ;;  %v1486_v28 = vld [vmem:[#allocation17 + $0x1960] sm:$0xff] }
 0x25b   :  { %2201 = vmatmul.f32.vlgmr.msra.gmra.mxu1 %v3965_v37  ;;  %2230 = vmatpush.msrb.mxu3 %v1398_v38  ;;  %v1382_v31 = vld [vmem:[#allocation17 + $0x1620] sm:$0xff]  ;;  %v1484_v36 = vld [vmem:[#allocation17 + $0x1950] sm:$0xff] }
 0x25c   :  { %2246 = vmatpush.msrb.mxu0 %v1438_v39  ;;  %2270 = vmatpush.msrb.mxu1 %v1462_v41  ;;  %v1422_v34 = vld [vmem:[#allocation17 + $0x1760] sm:$0xff]  ;;  %v1380_v38 = vld [vmem:[#allocation17 + $0x1610] sm:$0xff] }
 0x25d   :  { %2287 = vmatpush.msra.mxu2 %v1500_v42  ;;  %2231 = vmatpush.msrb.mxu3 %v1396_v43  ;;  %v1446_v35 = vld [vmem:[#allocation17 + $0x1820] sm:$0xff]  ;;  %v1420_v39 = vld [vmem:[#allocation17 + $0x1750] sm:$0xff] }
 0x25e   :  { %2247 = vmatpush.msrb.mxu0 %v1436_v44  ;;  %2271 = vmatpush.msrb.mxu1 %v1460_v46  ;;  %v1444_v41 = vld [vmem:[#allocation17 + $0x1810] sm:$0xff]  ;;  %v1482_v42 = vld [vmem:[#allocation17 + $0x1940] sm:$0xff] }
 0x25f   :  { %2288 = vmatpush.msra.mxu2 %v1498_v51  ;;  %2232 = vmatpush.msrb.mxu3 %v1394_v53  ;;  %v1378_v43 = vld [vmem:[#allocation17 + $0x1600] sm:$0xff]  ;;  %v1480_v51 = vld [vmem:[#allocation17 + $0x1930] sm:$0xff]  ;;  %v3969_v53 = vld.sshfl [vmem:[#allocation1 + $0x30] sm:$0xff pattern:$0x73625140] }
 0x260   :  { %2248 = vmatpush.msrb.mxu0 %v1434_v55  ;;  %2272 = vmatpush.msrb.mxu1 %v1458_v52  ;;  %v1418_v44 = vld [vmem:[#allocation17 + $0x1740] sm:$0xff]  ;;  %v1536_v55 = vld [vmem:[#allocation17 + $0x1af0] sm:$0xff] }
 0x261   :  { %2289 = vmatpush.msra.mxu2 %v1496_v62  ;;  %2233 = vmatpush.msrb.mxu3 %v1392_v63  ;;  %v1442_v46 = vld [vmem:[#allocation17 + $0x1800] sm:$0xff]  ;;  %v1600_v52 = vld [vmem:[#allocation17 + $0x1cf0] sm:$0xff] }
 0x262   :  { %2249 = vmatpush.msrb.mxu0 %v1432_v0  ;;  %2273 = vmatpush.msrb.mxu1 %v1456_v3  ;;  %v1416_v62 = vld [vmem:[#allocation17 + $0x1730] sm:$0xff]  ;;  %v1478_v63 = vld [vmem:[#allocation17 + $0x1920] sm:$0xff] }
 0x263   :  { %2290 = vmatpush.msra.mxu2 %v1494_v8  ;;  %2234 = vmatpush.msrb.mxu3 %v1390_v7  ;;  %v1534_v0 = vld [vmem:[#allocation17 + $0x1ae0] sm:$0xff] }
 0x264   :  { %2250 = vmatpush.msrb.mxu0 %v1430_v9  ;;  %2274 = vmatpush.msrb.mxu1 %v1454_v11  ;;  %v1598_v3 = vld [vmem:[#allocation17 + $0x1ce0] sm:$0xff]  ;;  %v1476_v11 = vld [vmem:[#allocation17 + $0x1910] sm:$0xff] }
 0x265   :  { %2291 = vmatpush.msra.mxu2 %v1492_v12  ;;  %2235 = vmatpush.msrb.mxu3 %v1388_v2  ;;  %v3972_v8 = vld.sshfl [vmem:[#allocation1 + $0x38] sm:$0xff pattern:$0x73625140]  ;;  %v1532_v12 = vld [vmem:[#allocation17 + $0x1ad0] sm:$0xff] }
 0x266   :  { %2251 = vmatpush.msrb.mxu0 %v1428_v16  ;;  %2275 = vmatpush.msrb.mxu1 %v1452_v17  ;;  %v673_v7 = vld [vmem:[#allocation20 + $0x38] sm:$0xff]  ;;  %v1596_v2 = vld [vmem:[#allocation17 + $0x1cd0] sm:$0xff] }
 0x267   :  { %2292 = vmatpush.msra.mxu2 %v1490_v18  ;;  %2236 = vmatpush.msrb.mxu3 %v1386_v21  ;;  %v1414_v9 = vld [vmem:[#allocation17 + $0x1720] sm:$0xff]  ;;  %1744 = vst [vmem:[#allocation1 + $0x20] ss:$4 sm:$0xff] %v673_v7  ;;  %v1412_v16 = vld [vmem:[#allocation17 + $0x1710] sm:$0xff] }
 0x268   :  { %2252 = vmatpush.msrb.mxu0 %v1426_v22  ;;  %2276 = vmatpush.msrb.mxu1 %v1450_v59  ;;  %v1474_v17 = vld [vmem:[#allocation17 + $0x1900] sm:$0xff]  ;;  %v1746_v18 = vld.sshfl [vmem:[#allocation1 + $0x8] sm:$0xff pattern:$0x73625140] }
 0x269   :  { %2293 = vmatpush.msra.mxu2 %v1488_v23  ;;  %2237 = vmatpush.msrb.mxu3 %v1384_v25  ;;  %v1530_v21 = vld [vmem:[#allocation17 + $0x1ac0] sm:$0xff]  ;;  %v1632_v59 = vld [vmem:[#allocation17 + $0x1df0] sm:$0xff] }
 0x26a   :  { %2253 = vmatpush.msrb.mxu0 %v1424_v26  ;;  %2277 = vmatpush.msrb.mxu1 %v1448_v27  ;;  %v1594_v22 = vld [vmem:[#allocation17 + $0x1cc0] sm:$0xff]  ;;  %v1528_v25 = vld [vmem:[#allocation17 + $0x1ab0] sm:$0xff] }
 0x26b   :  { %2294 = vmatpush.msra.mxu2 %v1486_v28  ;;  %2238 = vmatpush.msrb.mxu3 %v1382_v31  ;;  %v1410_v23 = vld [vmem:[#allocation17 + $0x1700] sm:$0xff]  ;;  %v1592_v26 = vld [vmem:[#allocation17 + $0x1cb0] sm:$0xff]  ;;  %v1745_v31 = vld.sshfl [vmem:[#allocation1] sm:$0xff pattern:$0x73625140] }
 0x26c   :  { %2254 = vmatpush.msrb.mxu0 %v1422_v34  ;;  %2278 = vmatpush.msrb.mxu1 %v1446_v35  ;;  %v1568_v27 = vld [vmem:[#allocation17 + $0x1bf0] sm:$0xff]  ;;  %v1630_v28 = vld [vmem:[#allocation17 + $0x1de0] sm:$0xff] }
 0x26d   :  { %2295 = vmatpush.msra.mxu2 %v1484_v36  ;;  %2239 = vmatpush.msrb.mxu3 %v1380_v38  ;;  %v1526_v34 = vld [vmem:[#allocation17 + $0x1aa0] sm:$0xff]  ;;  %v1628_v38 = vld [vmem:[#allocation17 + $0x1dd0] sm:$0xff] }
 0x26e   :  { %2255 = vmatpush.msrb.mxu0 %v1420_v39  ;;  %2279 = vmatpush.msrb.mxu1 %v1444_v41  ;;  %v1566_v35 = vld [vmem:[#allocation17 + $0x1be0] sm:$0xff]  ;;  %v1524_v39 = vld [vmem:[#allocation17 + $0x1a90] sm:$0xff] }
 0x26f   :  { %2296 = vmatpush.msra.mxu2 %v1482_v42  ;;  %2240 = vmatpush.msrb.mxu3 %v1378_v43  ;;  %v1590_v36 = vld [vmem:[#allocation17 + $0x1ca0] sm:$0xff]  ;;  %v1564_v41 = vld [vmem:[#allocation17 + $0x1bd0] sm:$0xff] }
 0x270   :  { %2256 = vmatpush.msrb.mxu0 %v1418_v44  ;;  %2280 = vmatpush.msrb.mxu1 %v1442_v46  ;;  %v1588_v42 = vld [vmem:[#allocation17 + $0x1c90] sm:$0xff]  ;;  %v1626_v43 = vld [vmem:[#allocation17 + $0x1dc0] sm:$0xff] }
 0x271   :  { %2297 = vmatpush.msra.mxu2 %v1480_v51  ;;  %2241 = vmatmul.f32.vlgmr.msrb.gmra.mxu3 %v3969_v53  ;;  %v1522_v44 = vld [vmem:[#allocation17 + $0x1a80] sm:$0xff] }
 0x272   :  { %2305 = vmatpush.msra.mxu3 %v1536_v55  ;;  %2345 = vmatpush.msra.mxu1 %v1600_v52  ;;  %v1562_v46 = vld [vmem:[#allocation17 + $0x1bc0] sm:$0xff]  ;;  %v1624_v55 = vld [vmem:[#allocation17 + $0x1db0] sm:$0xff] }
 0x273   :  { %2257 = vmatpush.msrb.mxu0 %v1416_v62  ;;  %2298 = vmatpush.msra.mxu2 %v1478_v63  ;;  %v1586_v51 = vld [vmem:[#allocation17 + $0x1c80] sm:$0xff]  ;;  %v1520_v52 = vld [vmem:[#allocation17 + $0x1a70] sm:$0xff] }
 0x274   :  { %2306 = vmatpush.msra.mxu3 %v1534_v0  ;;  %2346 = vmatpush.msra.mxu1 %v1598_v3  ;;  %v1560_v62 = vld [vmem:[#allocation17 + $0x1bb0] sm:$0xff]  ;;  %v1622_v0 = vld [vmem:[#allocation17 + $0x1da0] sm:$0xff] }
 0x275   :  { %2258 = vmatpush.msrb.mxu0 %v1414_v9  ;;  %2299 = vmatpush.msra.mxu2 %v1476_v11  ;;  %v1584_v63 = vld [vmem:[#allocation17 + $0x1c70] sm:$0xff]  ;;  %v1518_v3 = vld [vmem:[#allocation17 + $0x1a60] sm:$0xff] }
 0x276   :  { %2307 = vmatpush.msra.mxu3 %v1532_v12  ;;  %2347 = vmatpush.msra.mxu1 %v1596_v2  ;;  %v1558_v7 = vld [vmem:[#allocation17 + $0x1ba0] sm:$0xff]  ;;  %v1620_v11 = vld [vmem:[#allocation17 + $0x1d90] sm:$0xff] }
 0x277   :  { %2259 = vmatpush.msrb.mxu0 %v1412_v16  ;;  %2300 = vmatpush.msra.mxu2 %v1474_v17  ;;  %v1582_v9 = vld [vmem:[#allocation17 + $0x1c60] sm:$0xff]  ;;  %v1516_v12 = vld [vmem:[#allocation17 + $0x1a50] sm:$0xff] }
 0x278   :  { %2301 = vmatmul.f32.vlgmr.msra.gmra.mxu2 %v1746_v18  ;;  %2308 = vmatpush.msra.mxu3 %v1530_v21  ;;  %v1556_v2 = vld [vmem:[#allocation17 + $0x1b90] sm:$0xff]  ;;  %v1618_v17 = vld [vmem:[#allocation17 + $0x1d80] sm:$0xff] }
 0x279   :  { %2348 = vmatpush.msra.mxu1 %v1594_v22  ;;  %2365 = vmatpush.msrb.mxu2 %v1632_v59  ;;  %v1580_v16 = vld [vmem:[#allocation17 + $0x1c50] sm:$0xff]  ;;  %v1514_v18 = vld [vmem:[#allocation17 + $0x1a40] sm:$0xff] }
 0x27a   :  { %2260 = vmatpush.msrb.mxu0 %v1410_v23  ;;  %2309 = vmatpush.msra.mxu3 %v1528_v25  ;;  %v1554_v21 = vld [vmem:[#allocation17 + $0x1b80] sm:$0xff]  ;;  %v1616_v59 = vld [vmem:[#allocation17 + $0x1d70] sm:$0xff] }
 0x27b   :  { %2261 = vmatmul.f32.vlgmr.msrb.gmra.mxu0 %v3972_v8  ;;  %2349 = vmatpush.msra.mxu1 %v1592_v26  ;;  %v1578_v22 = vld [vmem:[#allocation17 + $0x1c40] sm:$0xff]  ;;  %v1512_v23 = vld [vmem:[#allocation17 + $0x1a30] sm:$0xff] }
 0x27c   :  { %2325 = vmatpush.msra.mxu0 %v1568_v27  ;;  %2366 = vmatpush.msrb.mxu2 %v1630_v28  ;;  %v1552_v25 = vld [vmem:[#allocation17 + $0x1b70] sm:$0xff]  ;;  %v1614_v27 = vld [vmem:[#allocation17 + $0x1d60] sm:$0xff] }
 0x27d   :  { %2281 = vmatmul.f32.vlgmr.msrb.gmra.mxu1 %v1745_v31  ;;  %2310 = vmatpush.msra.mxu3 %v1526_v34  ;;  %v1576_v26 = vld [vmem:[#allocation17 + $0x1c30] sm:$0xff]  ;;  %v1510_v28 = vld [vmem:[#allocation17 + $0x1a20] sm:$0xff] }
 0x27e   :  { %2326 = vmatpush.msra.mxu0 %v1566_v35  ;;  %2350 = vmatpush.msra.mxu1 %v1590_v36  ;;  %v1550_v31 = vld [vmem:[#allocation17 + $0x1b60] sm:$0xff]  ;;  %v1612_v35 = vld [vmem:[#allocation17 + $0x1d50] sm:$0xff] }
 0x27f   :  { %2367 = vmatpush.msrb.mxu2 %v1628_v38  ;;  %2311 = vmatpush.msra.mxu3 %v1524_v39  ;;  %v1574_v34 = vld [vmem:[#allocation17 + $0x1c20] sm:$0xff]  ;;  %v1508_v36 = vld [vmem:[#allocation17 + $0x1a10] sm:$0xff] }
 0x280   :  { %2327 = vmatpush.msra.mxu0 %v1564_v41  ;;  %2351 = vmatpush.msra.mxu1 %v1588_v42  ;;  %v1548_v38 = vld [vmem:[#allocation17 + $0x1b50] sm:$0xff]  ;;  %v1610_v41 = vld [vmem:[#allocation17 + $0x1d40] sm:$0xff] }
 0x281   :  { %2368 = vmatpush.msrb.mxu2 %v1626_v43  ;;  %2312 = vmatpush.msra.mxu3 %v1522_v44  ;;  %v1572_v39 = vld [vmem:[#allocation17 + $0x1c10] sm:$0xff]  ;;  %v1506_v42 = vld [vmem:[#allocation17 + $0x1a00] sm:$0xff] }
 0x282   :  { %2328 = vmatpush.msra.mxu0 %v1562_v46  ;;  %2352 = vmatpush.msra.mxu1 %v1586_v51  ;;  %v1546_v43 = vld [vmem:[#allocation17 + $0x1b40] sm:$0xff]  ;;  %v1608_v46 = vld [vmem:[#allocation17 + $0x1d30] sm:$0xff]  ;;  %v1747_v51 = vld.sshfl [vmem:[#allocation1 + $0x10] sm:$0xff pattern:$0x73625140] }
 0x283   :  { %2369 = vmatpush.msrb.mxu2 %v1624_v55  ;;  %2313 = vmatpush.msra.mxu3 %v1520_v52  ;;  %v1570_v44 = vld [vmem:[#allocation17 + $0x1c00] sm:$0xff]  ;;  %v1664_v55 = vld [vmem:[#allocation17 + $0x1ef0] sm:$0xff]  ;;  %v705_v52 = vld [vmem:[#allocation17 + $0xf8] sm:$0xff] }
 0x284   :  { %2329 = vmatpush.msra.mxu0 %v1560_v62  ;;  %2353 = vmatpush.msra.mxu1 %v1584_v63  ;;  %v1544_v62 = vld [vmem:[#allocation17 + $0x1b30] sm:$0xff]  ;;  %v1606_v63 = vld [vmem:[#allocation17 + $0x1d20] sm:$0xff] }
 0x285   :  { %2370 = vmatpush.msrb.mxu2 %v1622_v0  ;;  %2314 = vmatpush.msra.mxu3 %v1518_v3  ;;  %v1662_v0 = vld [vmem:[#allocation17 + $0x1ee0] sm:$0xff]  ;;  %v703_v3 = vld [vmem:[#allocation17 + $0xe8] sm:$0xff] }
 0x286   :  { %2330 = vmatpush.msra.mxu0 %v1558_v7  ;;  %2354 = vmatpush.msra.mxu1 %v1582_v9  ;;  %v1542_v7 = vld [vmem:[#allocation17 + $0x1b20] sm:$0xff]  ;;  %v1604_v9 = vld [vmem:[#allocation17 + $0x1d10] sm:$0xff] }
 0x287   :  { %2371 = vmatpush.msrb.mxu2 %v1620_v11  ;;  %2315 = vmatpush.msra.mxu3 %v1516_v12  ;;  %v1660_v11 = vld [vmem:[#allocation17 + $0x1ed0] sm:$0xff]  ;;  %v701_v12 = vld [vmem:[#allocation17 + $0xd8] sm:$0xff] }
 0x288   :  { %2331 = vmatpush.msra.mxu0 %v1556_v2  ;;  %2355 = vmatpush.msra.mxu1 %v1580_v16  ;;  %v1540_v2 = vld [vmem:[#allocation17 + $0x1b10] sm:$0xff]  ;;  %v1602_v16 = vld [vmem:[#allocation17 + $0x1d00] sm:$0xff] }
 0x289   :  { %2372 = vmatpush.msrb.mxu2 %v1618_v17  ;;  %2316 = vmatpush.msra.mxu3 %v1514_v18  ;;  %v1750_v17 = vld.sshfl [vmem:[#allocation1 + $0x28] sm:$0xff pattern:$0x73625140]  ;;  %v1658_v18 = vld [vmem:[#allocation17 + $0x1ec0] sm:$0xff] }
 0x28a   :  { %2332 = vmatpush.msra.mxu0 %v1554_v21  ;;  %2356 = vmatpush.msra.mxu1 %v1578_v22  ;;  %v699_v21 = vld [vmem:[#allocation17 + $0xc8] sm:$0xff]  ;;  %v737_v22 = vld [vmem:[#allocation17 + $0x1f8] sm:$0xff] }
 0x28b   :  { %2373 = vmatpush.msrb.mxu2 %v1616_v59  ;;  %2317 = vmatpush.msra.mxu3 %v1512_v23  ;;  %v1538_v59 = vld [vmem:[#allocation17 + $0x1b00] sm:$0xff]  ;;  %v1656_v23 = vld [vmem:[#allocation17 + $0x1eb0] sm:$0xff] }
 0x28c   :  { %2333 = vmatpush.msra.mxu0 %v1552_v25  ;;  %2357 = vmatpush.msra.mxu1 %v1576_v26  ;;  %v1748_v25 = vld.sshfl [vmem:[#allocation1 + $0x18] sm:$0xff pattern:$0x73625140]  ;;  %v697_v26 = vld [vmem:[#allocation17 + $0xb8] sm:$0xff] }
 0x28d   :  { %2374 = vmatpush.msrb.mxu2 %v1614_v27  ;;  %2318 = vmatpush.msra.mxu3 %v1510_v28  ;;  %v1696_v27 = vld [vmem:[#allocation17 + $0x1ff0] sm:$0xff]  ;;  %v735_v28 = vld [vmem:[#allocation17 + $0x1e8] sm:$0xff] }
 0x28e   :  { %2334 = vmatpush.msra.mxu0 %v1550_v31  ;;  %2358 = vmatpush.msra.mxu1 %v1574_v34  ;;  %v1749_v31 = vld.sshfl [vmem:[#allocation1 + $0x20] sm:$0xff pattern:$0x73625140]  ;;  %v1654_v34 = vld [vmem:[#allocation17 + $0x1ea0] sm:$0xff] }
 0x28f   :  { %2375 = vmatpush.msrb.mxu2 %v1612_v35  ;;  %2319 = vmatpush.msra.mxu3 %v1508_v36  ;;  %v1694_v35 = vld [vmem:[#allocation17 + $0x1fe0] sm:$0xff]  ;;  %v695_v36 = vld [vmem:[#allocation17 + $0xa8] sm:$0xff] }
 0x290   :  { %2335 = vmatpush.msra.mxu0 %v1548_v38  ;;  %2359 = vmatpush.msra.mxu1 %v1572_v39  ;;  %v733_v38 = vld [vmem:[#allocation17 + $0x1d8] sm:$0xff]  ;;  %v1652_v39 = vld [vmem:[#allocation17 + $0x1e90] sm:$0xff] }
 0x291   :  { %2376 = vmatpush.msrb.mxu2 %v1610_v41  ;;  %2320 = vmatpush.msra.mxu3 %v1506_v42  ;;  %v1692_v41 = vld [vmem:[#allocation17 + $0x1fd0] sm:$0xff]  ;;  %v693_v42 = vld [vmem:[#allocation17 + $0x98] sm:$0xff] }
 0x292   :  { %2336 = vmatpush.msra.mxu0 %v1546_v43  ;;  %2360 = vmatpush.msra.mxu1 %v1570_v44  ;;  %v731_v43 = vld [vmem:[#allocation17 + $0x1c8] sm:$0xff]  ;;  %v1650_v44 = vld [vmem:[#allocation17 + $0x1e80] sm:$0xff] }
 0x293   :  { %2377 = vmatpush.msrb.mxu2 %v1608_v46  ;;  %2321 = vmatmul.f32.vlgmr.msra.gmra.mxu3 %v1747_v51  ;;  %v1690_v46 = vld [vmem:[#allocation17 + $0x1fc0] sm:$0xff]  ;;  %v691_v51 = vld [vmem:[#allocation17 + $0x88] sm:$0xff] }
 0x294   :  { %2385 = vmatpush.msrb.mxu3 %v1664_v55  ;;  %2425 = vmatpush.msrb.mxu1 %v705_v52  ;;  %v729_v55 = vld [vmem:[#allocation17 + $0x1b8] sm:$0xff]  ;;  %v1648_v52 = vld [vmem:[#allocation17 + $0x1e70] sm:$0xff] }
 0x295   :  { %2337 = vmatpush.msra.mxu0 %v1544_v62  ;;  %2378 = vmatpush.msrb.mxu2 %v1606_v63  ;;  %v1688_v62 = vld [vmem:[#allocation17 + $0x1fb0] sm:$0xff]  ;;  %v689_v63 = vld [vmem:[#allocation17 + $0x78] sm:$0xff] }
 0x296   :  { %2386 = vmatpush.msrb.mxu3 %v1662_v0  ;;  %2426 = vmatpush.msrb.mxu1 %v703_v3  ;;  %v727_v0 = vld [vmem:[#allocation17 + $0x1a8] sm:$0xff]  ;;  %v1646_v3 = vld [vmem:[#allocation17 + $0x1e60] sm:$0xff] }
 0x297   :  { %2338 = vmatpush.msra.mxu0 %v1542_v7  ;;  %2379 = vmatpush.msrb.mxu2 %v1604_v9  ;;  %v1686_v7 = vld [vmem:[#allocation17 + $0x1fa0] sm:$0xff]  ;;  %v687_v9 = vld [vmem:[#allocation17 + $0x68] sm:$0xff] }
 0x298   :  { %2387 = vmatpush.msrb.mxu3 %v1660_v11  ;;  %2427 = vmatpush.msrb.mxu1 %v701_v12  ;;  %v725_v11 = vld [vmem:[#allocation17 + $0x198] sm:$0xff]  ;;  %v1644_v12 = vld [vmem:[#allocation17 + $0x1e50] sm:$0xff] }
 0x299   :  { %2339 = vmatpush.msra.mxu0 %v1540_v2  ;;  %2380 = vmatpush.msrb.mxu2 %v1602_v16  ;;  %v1684_v2 = vld [vmem:[#allocation17 + $0x1f90] sm:$0xff]  ;;  %v685_v16 = vld [vmem:[#allocation17 + $0x58] sm:$0xff] }
 0x29a   :  { %2381 = vmatmul.f32.vlgmr.msrb.gmra.mxu2 %v1750_v17  ;;  %2388 = vmatpush.msrb.mxu3 %v1658_v18  ;;  %v723_v17 = vld [vmem:[#allocation17 + $0x188] sm:$0xff]  ;;  %v1642_v18 = vld [vmem:[#allocation17 + $0x1e40] sm:$0xff] }
 0x29b   :  { %2428 = vmatpush.msrb.mxu1 %v699_v21  ;;  %2445 = vmatpush.msra.mxu2 %v737_v22  ;;  %v1682_v21 = vld [vmem:[#allocation17 + $0x1f80] sm:$0xff]  ;;  %v683_v22 = vld [vmem:[#allocation17 + $0x48] sm:$0xff] }
 0x29c   :  { %2340 = vmatpush.msra.mxu0 %v1538_v59  ;;  %2389 = vmatpush.msrb.mxu3 %v1656_v23  ;;  %v721_v59 = vld [vmem:[#allocation17 + $0x178] sm:$0xff]  ;;  %v1640_v23 = vld [vmem:[#allocation17 + $0x1e30] sm:$0xff] }
 0x29d   :  { %2341 = vmatmul.f32.vlgmr.msra.gmra.mxu0 %v1748_v25  ;;  %2429 = vmatpush.msrb.mxu1 %v697_v26  ;;  %v1680_v25 = vld [vmem:[#allocation17 + $0x1f70] sm:$0xff]  ;;  %v681_v26 = vld [vmem:[#allocation17 + $0x38] sm:$0xff] }
 0x29e   :  { %2405 = vmatpush.msrb.mxu0 %v1696_v27  ;;  %2446 = vmatpush.msra.mxu2 %v735_v28  ;;  %v719_v27 = vld [vmem:[#allocation17 + $0x168] sm:$0xff]  ;;  %v1638_v28 = vld [vmem:[#allocation17 + $0x1e20] sm:$0xff] }
 0x29f   :  { %2361 = vmatmul.f32.vlgmr.msra.gmra.mxu1 %v1749_v31  ;;  %2390 = vmatpush.msrb.mxu3 %v1654_v34  ;;  %v1678_v31 = vld [vmem:[#allocation17 + $0x1f60] sm:$0xff]  ;;  %v679_v34 = vld [vmem:[#allocation17 + $0x28] sm:$0xff] }
 0x2a0   :  { %2406 = vmatpush.msrb.mxu0 %v1694_v35  ;;  %2430 = vmatpush.msrb.mxu1 %v695_v36  ;;  %v717_v35 = vld [vmem:[#allocation17 + $0x158] sm:$0xff]  ;;  %v1636_v36 = vld [vmem:[#allocation17 + $0x1e10] sm:$0xff] }
 0x2a1   :  { %2447 = vmatpush.msra.mxu2 %v733_v38  ;;  %2391 = vmatpush.msrb.mxu3 %v1652_v39  ;;  %v1676_v38 = vld [vmem:[#allocation17 + $0x1f50] sm:$0xff]  ;;  %v677_v39 = vld [vmem:[#allocation17 + $0x18] sm:$0xff] }
 0x2a2   :  { %2407 = vmatpush.msrb.mxu0 %v1692_v41  ;;  %2431 = vmatpush.msrb.mxu1 %v693_v42  ;;  %v715_v41 = vld [vmem:[#allocation17 + $0x148] sm:$0xff]  ;;  %v1634_v42 = vld [vmem:[#allocation17 + $0x1e00] sm:$0xff] }
 0x2a3   :  { %2448 = vmatpush.msra.mxu2 %v731_v43  ;;  %2392 = vmatpush.msrb.mxu3 %v1650_v44  ;;  %v1674_v43 = vld [vmem:[#allocation17 + $0x1f40] sm:$0xff]  ;;  %v675_v44 = vld [vmem:[#allocation17 + $0x8] sm:$0xff] }
 0x2a4   :  { %2408 = vmatpush.msrb.mxu0 %v1690_v46  ;;  %2432 = vmatpush.msrb.mxu1 %v691_v51  ;;  %v713_v46 = vld [vmem:[#allocation17 + $0x138] sm:$0xff] }
 0x2a5   :  { %2449 = vmatpush.msra.mxu2 %v729_v55  ;;  %2393 = vmatpush.msrb.mxu3 %v1648_v52  ;;  %v1751_v51 = vld.sshfl [vmem:[#allocation1 + $0x30] sm:$0xff pattern:$0x73625140] }
 0x2a6   :  { %2409 = vmatpush.msrb.mxu0 %v1688_v62  ;;  %2433 = vmatpush.msrb.mxu1 %v689_v63  ;;  %v769_v55 = vld [vmem:[#allocation17 + $0x2f8] sm:$0xff]  ;;  %v1672_v62 = vld [vmem:[#allocation17 + $0x1f30] sm:$0xff]  ;;  %v711_v63 = vld [vmem:[#allocation17 + $0x128] sm:$0xff] }
 0x2a7   :  { %2450 = vmatpush.msra.mxu2 %v727_v0  ;;  %2394 = vmatpush.msrb.mxu3 %v1646_v3  ;;  %v833_v52 = vld [vmem:[#allocation17 + $0x4f8] sm:$0xff]  ;;  %v767_v0 = vld [vmem:[#allocation17 + $0x2e8] sm:$0xff] }
 0x2a8   :  { %2410 = vmatpush.msrb.mxu0 %v1686_v7  ;;  %2434 = vmatpush.msrb.mxu1 %v687_v9  ;;  %v831_v3 = vld [vmem:[#allocation17 + $0x4e8] sm:$0xff]  ;;  %v1670_v7 = vld [vmem:[#allocation17 + $0x1f20] sm:$0xff]  ;;  %v709_v9 = vld [vmem:[#allocation17 + $0x118] sm:$0xff] }
 0x2a9   :  { %2451 = vmatpush.msra.mxu2 %v725_v11  ;;  %2395 = vmatpush.msrb.mxu3 %v1644_v12  ;;  %v765_v11 = vld [vmem:[#allocation17 + $0x2d8] sm:$0xff] }
 0x2aa   :  { %2411 = vmatpush.msrb.mxu0 %v1684_v2  ;;  %2435 = vmatpush.msrb.mxu1 %v685_v16  ;;  %v829_v12 = vld [vmem:[#allocation17 + $0x4d8] sm:$0xff]  ;;  %v1668_v2 = vld [vmem:[#allocation17 + $0x1f10] sm:$0xff]  ;;  %v707_v16 = vld [vmem:[#allocation17 + $0x108] sm:$0xff] }
 0x2ab   :  { %2452 = vmatpush.msra.mxu2 %v723_v17  ;;  %2396 = vmatpush.msrb.mxu3 %v1642_v18  ;;  %v763_v17 = vld [vmem:[#allocation17 + $0x2c8] sm:$0xff] }
 0x2ac   :  { %2412 = vmatpush.msrb.mxu0 %v1682_v21  ;;  %2436 = vmatpush.msrb.mxu1 %v683_v22  ;;  %v827_v18 = vld [vmem:[#allocation17 + $0x4c8] sm:$0xff]  ;;  %v865_v21 = vld [vmem:[#allocation17 + $0x5f8] sm:$0xff]  ;;  %v1666_v22 = vld [vmem:[#allocation17 + $0x1f00] sm:$0xff] }
 0x2ad   :  { %2453 = vmatpush.msra.mxu2 %v721_v59  ;;  %2397 = vmatpush.msrb.mxu3 %v1640_v23  ;;  %v1752_v59 = vld.sshfl [vmem:[#allocation1 + $0x38] sm:$0xff pattern:$0x73625140]  ;;  %v761_v23 = vld [vmem:[#allocation17 + $0x2b8] sm:$0xff] }
 0x2ae   :  { %2413 = vmatpush.msrb.mxu0 %v1680_v25  ;;  %2437 = vmatpush.msrb.mxu1 %v681_v26  ;;  %v801_v25 = vld [vmem:[#allocation17 + $0x3f8] sm:$0xff] }
 0x2af   :  { %2454 = vmatpush.msra.mxu2 %v719_v27  ;;  %2398 = vmatpush.msrb.mxu3 %v1638_v28  ;;  %v825_v26 = vld [vmem:[#allocation17 + $0x4b8] sm:$0xff]  ;;  %v863_v27 = vld [vmem:[#allocation17 + $0x5e8] sm:$0xff] }
 0x2b0   :  { %2414 = vmatpush.msrb.mxu0 %v1678_v31  ;;  %2438 = vmatpush.msrb.mxu1 %v679_v34  ;;  %v759_v28 = vld [vmem:[#allocation17 + $0x2a8] sm:$0xff] }
 0x2b1   :  { %2455 = vmatpush.msra.mxu2 %v717_v35  ;;  %2399 = vmatpush.msrb.mxu3 %v1636_v36  ;;  %v799_v31 = vld [vmem:[#allocation17 + $0x3e8] sm:$0xff]  ;;  %v861_v35 = vld [vmem:[#allocation17 + $0x5d8] sm:$0xff] }
 0x2b2   :  { %2415 = vmatpush.msrb.mxu0 %v1676_v38  ;;  %2439 = vmatpush.msrb.mxu1 %v677_v39  ;;  %v823_v34 = vld [vmem:[#allocation17 + $0x4a8] sm:$0xff]  ;;  %v757_v36 = vld [vmem:[#allocation17 + $0x298] sm:$0xff] }
 0x2b3   :  { %2456 = vmatpush.msra.mxu2 %v715_v41  ;;  %2400 = vmatpush.msrb.mxu3 %v1634_v42  ;;  %v797_v38 = vld [vmem:[#allocation17 + $0x3d8] sm:$0xff]  ;;  %v859_v41 = vld [vmem:[#allocation17 + $0x5c8] sm:$0xff] }
 0x2b4   :  { %2416 = vmatpush.msrb.mxu0 %v1674_v43  ;;  %2440 = vmatpush.msrb.mxu1 %v675_v44  ;;  %v821_v39 = vld [vmem:[#allocation17 + $0x498] sm:$0xff]  ;;  %v755_v42 = vld [vmem:[#allocation17 + $0x288] sm:$0xff] }
 0x2b5   :  { %2457 = vmatpush.msra.mxu2 %v713_v46  ;;  %2401 = vmatmul.f32.vlgmr.msrb.gmra.mxu3 %v1751_v51  ;;  %v795_v43 = vld [vmem:[#allocation17 + $0x3c8] sm:$0xff]  ;;  %v857_v46 = vld [vmem:[#allocation17 + $0x5b8] sm:$0xff] }
 0x2b6   :  { %2465 = vmatpush.msra.mxu3 %v769_v55  ;;  %2505 = vmatpush.msra.mxu1 %v833_v52  ;;  %v819_v44 = vld [vmem:[#allocation17 + $0x488] sm:$0xff]  ;;  %v753_v51 = vld [vmem:[#allocation17 + $0x278] sm:$0xff] }
 0x2b7   :  { %2417 = vmatpush.msrb.mxu0 %v1672_v62  ;;  %2458 = vmatpush.msra.mxu2 %v711_v63  ;;  %v793_v55 = vld [vmem:[#allocation17 + $0x3b8] sm:$0xff]  ;;  %v855_v62 = vld [vmem:[#allocation17 + $0x5a8] sm:$0xff] }
 0x2b8   :  { %2466 = vmatpush.msra.mxu3 %v767_v0  ;;  %2506 = vmatpush.msra.mxu1 %v831_v3  ;;  %v817_v52 = vld [vmem:[#allocation17 + $0x478] sm:$0xff]  ;;  %v751_v63 = vld [vmem:[#allocation17 + $0x268] sm:$0xff] }
 0x2b9   :  { %2418 = vmatpush.msrb.mxu0 %v1670_v7  ;;  %2459 = vmatpush.msra.mxu2 %v709_v9  ;;  %v791_v0 = vld [vmem:[#allocation17 + $0x3a8] sm:$0xff]  ;;  %v853_v7 = vld [vmem:[#allocation17 + $0x598] sm:$0xff] }
 0x2ba   :  { %2467 = vmatpush.msra.mxu3 %v765_v11  ;;  %2507 = vmatpush.msra.mxu1 %v829_v12  ;;  %v815_v3 = vld [vmem:[#allocation17 + $0x468] sm:$0xff]  ;;  %v749_v9 = vld [vmem:[#allocation17 + $0x258] sm:$0xff] }
 0x2bb   :  { %2419 = vmatpush.msrb.mxu0 %v1668_v2  ;;  %2460 = vmatpush.msra.mxu2 %v707_v16  ;;  %v789_v11 = vld [vmem:[#allocation17 + $0x398] sm:$0xff]  ;;  %v851_v2 = vld [vmem:[#allocation17 + $0x588] sm:$0xff] }
 0x2bc   :  { %2468 = vmatpush.msra.mxu3 %v763_v17  ;;  %2508 = vmatpush.msra.mxu1 %v827_v18  ;;  %v813_v12 = vld [vmem:[#allocation17 + $0x458] sm:$0xff]  ;;  %v747_v16 = vld [vmem:[#allocation17 + $0x248] sm:$0xff] }
 0x2bd   :  { %2525 = vmatpush.msrb.mxu2 %v865_v21  ;;  %2420 = vmatpush.msrb.mxu0 %v1666_v22  ;;  %v787_v17 = vld [vmem:[#allocation17 + $0x388] sm:$0xff]  ;;  %v849_v21 = vld [vmem:[#allocation17 + $0x578] sm:$0xff] }
 0x2be   :  { %2421 = vmatmul.f32.vlgmr.msrb.gmra.mxu0 %v1752_v59  ;;  %2469 = vmatpush.msra.mxu3 %v761_v23  ;;  %v811_v18 = vld [vmem:[#allocation17 + $0x448] sm:$0xff]  ;;  %v745_v22 = vld [vmem:[#allocation17 + $0x238] sm:$0xff] }
 0x2bf   :  { %2485 = vmatpush.msra.mxu0 %v801_v25  ;;  %2509 = vmatpush.msra.mxu1 %v825_v26  ;;  %v785_v59 = vld [vmem:[#allocation17 + $0x378] sm:$0xff]  ;;  %v847_v25 = vld [vmem:[#allocation17 + $0x568] sm:$0xff] }
 0x2c0   :  { %2526 = vmatpush.msrb.mxu2 %v863_v27  ;;  %2470 = vmatpush.msra.mxu3 %v759_v28  ;;  %v809_v23 = vld [vmem:[#allocation17 + $0x438] sm:$0xff]  ;;  %v743_v26 = vld [vmem:[#allocation17 + $0x228] sm:$0xff]  ;;  %v1698_v27 = vld [vmem:[#allocation19] sm:$0x3] }
 0x2c1   :  { %2486 = vmatpush.msra.mxu0 %v799_v31  ;;  %2510 = vmatpush.msra.mxu1 %v823_v34  ;;  %v783_v28 = vld [vmem:[#allocation17 + $0x368] sm:$0xff]  ;;  %v845_v34 = vld [vmem:[#allocation17 + $0x558] sm:$0xff] }
 0x2c2   :  { %2527 = vmatpush.msrb.mxu2 %v861_v35  ;;  %2471 = vmatpush.msra.mxu3 %v757_v36  ;;  %v807_v31 = vld [vmem:[#allocation17 + $0x428] sm:$0xff]  ;;  %v741_v35 = vld [vmem:[#allocation17 + $0x218] sm:$0xff] }
 0x2c3   :  { %2487 = vmatpush.msra.mxu0 %v797_v38  ;;  %2511 = vmatpush.msra.mxu1 %v821_v39  ;;  %v781_v36 = vld [vmem:[#allocation17 + $0x358] sm:$0xff]  ;;  %v1700_v39 = vperm.slane %v1698_v27, 0 }
 0x2c4   :  { %2528 = vmatpush.msrb.mxu2 %v859_v41  ;;  %2472 = vmatpush.msra.mxu3 %v755_v42  ;;  %v805_v38 = vld [vmem:[#allocation17 + $0x418] sm:$0xff]  ;;  %v843_v41 = vld [vmem:[#allocation17 + $0x548] sm:$0xff] }
 0x2c5   :  { %2488 = vmatpush.msra.mxu0 %v795_v43  ;;  %2512 = vmatpush.msra.mxu1 %v819_v44  ;;  %v739_v42 = vld [vmem:[#allocation17 + $0x208] sm:$0xff]  ;;  %v1802_v43 = vpop.f32.mrf.mxu1 }
 0x2c6   :  { %2529 = vmatpush.msrb.mxu2 %v857_v46  ;;  %2473 = vmatpush.msra.mxu3 %v753_v51  ;;  %v779_v44 = vld [vmem:[#allocation17 + $0x348] sm:$0xff]  ;;  %v841_v51 = vld [vmem:[#allocation17 + $0x538] sm:$0xff] }
 0x2c7   :  { %2489 = vmatpush.msra.mxu0 %v793_v55  ;;  %2513 = vmatpush.msra.mxu1 %v817_v52  ;;  %v803_v46 = vld [vmem:[#allocation17 + $0x408] sm:$0xff]  ;;  %v897_v55 = vld [vmem:[#allocation17 + $0x6f8] sm:$0xff] }
 0x2c8   :  { %2530 = vmatpush.msrb.mxu2 %v855_v62  ;;  %2474 = vmatpush.msra.mxu3 %v751_v63  ;;  %v961_v52 = vld [vmem:[#allocation17 + $0x8f8] sm:$0xff]  ;;  %v1803_v62 = vadd.f32 %v1802_v43, %v1700_v39  ;;  %v951_v39 = vld [vmem:[#allocation17 + $0x8a8] sm:$0xff] }
 0x2c9   :  { %2490 = vmatpush.msra.mxu0 %v791_v0  ;;  %2514 = vmatpush.msra.mxu1 %v815_v3  ;;  %v777_v63 = vld [vmem:[#allocation17 + $0x338] sm:$0xff]  ;;  %v839_v0 = vld [vmem:[#allocation17 + $0x528] sm:$0xff]  ;;  %v1822_v3 = vpop.f32.mrf.mxu2 }
 0x2ca   :  { %2531 = vmatpush.msrb.mxu2 %v853_v7  ;;  %2475 = vmatpush.msra.mxu3 %v749_v9  ;;  %v895_v7 = vld [vmem:[#allocation17 + $0x6e8] sm:$0xff] }
 0x2cb   :  { %2491 = vmatpush.msra.mxu0 %v789_v11  ;;  %2515 = vmatpush.msra.mxu1 %v813_v12  ;;  %v959_v9 = vld [vmem:[#allocation17 + $0x8e8] sm:$0xff]  ;;  %v837_v12 = vld [vmem:[#allocation17 + $0x518] sm:$0xff] }
 0x2cc   :  { %2532 = vmatpush.msrb.mxu2 %v851_v2  ;;  %2476 = vmatpush.msra.mxu3 %v747_v16  ;;  %v775_v11 = vld [vmem:[#allocation17 + $0x328] sm:$0xff]  ;;  %v893_v2 = vld [vmem:[#allocation17 + $0x6d8] sm:$0xff] }
 0x2cd   :  { %2492 = vmatpush.msra.mxu0 %v787_v17  ;;  %2516 = vmatpush.msra.mxu1 %v811_v18  ;;  %v957_v16 = vld [vmem:[#allocation17 + $0x8d8] sm:$0xff]  ;;  %v1823_v17 = vadd.f32 %v1822_v3, %v1803_v62  ;;  %v947_v62 = vld [vmem:[#allocation17 + $0x888] sm:$0xff] }
 0x2ce   :  { %2533 = vmatpush.msrb.mxu2 %v849_v21  ;;  %2477 = vmatpush.msra.mxu3 %v745_v22  ;;  %v773_v18 = vld [vmem:[#allocation17 + $0x318] sm:$0xff]  ;;  %v835_v21 = vld [vmem:[#allocation17 + $0x508] sm:$0xff]  ;;  %v1842_v22 = vpop.f32.mrf.mxu3 }
 0x2cf   :  { %2493 = vmatpush.msra.mxu0 %v785_v59  ;;  %2517 = vmatpush.msra.mxu1 %v809_v23  ;;  %v891_v59 = vld [vmem:[#allocation17 + $0x6c8] sm:$0xff]  ;;  %v993_v23 = vld [vmem:[#allocation17 + $0x9f8] sm:$0xff]  ;;  %v1843_v27 = vadd.f32 %v1842_v22, %v1823_v17 }
 0x2d0   :  { %2534 = vmatpush.msrb.mxu2 %v847_v25  ;;  %2478 = vmatpush.msra.mxu3 %v743_v26  ;;  %v771_v25 = vld [vmem:[#allocation17 + $0x308] sm:$0xff]  ;;  %v889_v26 = vld [vmem:[#allocation17 + $0x6b8] sm:$0xff] }
 0x2d1   :  { %2494 = vmatpush.msra.mxu0 %v783_v28  ;;  %2518 = vmatpush.msra.mxu1 %v807_v31  ;;  %v929_v28 = vld [vmem:[#allocation17 + $0x7f8] sm:$0xff]  ;;  %v943_v17 = vld [vmem:[#allocation17 + $0x868] sm:$0xff] }
 0x2d2   :  { %2535 = vmatpush.msrb.mxu2 %v845_v34  ;;  %2479 = vmatpush.msra.mxu3 %v741_v35  ;;  %v953_v31 = vld [vmem:[#allocation17 + $0x8b8] sm:$0xff]  ;;  %v1862_v34 = vpop.f32.mrf.mxu0  ;;  %v991_v35 = vld [vmem:[#allocation17 + $0x9e8] sm:$0xff] }
 0x2d3   :  { %2495 = vmatpush.msra.mxu0 %v781_v36  ;;  %2519 = vmatpush.msra.mxu1 %v805_v38  ;;  %v887_v36 = vld [vmem:[#allocation17 + $0x6a8] sm:$0xff]  ;;  %v1863_v43 = vadd.f32 %v1862_v34, %v1843_v27  ;;  %v873_v34 = vld [vmem:[#allocation17 + $0x638] sm:$0xff] }
 0x2d4   :  { %2536 = vmatpush.msrb.mxu2 %v843_v41  ;;  %2480 = vmatpush.msra.mxu3 %v739_v42  ;;  %v927_v38 = vld [vmem:[#allocation17 + $0x7e8] sm:$0xff]  ;;  %v989_v41 = vld [vmem:[#allocation17 + $0x9d8] sm:$0xff] }
 0x2d5   :  { %2496 = vmatpush.msra.mxu0 %v779_v44  ;;  %2520 = vmatpush.msra.mxu1 %v803_v46  ;;  %v885_v42 = vld [vmem:[#allocation17 + $0x698] sm:$0xff]  ;;  %v1882_v46 = vpop.f32.mrf.mxu1  ;;  %v915_v27 = vld [vmem:[#allocation17 + $0x788] sm:$0xff] }
 0x2d6   :  { %2537 = vmatpush.msrb.mxu2 %v841_v51  ;;  %2441 = vmatmul.f32.vlgmr.msrb.gmra.mxu1 %v3893_v5  ;;  %v955_v5 = vld [vmem:[#allocation17 + $0x8c8] sm:$0xff]  ;;  %v949_v44 = vld [vmem:[#allocation17 + $0x898] sm:$0xff]  ;;  %v1883_v3 = vadd.f32 %v1882_v46, %v1863_v43 }
 0x2d7   :  { %2545 = vmatpush.msrb.mxu3 %v897_v55  ;;  %2585 = vmatpush.msrb.mxu1 %v961_v52  ;;  %v987_v51 = vld [vmem:[#allocation17 + $0x9c8] sm:$0xff]  ;;  %v869_v46 = vld [vmem:[#allocation17 + $0x618] sm:$0xff] }
 0x2d8   :  { %2497 = vmatpush.msra.mxu0 %v777_v63  ;;  %2538 = vmatpush.msrb.mxu2 %v839_v0  ;;  %v883_v55 = vld [vmem:[#allocation17 + $0x688] sm:$0xff]  ;;  %v985_v63 = vld [vmem:[#allocation17 + $0x9b8] sm:$0xff] }
 0x2d9   :  { %2546 = vmatpush.msrb.mxu3 %v895_v7  ;;  %2586 = vmatpush.msrb.mxu1 %v959_v9  ;;  %v923_v52 = vld [vmem:[#allocation17 + $0x7c8] sm:$0xff]  ;;  %v881_v0 = vld [vmem:[#allocation17 + $0x678] sm:$0xff] }
 0x2da   :  { %2498 = vmatpush.msra.mxu0 %v775_v11  ;;  %2539 = vmatpush.msrb.mxu2 %v837_v12  ;;  %v921_v7 = vld [vmem:[#allocation17 + $0x7b8] sm:$0xff]  ;;  %v1902_v11 = vpop.f32.mrf.mxu2  ;;  %v983_v12 = vld [vmem:[#allocation17 + $0x9a8] sm:$0xff] }
 0x2db   :  { %2547 = vmatpush.msrb.mxu3 %v893_v2  ;;  %2587 = vmatpush.msrb.mxu1 %v957_v16  ;;  %v945_v9 = vld [vmem:[#allocation17 + $0x878] sm:$0xff]  ;;  %v879_v2 = vld [vmem:[#allocation17 + $0x668] sm:$0xff]  ;;  %v1903_v22 = vadd.f32 %v1902_v11, %v1883_v3 }
 0x2dc   :  { %2499 = vmatpush.msra.mxu0 %v773_v18  ;;  %2540 = vmatpush.msrb.mxu2 %v835_v21  ;;  %v919_v16 = vld [vmem:[#allocation17 + $0x7a8] sm:$0xff]  ;;  %v981_v18 = vld [vmem:[#allocation17 + $0x998] sm:$0xff] }
 0x2dd   :  { %2461 = vmatmul.f32.vlgmr.msra.gmra.mxu2 %v3896_v19  ;;  %2548 = vmatpush.msrb.mxu3 %v891_v59  ;;  %v925_v19 = vld [vmem:[#allocation17 + $0x7d8] sm:$0xff]  ;;  %v911_v43 = vld [vmem:[#allocation17 + $0x768] sm:$0xff] }
 0x2de   :  { %2588 = vmatpush.msrb.mxu1 %v955_v5  ;;  %2605 = vmatpush.msra.mxu2 %v993_v23  ;;  %v877_v21 = vld [vmem:[#allocation17 + $0x658] sm:$0xff]  ;;  %v1922_v23 = vpop.f32.mrf.mxu3  ;;  %v907_v3 = vld [vmem:[#allocation17 + $0x748] sm:$0xff] }
 0x2df   :  { %2500 = vmatpush.msra.mxu0 %v771_v25  ;;  %2549 = vmatpush.msrb.mxu3 %v889_v26  ;;  %v917_v59 = vld [vmem:[#allocation17 + $0x798] sm:$0xff]  ;;  %v979_v25 = vld [vmem:[#allocation17 + $0x988] sm:$0xff] }
 0x2e0   :  { %2589 = vmatpush.msrb.mxu1 %v953_v31  ;;  %2606 = vmatpush.msra.mxu2 %v991_v35  ;;  %v941_v5 = vld [vmem:[#allocation17 + $0x858] sm:$0xff]  ;;  %v875_v26 = vld [vmem:[#allocation17 + $0x648] sm:$0xff]  ;;  %v1923_v35 = vadd.f32 %v1922_v23, %v1903_v22 }
 0x2e1   :  { %2565 = vmatpush.msrb.mxu0 %v929_v28  ;;  %2550 = vmatpush.msrb.mxu3 %v887_v36  ;;  %v939_v28 = vld [vmem:[#allocation17 + $0x848] sm:$0xff]  ;;  %v977_v31 = vld [vmem:[#allocation17 + $0x978] sm:$0xff] }
 0x2e2   :  { %2590 = vmatpush.msrb.mxu1 %v951_v39  ;;  %2607 = vmatpush.msra.mxu2 %v989_v41  ;;  %v913_v36 = vld [vmem:[#allocation17 + $0x778] sm:$0xff]  ;;  %v1942_v39 = vpop.f32.mrf.mxu0  ;;  %v975_v41 = vld [vmem:[#allocation17 + $0x968] sm:$0xff] }
 0x2e3   :  { %2566 = vmatpush.msrb.mxu0 %v927_v38  ;;  %2551 = vmatpush.msrb.mxu3 %v885_v42  ;;  %v937_v38 = vld [vmem:[#allocation17 + $0x838] sm:$0xff]  ;;  %v871_v42 = vld [vmem:[#allocation17 + $0x628] sm:$0xff] }
 0x2e4   :  { %2591 = vmatpush.msrb.mxu1 %v949_v44  ;;  %2608 = vmatpush.msra.mxu2 %v987_v51  ;;  %v973_v44 = vld [vmem:[#allocation17 + $0x958] sm:$0xff]  ;;  %v1943_v51 = vadd.f32 %v1942_v39, %v1923_v35 }
 0x2e5   :  { %2567 = vmatpush.msrb.mxu0 %v925_v19  ;;  %2552 = vmatpush.msrb.mxu3 %v883_v55  ;;  %v935_v19 = vld [vmem:[#allocation17 + $0x828] sm:$0xff]  ;;  %v909_v55 = vld [vmem:[#allocation17 + $0x758] sm:$0xff] }
 0x2e6   :  { %2592 = vmatpush.msrb.mxu1 %v947_v62  ;;  %2609 = vmatpush.msra.mxu2 %v985_v63  ;;  %v1962_v62 = vpop.f32.mrf.mxu1  ;;  %v971_v63 = vld [vmem:[#allocation17 + $0x948] sm:$0xff]  ;;  %v2002_v22 = vpop.f32.mrf.mxu3 }
 0x2e7   :  { %2568 = vmatpush.msrb.mxu0 %v923_v52  ;;  %2553 = vmatpush.msrb.mxu3 %v881_v0  ;;  %v933_v52 = vld [vmem:[#allocation17 + $0x818] sm:$0xff]  ;;  %v867_v0 = vld [vmem:[#allocation17 + $0x608] sm:$0xff]  ;;  %v1963_v11 = vadd.f32 %v1962_v62, %v1943_v51 }
 0x2e8   :  { %2593 = vmatpush.msrb.mxu1 %v945_v9  ;;  %2610 = vmatpush.msra.mxu2 %v983_v12  ;;  %v969_v9 = vld [vmem:[#allocation17 + $0x938] sm:$0xff]  ;;  %v1055_v51 = vld [vmem:[#allocation17 + $0xbe8] sm:$0xff] }
 0x2e9   :  { %2569 = vmatpush.msrb.mxu0 %v921_v7  ;;  %2554 = vmatpush.msrb.mxu3 %v879_v2  ;;  %v931_v7 = vld [vmem:[#allocation17 + $0x808] sm:$0xff]  ;;  %v1025_v12 = vld [vmem:[#allocation17 + $0xaf8] sm:$0xff]  ;;  %v1982_v2 = vpop.f32.mrf.mxu2 }
 0x2ea   :  { %2594 = vmatpush.msrb.mxu1 %v943_v17  ;;  %2611 = vmatpush.msra.mxu2 %v981_v18  ;;  %v905_v17 = vld [vmem:[#allocation17 + $0x738] sm:$0xff]  ;;  %v967_v18 = vld [vmem:[#allocation17 + $0x928] sm:$0xff]  ;;  %v1983_v23 = vadd.f32 %v1982_v2, %v1963_v11  ;;  %v2022_v35 = vpop.f32.mrf.mxu0 }
 0x2eb   :  { %2570 = vmatpush.msrb.mxu0 %v919_v16  ;;  %2555 = vmatpush.msrb.mxu3 %v877_v21  ;;  %v1089_v16 = vld [vmem:[#allocation17 + $0xcf8] sm:$0xff]  ;;  %v1023_v21 = vld [vmem:[#allocation17 + $0xae8] sm:$0xff] }
 0x2ec   :  { %2595 = vmatpush.msrb.mxu1 %v941_v5  ;;  %2612 = vmatpush.msra.mxu2 %v979_v25  ;;  %v903_v5 = vld [vmem:[#allocation17 + $0x728] sm:$0xff]  ;;  %v965_v25 = vld [vmem:[#allocation17 + $0x918] sm:$0xff] }
 0x2ed   :  { %2571 = vmatpush.msrb.mxu0 %v917_v59  ;;  %2556 = vmatpush.msrb.mxu3 %v875_v26  ;;  %v1087_v59 = vld [vmem:[#allocation17 + $0xce8] sm:$0xff]  ;;  %v1021_v26 = vld [vmem:[#allocation17 + $0xad8] sm:$0xff] }
 0x2ee   :  { %2596 = vmatpush.msrb.mxu1 %v939_v28  ;;  %2613 = vmatpush.msra.mxu2 %v977_v31  ;;  %v901_v28 = vld [vmem:[#allocation17 + $0x718] sm:$0xff]  ;;  %v2003_v31 = vadd.f32 %v2002_v22, %v1983_v23  ;;  %v1075_v11 = vld [vmem:[#allocation17 + $0xc88] sm:$0xff] }
 0x2ef   :  { %2572 = vmatpush.msrb.mxu0 %v915_v27  ;;  %2557 = vmatpush.msrb.mxu3 %v873_v34  ;;  %v1085_v27 = vld [vmem:[#allocation17 + $0xcd8] sm:$0xff]  ;;  %v1019_v34 = vld [vmem:[#allocation17 + $0xac8] sm:$0xff] }
 0x2f0   :  { %2597 = vmatpush.msrb.mxu1 %v937_v38  ;;  %2614 = vmatpush.msra.mxu2 %v975_v41  ;;  %v899_v38 = vld [vmem:[#allocation17 + $0x708] sm:$0xff]  ;;  %v2023_v39 = vadd.f32 %v2022_v35, %v2003_v31  ;;  %v1017_v41 = vld [vmem:[#allocation17 + $0xab8] sm:$0xff] }
 0x2f1   :  { %2573 = vmatpush.msrb.mxu0 %v913_v36  ;;  %2558 = vmatpush.msrb.mxu3 %v871_v42  ;;  %v1121_v36 = vld [vmem:[#allocation17 + $0xdf8] sm:$0xff]  ;;  %v1111_v22 = vld [vmem:[#allocation17 + $0xda8] sm:$0xff] }
 0x2f2   :  { %2598 = vmatpush.msrb.mxu1 %v935_v19  ;;  %2615 = vmatpush.msra.mxu2 %v973_v44  ;;  %v1057_v42 = vld [vmem:[#allocation17 + $0xbf8] sm:$0xff]  ;;  %v1119_v44 = vld [vmem:[#allocation17 + $0xde8] sm:$0xff] }
 0x2f3   :  { %2574 = vmatpush.msrb.mxu0 %v911_v43  ;;  %2559 = vmatpush.msrb.mxu3 %v869_v46  ;;  %v2042_v43 = vpop.f32.mrf.mxu1  ;;  %v1081_v19 = vld [vmem:[#allocation17 + $0xcb8] sm:$0xff]  ;;  %v1015_v46 = vld [vmem:[#allocation17 + $0xaa8] sm:$0xff] }
 0x2f4   :  { %2599 = vmatpush.msrb.mxu1 %v933_v52  ;;  %2616 = vmatpush.msra.mxu2 %v971_v63  ;;  %v1117_v52 = vld [vmem:[#allocation17 + $0xdd8] sm:$0xff]  ;;  %v2043_v62 = vadd.f32 %v2042_v43, %v2023_v39  ;;  %v1047_v23 = vld [vmem:[#allocation17 + $0xba8] sm:$0xff] }
 0x2f5   :  { %2575 = vmatpush.msrb.mxu0 %v909_v55  ;;  %2560 = vmatpush.msrb.mxu3 %v867_v0  ;;  %v1079_v55 = vld [vmem:[#allocation17 + $0xca8] sm:$0xff]  ;;  %v1053_v63 = vld [vmem:[#allocation17 + $0xbd8] sm:$0xff]  ;;  %v2062_v0 = vpop.f32.mrf.mxu2 }
 0x2f6   :  { %2600 = vmatpush.msrb.mxu1 %v931_v7  ;;  %2617 = vmatpush.msra.mxu2 %v969_v9  ;;  %v1115_v7 = vld [vmem:[#allocation17 + $0xdc8] sm:$0xff]  ;;  %v1113_v2 = vld [vmem:[#allocation17 + $0xdb8] sm:$0xff] }
 0x2f7   :  { %2576 = vmatpush.msrb.mxu0 %v907_v3  ;;  %2481 = vmatmul.f32.vlgmr.msra.gmra.mxu3 %v3899_v29  ;;  %v963_v29 = vld [vmem:[#allocation17 + $0x908] sm:$0xff]  ;;  %v1077_v3 = vld [vmem:[#allocation17 + $0xc98] sm:$0xff] }
 0x2f8   :  { %2521 = vmatmul.f32.vlgmr.msra.gmra.mxu1 %v3903_v56  ;;  %2625 = vmatpush.msra.mxu3 %v1025_v12  ;;  %v1083_v56 = vld [vmem:[#allocation17 + $0xcc8] sm:$0xff]  ;;  %v2063_v12 = vadd.f32 %v2062_v0, %v2043_v62  ;;  %v1069_v31 = vld [vmem:[#allocation17 + $0xc58] sm:$0xff] }
 0x2f9   :  { %2665 = vmatpush.msra.mxu1 %v1089_v16  ;;  %2577 = vmatpush.msrb.mxu0 %v905_v17  ;;  %v1051_v9 = vld [vmem:[#allocation17 + $0xbc8] sm:$0xff]  ;;  %v1009_v16 = vld [vmem:[#allocation17 + $0xa78] sm:$0xff] }
 0x2fa   :  { %2618 = vmatpush.msra.mxu2 %v967_v18  ;;  %2626 = vmatpush.msra.mxu3 %v1023_v21  ;;  %v1049_v17 = vld [vmem:[#allocation17 + $0xbb8] sm:$0xff]  ;;  %v1043_v35 = vld [vmem:[#allocation17 + $0xb88] sm:$0xff] }
 0x2fb   :  { %2666 = vmatpush.msra.mxu1 %v1087_v59  ;;  %2578 = vmatpush.msrb.mxu0 %v903_v5  ;;  %v1073_v21 = vld [vmem:[#allocation17 + $0xc78] sm:$0xff]  ;;  %v2102_v59 = vpop.f32.mrf.mxu0  ;;  %v1007_v5 = vld [vmem:[#allocation17 + $0xa68] sm:$0xff] }
 0x2fc   :  { %2619 = vmatpush.msra.mxu2 %v965_v25  ;;  %2627 = vmatpush.msra.mxu3 %v1021_v26  ;;  %v1071_v25 = vld [vmem:[#allocation17 + $0xc68] sm:$0xff]  ;;  %v1005_v26 = vld [vmem:[#allocation17 + $0xa58] sm:$0xff] }
 0x2fd   :  { %2667 = vmatpush.msra.mxu1 %v1085_v27  ;;  %2579 = vmatpush.msrb.mxu0 %v901_v28  ;;  %v1045_v28 = vld [vmem:[#allocation17 + $0xb98] sm:$0xff]  ;;  %v1103_v43 = vld [vmem:[#allocation17 + $0xd68] sm:$0xff] }
 0x2fe   :  { %2620 = vmatpush.msra.mxu2 %v963_v29  ;;  %2628 = vmatpush.msra.mxu3 %v1019_v34  ;;  %v2122_v29 = vpop.f32.mrf.mxu1  ;;  %v1107_v34 = vld [vmem:[#allocation17 + $0xd88] sm:$0xff] }
 0x2ff   :  { %2541 = vmatmul.f32.vlgmr.msrb.gmra.mxu2 %v3905_v57  ;;  %2668 = vmatpush.msra.mxu1 %v1083_v56  ;;  %v1013_v57 = vld [vmem:[#allocation17 + $0xa98] sm:$0xff]  ;;  %v1067_v56 = vld [vmem:[#allocation17 + $0xc48] sm:$0xff] }
 0x300   :  { %2685 = vmatpush.msrb.mxu2 %v1121_v36  ;;  %2580 = vmatpush.msrb.mxu0 %v899_v38  ;;  %v1105_v36 = vld [vmem:[#allocation17 + $0xd78] sm:$0xff]  ;;  %v1099_v0 = vld [vmem:[#allocation17 + $0xd48] sm:$0xff] }
 0x301   :  { %2501 = vmatmul.f32.vlgmr.msra.gmra.mxu0 %v3901_v32  ;;  %2561 = vmatmul.f32.vlgmr.msrb.gmra.mxu3 %v3907_v58  ;;  %v1011_v32 = vld [vmem:[#allocation17 + $0xa88] sm:$0xff]  ;;  %v2082_v58 = vpop.f32.mrf.mxu3  ;;  %v1001_v38 = vld [vmem:[#allocation17 + $0xa38] sm:$0xff] }
 0x302   :  { %2629 = vmatpush.msra.mxu3 %v1017_v41  ;;  %2645 = vmatpush.msra.mxu0 %v1057_v42  ;;  %v2083_v18 = vadd.f32 %v2082_v58, %v2063_v12  ;;  %v1065_v41 = vld [vmem:[#allocation17 + $0xc38] sm:$0xff]  ;;  %v2142_v42 = vpop.f32.mrf.mxu2  ;;  %v1059_v58 = vld [vmem:[#allocation17 + $0xc08] sm:$0xff] }
 0x303   :  { %2669 = vmatpush.msra.mxu1 %v1081_v19  ;;  %2686 = vmatpush.msrb.mxu2 %v1119_v44  ;;  %v999_v19 = vld [vmem:[#allocation17 + $0xa28] sm:$0xff]  ;;  %v1153_v12 = vld [vmem:[#allocation17 + $0xef8] sm:$0xff] }
 0x304   :  { %2630 = vmatpush.msra.mxu3 %v1015_v46  ;;  %2646 = vmatpush.msra.mxu0 %v1055_v51  ;;  %v2103_v27 = vadd.f32 %v2102_v59, %v2083_v18  ;;  %v1039_v44 = vld [vmem:[#allocation17 + $0xb68] sm:$0xff] }
 0x305   :  { %2670 = vmatpush.msra.mxu1 %v1079_v55  ;;  %2687 = vmatpush.msrb.mxu2 %v1117_v52  ;;  %v1063_v46 = vld [vmem:[#allocation17 + $0xc28] sm:$0xff]  ;;  %v1101_v55 = vld [vmem:[#allocation17 + $0xd58] sm:$0xff] }
 0x306   :  { %2631 = vmatpush.msra.mxu3 %v1013_v57  ;;  %2647 = vmatpush.msra.mxu0 %v1053_v63  ;;  %v2123_v39 = vadd.f32 %v2122_v29, %v2103_v27  ;;  %v997_v52 = vld [vmem:[#allocation17 + $0xa18] sm:$0xff]  ;;  %v2202_v59 = vpop.f32.mrf.mxu1  ;;  %v1091_v27 = vld [vmem:[#allocation17 + $0xd08] sm:$0xff] }
 0x307   :  { %2671 = vmatpush.msra.mxu1 %v1077_v3  ;;  %2688 = vmatpush.msrb.mxu2 %v1115_v7  ;;  %v1037_v57 = vld [vmem:[#allocation17 + $0xb58] sm:$0xff]  ;;  %v995_v3 = vld [vmem:[#allocation17 + $0xa08] sm:$0xff] }
 0x308   :  { %2621 = vmatmul.f32.vlgmr.msra.gmra.mxu2 %v3916_v14  ;;  %2632 = vmatpush.msra.mxu3 %v1011_v32  ;;  %v1109_v14 = vld [vmem:[#allocation17 + $0xd98] sm:$0xff]  ;;  %v2143_v62 = vadd.f32 %v2142_v42, %v2123_v39  ;;  %v1035_v32 = vld [vmem:[#allocation17 + $0xb48] sm:$0xff] }
 0x309   :  { %2648 = vmatpush.msra.mxu0 %v1051_v9  ;;  %2672 = vmatpush.msra.mxu1 %v1075_v11  ;;  %v2162_v51 = vpop.f32.mrf.mxu3  ;;  %v1061_v63 = vld [vmem:[#allocation17 + $0xc18] sm:$0xff]  ;;  %v2182_v9 = vpop.f32.mrf.mxu0  ;;  %v1211_v29 = vld [vmem:[#allocation17 + $0x10c8] sm:$0xff] }
 0x30a   :  { %2689 = vmatpush.msrb.mxu2 %v1113_v2  ;;  %2581 = vmatmul.f32.vlgmr.msrb.gmra.mxu0 %v3909_v61  ;;  %v1003_v61 = vld [vmem:[#allocation17 + $0xa48] sm:$0xff]  ;;  %v2163_v7 = vadd.f32 %v2162_v51, %v2143_v62  ;;  %v1097_v11 = vld [vmem:[#allocation17 + $0xd38] sm:$0xff] }
 0x30b   :  { %2633 = vmatpush.msra.mxu3 %v1009_v16  ;;  %2649 = vmatpush.msra.mxu0 %v1049_v17  ;;  %v1217_v2 = vld [vmem:[#allocation17 + $0x10f8] sm:$0xff]  ;;  %v1095_v17 = vld [vmem:[#allocation17 + $0xd28] sm:$0xff] }
 0x30c   :  { %2673 = vmatpush.msra.mxu1 %v1073_v21  ;;  %2690 = vmatpush.msrb.mxu2 %v1111_v22  ;;  %v1033_v16 = vld [vmem:[#allocation17 + $0xb38] sm:$0xff]  ;;  %v2183_v18 = vadd.f32 %v2182_v9, %v2163_v7  ;;  %v1151_v21 = vld [vmem:[#allocation17 + $0xee8] sm:$0xff] }
 0x30d   :  { %2601 = vmatmul.f32.vlgmr.msrb.gmra.mxu1 %v3918_v49  ;;  %2634 = vmatpush.msra.mxu3 %v1007_v5  ;;  %v1041_v49 = vld [vmem:[#allocation17 + $0xb78] sm:$0xff]  ;;  %v1215_v22 = vld [vmem:[#allocation17 + $0x10e8] sm:$0xff] }
 0x30e   :  { %2650 = vmatpush.msra.mxu0 %v1047_v23  ;;  %2674 = vmatpush.msra.mxu1 %v1071_v25  ;;  %v1031_v5 = vld [vmem:[#allocation17 + $0xb28] sm:$0xff]  ;;  %v1093_v23 = vld [vmem:[#allocation17 + $0xd18] sm:$0xff] }
 0x30f   :  { %2691 = vmatpush.msrb.mxu2 %v1109_v14  ;;  %2635 = vmatpush.msra.mxu3 %v1005_v26  ;;  %v1149_v25 = vld [vmem:[#allocation17 + $0xed8] sm:$0xff]  ;;  %v1139_v62 = vld [vmem:[#allocation17 + $0xe88] sm:$0xff] }
 0x310   :  { %2651 = vmatpush.msra.mxu0 %v1045_v28  ;;  %2675 = vmatpush.msra.mxu1 %v1069_v31  ;;  %v1213_v14 = vld [vmem:[#allocation17 + $0x10d8] sm:$0xff]  ;;  %v2203_v28 = vadd.f32 %v2202_v59, %v2183_v18  ;;  %v1147_v31 = vld [vmem:[#allocation17 + $0xec8] sm:$0xff] }
 0x311   :  { %2692 = vmatpush.msrb.mxu2 %v1107_v34  ;;  %2636 = vmatpush.msra.mxu3 %v1003_v61  ;;  %v1029_v26 = vld [vmem:[#allocation17 + $0xb18] sm:$0xff]  ;;  %v1027_v61 = vld [vmem:[#allocation17 + $0xb08] sm:$0xff] }
 0x312   :  { %2652 = vmatpush.msra.mxu0 %v1043_v35  ;;  %2676 = vmatpush.msra.mxu1 %v1067_v56  ;;  %v1249_v34 = vld [vmem:[#allocation17 + $0x11f8] sm:$0xff]  ;;  %v2242_v56 = vpop.f32.mrf.mxu3  ;;  %v1135_v9 = vld [vmem:[#allocation17 + $0xe68] sm:$0xff] }
 0x313   :  { %2693 = vmatpush.msrb.mxu2 %v1105_v36  ;;  %2637 = vmatpush.msra.mxu3 %v1001_v38  ;;  %v1145_v35 = vld [vmem:[#allocation17 + $0xeb8] sm:$0xff] }
 0x314   :  { %2653 = vmatpush.msra.mxu0 %v1041_v49  ;;  %2677 = vmatpush.msra.mxu1 %v1065_v41  ;;  %v1209_v36 = vld [vmem:[#allocation17 + $0x10b8] sm:$0xff]  ;;  %v1247_v49 = vld [vmem:[#allocation17 + $0x11e8] sm:$0xff] }
 0x315   :  { %2694 = vmatpush.msrb.mxu2 %v1103_v43  ;;  %2638 = vmatpush.msra.mxu3 %v999_v19  ;;  %v1185_v39 = vld [vmem:[#allocation17 + $0xff8] sm:$0xff]  ;;  %v1143_v41 = vld [vmem:[#allocation17 + $0xea8] sm:$0xff] }
 0x316   :  { %2654 = vmatpush.msra.mxu0 %v1039_v44  ;;  %2678 = vmatpush.msra.mxu1 %v1063_v46  ;;  %v1183_v43 = vld [vmem:[#allocation17 + $0xfe8] sm:$0xff]  ;;  %v2262_v44 = vpop.f32.mrf.mxu0  ;;  %v1141_v46 = vld [vmem:[#allocation17 + $0xe98] sm:$0xff] }
 0x317   :  { %2695 = vmatpush.msrb.mxu2 %v1101_v55  ;;  %2639 = vmatpush.msra.mxu3 %v997_v52  ;;  %v1207_v19 = vld [vmem:[#allocation17 + $0x10a8] sm:$0xff]  ;;  %v1181_v51 = vld [vmem:[#allocation17 + $0xfd8] sm:$0xff] }
 0x318   :  { %2655 = vmatpush.msra.mxu0 %v1037_v57  ;;  %2679 = vmatpush.msra.mxu1 %v1061_v63  ;;  %v1205_v55 = vld [vmem:[#allocation17 + $0x1098] sm:$0xff]  ;;  %v1243_v52 = vld [vmem:[#allocation17 + $0x11c8] sm:$0xff] }
 0x319   :  { %2696 = vmatpush.msrb.mxu2 %v1099_v0  ;;  %2640 = vmatpush.msra.mxu3 %v995_v3  ;;  %v1203_v63 = vld [vmem:[#allocation17 + $0x1088] sm:$0xff]  ;;  %v2282_v0 = vpop.f32.mrf.mxu1  ;;  %v1241_v3 = vld [vmem:[#allocation17 + $0x11b8] sm:$0xff] }
 0x31a   :  { %2656 = vmatpush.msra.mxu0 %v1035_v32  ;;  %2680 = vmatpush.msra.mxu1 %v1059_v58  ;;  %v1137_v7 = vld [vmem:[#allocation17 + $0xe78] sm:$0xff]  ;;  %v1239_v58 = vld [vmem:[#allocation17 + $0x11a8] sm:$0xff]  ;;  %v2322_v59 = vpop.f32.mrf.mxu3 }
 0x31b   :  { %2697 = vmatpush.msrb.mxu2 %v1097_v11  ;;  %2641 = vmatmul.f32.vlgmr.msra.gmra.mxu3 %v3920_v50  ;;  %v2222_v50 = vpop.f32.mrf.mxu2  ;;  %v1201_v32 = vld [vmem:[#allocation17 + $0x1078] sm:$0xff] }
 0x31c   :  { %2705 = vmatpush.msrb.mxu3 %v1153_v12  ;;  %2745 = vmatpush.msrb.mxu1 %v1217_v2  ;;  %v2223_v38 = vadd.f32 %v2222_v50, %v2203_v28  ;;  %v1175_v12 = vld [vmem:[#allocation17 + $0xfa8] sm:$0xff]  ;;  %v1133_v18 = vld [vmem:[#allocation17 + $0xe58] sm:$0xff] }
 0x31d   :  { %2657 = vmatpush.msra.mxu0 %v1033_v16  ;;  %2698 = vmatpush.msrb.mxu2 %v1095_v17  ;;  %v1199_v2 = vld [vmem:[#allocation17 + $0x1068] sm:$0xff]  ;;  %v1237_v17 = vld [vmem:[#allocation17 + $0x1198] sm:$0xff] }
 0x31e   :  { %2706 = vmatpush.msrb.mxu3 %v1151_v21  ;;  %2746 = vmatpush.msrb.mxu1 %v1215_v22  ;;  %v2243_v42 = vadd.f32 %v2242_v56, %v2223_v38  ;;  %v1173_v21 = vld [vmem:[#allocation17 + $0xf98] sm:$0xff]  ;;  %v1167_v56 = vld [vmem:[#allocation17 + $0xf68] sm:$0xff] }
 0x31f   :  { %2658 = vmatpush.msra.mxu0 %v1031_v5  ;;  %2699 = vmatpush.msrb.mxu2 %v1093_v23  ;;  %v1197_v22 = vld [vmem:[#allocation17 + $0x1058] sm:$0xff]  ;;  %v1235_v5 = vld [vmem:[#allocation17 + $0x1188] sm:$0xff] }
 0x320   :  { %2707 = vmatpush.msrb.mxu3 %v1149_v25  ;;  %2747 = vmatpush.msrb.mxu1 %v1213_v14  ;;  %v2263_v57 = vadd.f32 %v2262_v44, %v2243_v42  ;;  %v1131_v23 = vld [vmem:[#allocation17 + $0xe48] sm:$0xff]  ;;  %v1129_v28 = vld [vmem:[#allocation17 + $0xe38] sm:$0xff] }
 0x321   :  { %2659 = vmatpush.msra.mxu0 %v1029_v26  ;;  %2700 = vmatpush.msrb.mxu2 %v1091_v27  ;;  %v1171_v14 = vld [vmem:[#allocation17 + $0xf88] sm:$0xff]  ;;  %v1233_v27 = vld [vmem:[#allocation17 + $0x1178] sm:$0xff] }
 0x322   :  { %2701 = vmatmul.f32.vlgmr.msrb.gmra.mxu2 %v3928_v48  ;;  %2708 = vmatpush.msrb.mxu3 %v1147_v31  ;;  %v1245_v48 = vld [vmem:[#allocation17 + $0x11d8] sm:$0xff]  ;;  %v2283_v11 = vadd.f32 %v2282_v0, %v2263_v57  ;;  %v1195_v26 = vld [vmem:[#allocation17 + $0x1048] sm:$0xff] }
 0x323   :  { %2748 = vmatpush.msrb.mxu1 %v1211_v29  ;;  %2765 = vmatpush.msra.mxu2 %v1249_v34  ;;  %v2302_v16 = vpop.f32.mrf.mxu2  ;;  %v1169_v50 = vld [vmem:[#allocation17 + $0xf78] sm:$0xff]  ;;  %v2342_v34 = vpop.f32.mrf.mxu0  ;;  %v1123_v44 = vld [vmem:[#allocation17 + $0xe08] sm:$0xff] }
 0x324   :  { %2660 = vmatpush.msra.mxu0 %v1027_v61  ;;  %2709 = vmatpush.msrb.mxu3 %v1145_v35  ;;  %v2303_v25 = vadd.f32 %v2302_v16, %v2283_v11  ;;  %v1193_v29 = vld [vmem:[#allocation17 + $0x1038] sm:$0xff]  ;;  %v1231_v61 = vld [vmem:[#allocation17 + $0x1168] sm:$0xff] }
 0x325   :  { %2661 = vmatmul.f32.vlgmr.msra.gmra.mxu0 %v3922_v54  ;;  %2749 = vmatpush.msrb.mxu1 %v1209_v36  ;;  %v1179_v54 = vld [vmem:[#allocation17 + $0xfc8] sm:$0xff]  ;;  %v1229_v38 = vld [vmem:[#allocation17 + $0x1158] sm:$0xff] }
 0x326   :  { %2725 = vmatpush.msrb.mxu0 %v1185_v39  ;;  %2766 = vmatpush.msra.mxu2 %v1247_v49  ;;  %v2323_v31 = vadd.f32 %v2322_v59, %v2303_v25  ;;  %v1127_v35 = vld [vmem:[#allocation17 + $0xe28] sm:$0xff]  ;;  %v1125_v39 = vld [vmem:[#allocation17 + $0xe18] sm:$0xff] }
 0x327   :  { %2681 = vmatmul.f32.vlgmr.msra.gmra.mxu1 %v3931_v1  ;;  %2710 = vmatpush.msrb.mxu3 %v1143_v41  ;;  %v1177_v1 = vld [vmem:[#allocation17 + $0xfb8] sm:$0xff]  ;;  %v1191_v36 = vld [vmem:[#allocation17 + $0x1028] sm:$0xff] }
 0x328   :  { %2726 = vmatpush.msrb.mxu0 %v1183_v43  ;;  %2750 = vmatpush.msrb.mxu1 %v1207_v19  ;;  %v2343_v49 = vadd.f32 %v2342_v34, %v2323_v31  ;;  %v1165_v41 = vld [vmem:[#allocation17 + $0xf58] sm:$0xff]  ;;  %v2362_v43 = vpop.f32.mrf.mxu1  ;;  %v1227_v19 = vld [vmem:[#allocation17 + $0x1148] sm:$0xff] }
 0x329   :  { %2767 = vmatpush.msra.mxu2 %v1245_v48  ;;  %2711 = vmatpush.msrb.mxu3 %v1141_v46  ;;  %v1189_v42 = vld [vmem:[#allocation17 + $0x1018] sm:$0xff]  ;;  %v1163_v48 = vld [vmem:[#allocation17 + $0xf48] sm:$0xff] }
 0x32a   :  { %2727 = vmatpush.msrb.mxu0 %v1181_v51  ;;  %2751 = vmatpush.msrb.mxu1 %v1205_v55  ;;  %v1187_v46 = vld [vmem:[#allocation17 + $0x1008] sm:$0xff]  ;;  %v1225_v51 = vld [vmem:[#allocation17 + $0x1138] sm:$0xff]  ;;  %v2363_v55 = vadd.f32 %v2362_v43, %v2343_v49 }
 0x32b   :  { %2768 = vmatpush.msra.mxu2 %v1243_v52  ;;  %2712 = vmatpush.msrb.mxu3 %v1139_v62  ;;  %v1281_v52 = vld [vmem:[#allocation17 + $0x12f8] sm:$0xff]  ;;  %v2382_v57 = vpop.f32.mrf.mxu2  ;;  %v1279_v0 = vld [vmem:[#allocation17 + $0x12e8] sm:$0xff] }
 0x32c   :  { %2728 = vmatpush.msrb.mxu0 %v1179_v54  ;;  %2752 = vmatpush.msrb.mxu1 %v1203_v63  ;;  %v1345_v62 = vld [vmem:[#allocation17 + $0x14f8] sm:$0xff]  ;;  %v1223_v63 = vld [vmem:[#allocation17 + $0x1128] sm:$0xff] }
 0x32d   :  { %2769 = vmatpush.msra.mxu2 %v1241_v3  ;;  %2713 = vmatpush.msrb.mxu3 %v1137_v7  ;;  %v1161_v54 = vld [vmem:[#allocation17 + $0xf38] sm:$0xff]  ;;  %v1343_v3 = vld [vmem:[#allocation17 + $0x14e8] sm:$0xff] }
 0x32e   :  { %2729 = vmatpush.msrb.mxu0 %v1177_v1  ;;  %2753 = vmatpush.msrb.mxu1 %v1201_v32  ;;  %v1159_v7 = vld [vmem:[#allocation17 + $0xf28] sm:$0xff]  ;;  %v1221_v1 = vld [vmem:[#allocation17 + $0x1118] sm:$0xff] }
 0x32f   :  { %2770 = vmatpush.msra.mxu2 %v1239_v58  ;;  %2714 = vmatpush.msrb.mxu3 %v1135_v9  ;;  %v2383_v58 = vadd.f32 %v2382_v57, %v2363_v55  ;;  %v1277_v9 = vld [vmem:[#allocation17 + $0x12d8] sm:$0xff]  ;;  %v1275_v16 = vld [vmem:[#allocation17 + $0x12c8] sm:$0xff] }
 0x330   :  { %2730 = vmatpush.msrb.mxu0 %v1175_v12  ;;  %2754 = vmatpush.msrb.mxu1 %v1199_v2  ;;  %v1341_v11 = vld [vmem:[#allocation17 + $0x14d8] sm:$0xff]  ;;  %v1219_v2 = vld [vmem:[#allocation17 + $0x1108] sm:$0xff] }
 0x331   :  { %2771 = vmatpush.msra.mxu2 %v1237_v17  ;;  %2715 = vmatpush.msrb.mxu3 %v1133_v18  ;;  %v1157_v12 = vld [vmem:[#allocation17 + $0xf18] sm:$0xff]  ;;  %v1339_v17 = vld [vmem:[#allocation17 + $0x14c8] sm:$0xff] }
 0x332   :  { %2731 = vmatpush.msrb.mxu0 %v1173_v21  ;;  %2755 = vmatpush.msrb.mxu1 %v1197_v22  ;;  %v1377_v18 = vld [vmem:[#allocation17 + $0x15f8] sm:$0xff]  ;;  %v1155_v22 = vld [vmem:[#allocation17 + $0xf08] sm:$0xff] }
 0x333   :  { %2772 = vmatpush.msra.mxu2 %v1235_v5  ;;  %2716 = vmatpush.msrb.mxu3 %v1131_v23  ;;  %v1273_v59 = vld [vmem:[#allocation17 + $0x12b8] sm:$0xff]  ;;  %v1375_v25 = vld [vmem:[#allocation17 + $0x15e8] sm:$0xff] }
 0x334   :  { %2732 = vmatpush.msrb.mxu0 %v1171_v14  ;;  %2756 = vmatpush.msrb.mxu1 %v1195_v26  ;;  %v1337_v5 = vld [vmem:[#allocation17 + $0x14b8] sm:$0xff]  ;;  %v1271_v26 = vld [vmem:[#allocation17 + $0x12a8] sm:$0xff] }
 0x335   :  { %2773 = vmatpush.msra.mxu2 %v1233_v27  ;;  %2717 = vmatpush.msrb.mxu3 %v1129_v28  ;;  %v1313_v23 = vld [vmem:[#allocation17 + $0x13f8] sm:$0xff]  ;;  %v1311_v27 = vld [vmem:[#allocation17 + $0x13e8] sm:$0xff] }
 0x336   :  { %2733 = vmatpush.msrb.mxu0 %v1169_v50  ;;  %2757 = vmatpush.msrb.mxu1 %v1193_v29  ;;  %v1335_v28 = vld [vmem:[#allocation17 + $0x14a8] sm:$0xff]  ;;  %v1373_v31 = vld [vmem:[#allocation17 + $0x15d8] sm:$0xff] }
 0x337   :  { %2774 = vmatpush.msra.mxu2 %v1231_v61  ;;  %2718 = vmatpush.msrb.mxu3 %v1127_v35  ;;  %v1309_v29 = vld [vmem:[#allocation17 + $0x13d8] sm:$0xff]  ;;  %v1371_v61 = vld [vmem:[#allocation17 + $0x15c8] sm:$0xff] }
 0x338   :  { %2734 = vmatpush.msrb.mxu0 %v1167_v56  ;;  %2758 = vmatpush.msrb.mxu1 %v1191_v36  ;;  %v2402_v32 = vpop.f32.mrf.mxu3  ;;  %v1333_v34 = vld [vmem:[#allocation17 + $0x1498] sm:$0xff]  ;;  %v1267_v35 = vld [vmem:[#allocation17 + $0x1288] sm:$0xff] }
 0x339   :  { %2775 = vmatpush.msra.mxu2 %v1229_v38  ;;  %2719 = vmatpush.msrb.mxu3 %v1125_v39  ;;  %v1331_v56 = vld [vmem:[#allocation17 + $0x1488] sm:$0xff]  ;;  %v1369_v36 = vld [vmem:[#allocation17 + $0x15b8] sm:$0xff] }
 0x33a   :  { %2735 = vmatpush.msrb.mxu0 %v1165_v41  ;;  %2759 = vmatpush.msrb.mxu1 %v1189_v42  ;;  %v1265_v38 = vld [vmem:[#allocation17 + $0x1278] sm:$0xff]  ;;  %v1367_v41 = vld [vmem:[#allocation17 + $0x15a8] sm:$0xff] }
 0x33b   :  { %2776 = vmatpush.msra.mxu2 %v1227_v19  ;;  %2720 = vmatpush.msrb.mxu3 %v1123_v44  ;;  %v2422_v21 = vpop.f32.mrf.mxu0  ;;  %v1329_v49 = vld [vmem:[#allocation17 + $0x1478] sm:$0xff]  ;;  %v1263_v42 = vld [vmem:[#allocation17 + $0x1268] sm:$0xff] }
 0x33c   :  { %2736 = vmatpush.msrb.mxu0 %v1163_v48  ;;  %2760 = vmatpush.msrb.mxu1 %v1187_v46  ;;  %v1303_v43 = vld [vmem:[#allocation17 + $0x13a8] sm:$0xff]  ;;  %v1365_v44 = vld [vmem:[#allocation17 + $0x1598] sm:$0xff] }
 0x33d   :  { %2777 = vmatpush.msra.mxu2 %v1225_v51  ;;  %2721 = vmatmul.f32.vlgmr.msrb.gmra.mxu3 %v3934_v6  ;;  %v2403_v6 = vadd.f32 %v2402_v32, %v2383_v58  ;;  %v1327_v19 = vld [vmem:[#allocation17 + $0x1468] sm:$0xff]  ;;  %v1261_v48 = vld [vmem:[#allocation17 + $0x1258] sm:$0xff] }
 0x33e   :  { %2785 = vmatpush.msra.mxu3 %v1281_v52  ;;  %2825 = vmatpush.msra.mxu1 %v1345_v62  ;;  %v1301_v51 = vld [vmem:[#allocation17 + $0x1398] sm:$0xff]  ;;  %v1363_v52 = vld [vmem:[#allocation17 + $0x1588] sm:$0xff] }
 0x33f   :  { %2737 = vmatpush.msrb.mxu0 %v1161_v54  ;;  %2778 = vmatpush.msra.mxu2 %v1223_v63  ;;  %v3991_v14 = vadd.f32 %v2422_v21, %v2403_v6  ;;  %v1325_v55 = vld [vmem:[#allocation17 + $0x1458] sm:$0xff]  ;;  %v1259_v62 = vld [vmem:[#allocation17 + $0x1248] sm:$0xff] }
 0x340   :  { %2786 = vmatpush.msra.mxu3 %v1279_v0  ;;  %2826 = vmatpush.msra.mxu1 %v1343_v3  ;;  %v1299_v57 = vld [vmem:[#allocation17 + $0x1388] sm:$0xff]  ;;  %v1361_v63 = vld [vmem:[#allocation17 + $0x1578] sm:$0xff] }
 0x341   :  { %2738 = vmatpush.msrb.mxu0 %v1159_v7  ;;  %2779 = vmatpush.msra.mxu2 %v1221_v1  ;;  %v3995_v50 = vmul.f32 0.70710677, %v3991_v14  ;;  %v1323_v54 = vld [vmem:[#allocation17 + $0x1448] sm:$0xff]  ;;  %v1257_v0 = vld [vmem:[#allocation17 + $0x1238] sm:$0xff] }
 0x342   :  { %2787 = vmatpush.msra.mxu3 %v1277_v9  ;;  %2827 = vmatpush.msra.mxu1 %v1341_v11  ;;  %v1297_v7 = vld [vmem:[#allocation17 + $0x1378] sm:$0xff]  ;;  %v1359_v32 = vld [vmem:[#allocation17 + $0x1568] sm:$0xff] }
 0x343   :  { %2739 = vmatpush.msrb.mxu0 %v1157_v12  ;;  %2780 = vmatpush.msra.mxu2 %v1219_v2  ;;  %v3999_v39 = vand.u32 2147483647, %v3995_v50  ;;  %v1321_v1 = vld [vmem:[#allocation17 + $0x1438] sm:$0xff]  ;;  %v1255_v58 = vld [vmem:[#allocation17 + $0x1228] sm:$0xff]  ;;  %vm3069_vm6 = vcmp.ge.f32.partialorder %v3995_v50, 0.0 }
 0x344   :  { %2781 = vmatmul.f32.vlgmr.msra.gmra.mxu2 %v3944_v30  ;;  %2788 = vmatpush.msra.mxu3 %v1275_v16  ;;  %v1269_v30 = vld [vmem:[#allocation17 + $0x1298] sm:$0xff]  ;;  %v1295_v9 = vld [vmem:[#allocation17 + $0x1368] sm:$0xff] }
 0x345   :  { %2828 = vmatpush.msra.mxu1 %v1339_v17  ;;  %2845 = vmatpush.msrb.mxu2 %v1377_v18  ;;  %v3075_v46 = vmul.f32 0.3275911, %v3999_v39  ;;  %v1319_v11 = vld [vmem:[#allocation17 + $0x1428] sm:$0xff]  ;;  %v1357_v12 = vld [vmem:[#allocation17 + $0x1558] sm:$0xff] }
 0x346   :  { %2740 = vmatpush.msrb.mxu0 %v1155_v22  ;;  %2789 = vmatpush.msra.mxu3 %v1273_v59  ;;  %v1253_v2 = vld [vmem:[#allocation17 + $0x1218] sm:$0xff]  ;;  %v1355_v17 = vld [vmem:[#allocation17 + $0x1548] sm:$0xff] }
 0x347   :  { %2741 = vmatmul.f32.vlgmr.msrb.gmra.mxu0 %v3936_v10  ;;  %2829 = vmatpush.msra.mxu1 %v1337_v5  ;;  %v1307_v10 = vld [vmem:[#allocation17 + $0x13c8] sm:$0xff]  ;;  %v4002_v3 = vadd.f32 1.0, %v3075_v46  ;;  %v1293_v16 = vld [vmem:[#allocation17 + $0x1358] sm:$0xff] }
 0x348   :  { %2805 = vmatpush.msra.mxu0 %v1313_v23  ;;  %2846 = vmatpush.msrb.mxu2 %v1375_v25  ;;  %v1317_v6 = vld [vmem:[#allocation17 + $0x1418] sm:$0xff]  ;;  %v1251_v18 = vld [vmem:[#allocation17 + $0x1208] sm:$0xff] }
 0x349   :  { %2761 = vmatmul.f32.vlgmr.msrb.gmra.mxu1 %v3949_v45  ;;  %2790 = vmatpush.msra.mxu3 %v1271_v26  ;;  %v1305_v45 = vld [vmem:[#allocation17 + $0x13b8] sm:$0xff]  ;;  %3243 = vrcp.f32 %v4002_v3  ;;  %v1291_v21 = vld [vmem:[#allocation17 + $0x1348] sm:$0xff]  ;;  %vm3084_vm3 = vweird.f32 %v4002_v3 }
 0x34a   :  { %2806 = vmatpush.msra.mxu0 %v1311_v27  ;;  %2830 = vmatpush.msra.mxu1 %v1335_v28  ;;  %v1315_v22 = vld [vmem:[#allocation17 + $0x1408] sm:$0xff]  ;;  %v1353_v59 = vld [vmem:[#allocation17 + $0x1538] sm:$0xff] }
 0x34b   :  { %2847 = vmatpush.msrb.mxu2 %v1373_v31  ;;  %2791 = vmatpush.msra.mxu3 %v1269_v30  ;;  %v1409_v5 = vld [vmem:[#allocation17 + $0x16f8] sm:$0xff]  ;;  %v1351_v26 = vld [vmem:[#allocation17 + $0x1528] sm:$0xff] }
 0x34c   :  { %2807 = vmatpush.msra.mxu0 %v1309_v29  ;;  %2831 = vmatpush.msra.mxu1 %v1333_v34  ;;  %v1473_v23 = vld [vmem:[#allocation17 + $0x18f8] sm:$0xff]  ;;  %v1407_v28 = vld [vmem:[#allocation17 + $0x16e8] sm:$0xff] }
 0x34d   :  { %2848 = vmatpush.msrb.mxu2 %v1371_v61  ;;  %2792 = vmatpush.msra.mxu3 %v1267_v35  ;;  %v1289_v25 = vld [vmem:[#allocation17 + $0x1338] sm:$0xff]  ;;  %v1471_v31 = vld [vmem:[#allocation17 + $0x18e8] sm:$0xff] }
 0x34e   :  { %2808 = vmatpush.msra.mxu0 %v1307_v10  ;;  %2832 = vmatpush.msra.mxu1 %v1331_v56  ;;  %v1287_v30 = vld [vmem:[#allocation17 + $0x1328] sm:$0xff]  ;;  %v1349_v29 = vld [vmem:[#allocation17 + $0x1518] sm:$0xff] }
 0x34f   :  { %2849 = vmatpush.msrb.mxu2 %v1369_v36  ;;  %2793 = vmatpush.msra.mxu3 %v1265_v38  ;;  %v4005_v27 = vpop.eup %3243  ;;  %v1405_v34 = vld [vmem:[#allocation17 + $0x16d8] sm:$0xff]  ;;  %v1347_v56 = vld [vmem:[#allocation17 + $0x1508] sm:$0xff] }
 0x350   :  { %2809 = vmatpush.msra.mxu0 %v1305_v45  ;;  %2833 = vmatpush.msra.mxu1 %v1329_v49  ;;  %v1469_v61 = vld [vmem:[#allocation17 + $0x18d8] sm:$0xff]  ;;  %v3080_v35 = vmul.f32 %v4005_v27, %v4002_v3  ;;  %v1467_v36 = vld [vmem:[#allocation17 + $0x18c8] sm:$0xff]  ;;  %vm3085_vm2 = vweird.f32 %v4005_v27 }
 0x351   :  { %2850 = vmatpush.msrb.mxu2 %v1367_v41  ;;  %2794 = vmatpush.msra.mxu3 %v1263_v42  ;;  %v1285_v10 = vld [vmem:[#allocation17 + $0x1318] sm:$0xff]  ;;  %v1283_v45 = vld [vmem:[#allocation17 + $0x1308] sm:$0xff]  ;;  %vm4021_vm4 = vmor %vm3084_vm3, %vm3085_vm2 }
 0x352   :  { %2810 = vmatpush.msra.mxu0 %v1303_v43  ;;  %2834 = vmatpush.msra.mxu1 %v1327_v19  ;;  %v1505_v38 = vld [vmem:[#allocation17 + $0x19f8] sm:$0xff]  ;;  %v3081_v41 = vsub.f32 1.0, %v3080_v35  ;;  %v1503_v19 = vld [vmem:[#allocation17 + $0x19e8] sm:$0xff] }
 0x353   :  { %2851 = vmatpush.msrb.mxu2 %v1365_v44  ;;  %2795 = vmatpush.msra.mxu3 %v1261_v48  ;;  %v1401_v49 = vld [vmem:[#allocation17 + $0x16b8] sm:$0xff]  ;;  %v1399_v44 = vld [vmem:[#allocation17 + $0x16a8] sm:$0xff] }
 0x354   :  { %2811 = vmatpush.msra.mxu0 %v1301_v51  ;;  %2835 = vmatpush.msra.mxu1 %v1325_v55  ;;  %v1465_v42 = vld [vmem:[#allocation17 + $0x18b8] sm:$0xff]  ;;  %v1439_v48 = vld [vmem:[#allocation17 + $0x17e8] sm:$0xff]  ;;  %v3082_v51 = vmul.f32 %v4005_v27, %v3081_v41 }
 0x355   :  { %2852 = vmatpush.msrb.mxu2 %v1363_v52  ;;  %2796 = vmatpush.msra.mxu3 %v1259_v62  ;;  %v1441_v43 = vld [vmem:[#allocation17 + $0x17f8] sm:$0xff]  ;;  %v1463_v46 = vld [vmem:[#allocation17 + $0x18a8] sm:$0xff] }
 0x356   :  { %2812 = vmatpush.msra.mxu0 %v1299_v57  ;;  %2836 = vmatpush.msra.mxu1 %v1323_v54  ;;  %v1501_v55 = vld [vmem:[#allocation17 + $0x19d8] sm:$0xff]  ;;  %v1499_v57 = vld [vmem:[#allocation17 + $0x19c8] sm:$0xff] }
 0x357   :  { %2853 = vmatpush.msrb.mxu2 %v1361_v63  ;;  %2797 = vmatpush.msra.mxu3 %v1257_v0  ;;  %v1437_v52 = vld [vmem:[#allocation17 + $0x17d8] sm:$0xff]  ;;  %v1395_v54 = vld [vmem:[#allocation17 + $0x1688] sm:$0xff]  ;;  %v3083_v0 = vadd.f32 %v4005_v27, %v3082_v51 }
 0x358   :  { %2813 = vmatpush.msra.mxu0 %v1297_v7  ;;  %2837 = vmatpush.msra.mxu1 %v1321_v1  ;;  %v1461_v62 = vld [vmem:[#allocation17 + $0x1898] sm:$0xff]  ;;  %v1459_v63 = vld [vmem:[#allocation17 + $0x1888] sm:$0xff] }
 0x359   :  { %2854 = vmatpush.msrb.mxu2 %v1359_v32  ;;  %2798 = vmatpush.msra.mxu3 %v1255_v58  ;;  %v1497_v7 = vld [vmem:[#allocation17 + $0x19b8] sm:$0xff]  ;;  %v1383_v35 = vld [vmem:[#allocation17 + $0x1628] sm:$0xff] }
 0x35a   :  { %2814 = vmatpush.msra.mxu0 %v1295_v9  ;;  %2838 = vmatpush.msra.mxu1 %v1319_v11  ;;  %v1393_v1 = vld [vmem:[#allocation17 + $0x1678] sm:$0xff]  ;;  %v3088_v9 = vand.u32 2147483647, %v4002_v3  ;;  %v1495_v11 = vld [vmem:[#allocation17 + $0x19a8] sm:$0xff] }
 0x35b   :  { %2855 = vmatpush.msrb.mxu2 %v1357_v12  ;;  %2799 = vmatpush.msra.mxu3 %v1253_v2  ;;  %v1433_v32 = vld [vmem:[#allocation17 + $0x17b8] sm:$0xff]  ;;  %v1391_v12 = vld [vmem:[#allocation17 + $0x1668] sm:$0xff] }
 0x35c   :  { %2815 = vmatpush.msra.mxu0 %v1293_v16  ;;  %2839 = vmatpush.msra.mxu1 %v1317_v6  ;;  %v1457_v58 = vld [vmem:[#allocation17 + $0x1878] sm:$0xff]  ;;  %v1431_v16 = vld [vmem:[#allocation17 + $0x17a8] sm:$0xff]  ;;  %vm3089_vm5 = vcmp.eq.f32.partialorder %v3088_v9, 8.507059e+37 }
 0x35d   :  { %2856 = vmatpush.msrb.mxu2 %v1355_v17  ;;  %2800 = vmatpush.msra.mxu3 %v1251_v18  ;;  %v1455_v6 = vld [vmem:[#allocation17 + $0x1868] sm:$0xff]  ;;  %v3087_v17 = vsel %vm4021_vm4, %v4005_v27, %v3083_v0  ;;  %v1389_v18 = vld [vmem:[#allocation17 + $0x1658] sm:$0xff] }
 0x35e   :  { %2816 = vmatpush.msra.mxu0 %v1291_v21  ;;  %2840 = vmatpush.msra.mxu1 %v1315_v22  ;;  %v1429_v22 = vld [vmem:[#allocation17 + $0x1798] sm:$0xff]  ;;  %v1451_v27 = vld [vmem:[#allocation17 + $0x1848] sm:$0xff] }
 0x35f   :  { %2857 = vmatpush.msrb.mxu2 %v1353_v59  ;;  %2801 = vmatmul.f32.vlgmr.msra.gmra.mxu3 %v3957_v4  ;;  %v1403_v4 = vld [vmem:[#allocation17 + $0x16c8] sm:$0xff]  ;;  %v1453_v59 = vld [vmem:[#allocation17 + $0x1858] sm:$0xff] }
 0x360   :  { %2865 = vmatpush.msrb.mxu3 %v1409_v5  ;;  %2905 = vmatpush.msrb.mxu1 %v1473_v23  ;;  %v1491_v5 = vld [vmem:[#allocation17 + $0x1988] sm:$0xff]  ;;  %v1529_v9 = vld [vmem:[#allocation17 + $0x1ab8] sm:$0xff] }
 0x361   :  { %2817 = vmatpush.msra.mxu0 %v1289_v25  ;;  %2858 = vmatpush.msrb.mxu2 %v1351_v26  ;;  %v1387_v23 = vld [vmem:[#allocation17 + $0x1648] sm:$0xff]  ;;  %v1593_v2 = vld [vmem:[#allocation17 + $0x1cb8] sm:$0xff] }
 0x362   :  { %2866 = vmatpush.msrb.mxu3 %v1407_v28  ;;  %2906 = vmatpush.msrb.mxu1 %v1471_v31  ;;  %v1427_v26 = vld [vmem:[#allocation17 + $0x1788] sm:$0xff]  ;;  %v1489_v28 = vld [vmem:[#allocation17 + $0x1978] sm:$0xff] }
 0x363   :  { %2818 = vmatpush.msra.mxu0 %v1287_v30  ;;  %2859 = vmatpush.msrb.mxu2 %v1349_v29  ;;  %v1385_v31 = vld [vmem:[#allocation17 + $0x1638] sm:$0xff]  ;;  %v1483_v41 = vld [vmem:[#allocation17 + $0x1948] sm:$0xff] }
 0x364   :  { %2867 = vmatpush.msrb.mxu3 %v1405_v34  ;;  %2907 = vmatpush.msrb.mxu1 %v1469_v61  ;;  %v1425_v30 = vld [vmem:[#allocation17 + $0x1778] sm:$0xff]  ;;  %v1487_v61 = vld [vmem:[#allocation17 + $0x1968] sm:$0xff] }
 0x365   :  { %2819 = vmatpush.msra.mxu0 %v1285_v10  ;;  %2860 = vmatpush.msrb.mxu2 %v1347_v56  ;;  %v1449_v29 = vld [vmem:[#allocation17 + $0x1838] sm:$0xff]  ;;  %v1423_v10 = vld [vmem:[#allocation17 + $0x1768] sm:$0xff] }
 0x366   :  { %2861 = vmatmul.f32.vlgmr.msrb.gmra.mxu2 %v3962_v24  ;;  %2868 = vmatpush.msrb.mxu3 %v1403_v4  ;;  %v1397_v24 = vld [vmem:[#allocation17 + $0x1698] sm:$0xff]  ;;  %v1447_v56 = vld [vmem:[#allocation17 + $0x1828] sm:$0xff] }
 0x367   :  { %2908 = vmatpush.msrb.mxu1 %v1467_v36  ;;  %2925 = vmatpush.msra.mxu2 %v1505_v38  ;;  %v1485_v4 = vld [vmem:[#allocation17 + $0x1958] sm:$0xff]  ;;  %v1543_v50 = vld [vmem:[#allocation17 + $0x1b28] sm:$0xff] }
 0x368   :  { %2820 = vmatpush.msra.mxu0 %v1283_v45  ;;  %2869 = vmatpush.msrb.mxu3 %v1401_v49  ;;  %v1381_v36 = vld [vmem:[#allocation17 + $0x1618] sm:$0xff] }
 0x369   :  { %2821 = vmatmul.f32.vlgmr.msra.gmra.mxu0 %v3960_v15  ;;  %2909 = vmatpush.msrb.mxu1 %v1465_v42  ;;  %v1435_v15 = vld [vmem:[#allocation17 + $0x17c8] sm:$0xff]  ;;  %v1421_v38 = vld [vmem:[#allocation17 + $0x1758] sm:$0xff] }
 0x36a   :  { %2885 = vmatpush.msrb.mxu0 %v1441_v43  ;;  %2926 = vmatpush.msra.mxu2 %v1503_v19  ;;  %v1445_v45 = vld [vmem:[#allocation17 + $0x1818] sm:$0xff]  ;;  %v1379_v42 = vld [vmem:[#allocation17 + $0x1608] sm:$0xff] }
 0x36b   :  { %2841 = vmatmul.f32.vlgmr.msra.gmra.mxu1 %v3965_v37  ;;  %2870 = vmatpush.msrb.mxu3 %v1399_v44  ;;  %v3090_v37 = vand.u32 2147483648, %v4002_v3  ;;  %v1493_v3 = vld [vmem:[#allocation17 + $0x1998] sm:$0xff]  ;;  %v1419_v43 = vld [vmem:[#allocation17 + $0x1748] sm:$0xff] }
 0x36c   :  { %2886 = vmatpush.msrb.mxu0 %v1439_v48  ;;  %2910 = vmatpush.msrb.mxu1 %v1463_v46  ;;  %v1443_v19 = vld [vmem:[#allocation17 + $0x1808] sm:$0xff]  ;;  %v1481_v44 = vld [vmem:[#allocation17 + $0x1938] sm:$0xff] }
 0x36d   :  { %2927 = vmatpush.msra.mxu2 %v1501_v55  ;;  %2871 = vmatpush.msrb.mxu3 %v1397_v24  ;;  %v3091_v21 = vor.u32 1.1754944e-38, %v3090_v37  ;;  %v1537_v48 = vld [vmem:[#allocation17 + $0x1af8] sm:$0xff]  ;;  %v1479_v24 = vld [vmem:[#allocation17 + $0x1928] sm:$0xff] }
 0x36e   :  { %2887 = vmatpush.msrb.mxu0 %v1437_v52  ;;  %2911 = vmatpush.msrb.mxu1 %v1461_v62  ;;  %v1601_v46 = vld [vmem:[#allocation17 + $0x1cf8] sm:$0xff]  ;;  %v1535_v52 = vld [vmem:[#allocation17 + $0x1ae8] sm:$0xff] }
 0x36f   :  { %2928 = vmatpush.msra.mxu2 %v1499_v57  ;;  %2872 = vmatpush.msrb.mxu3 %v1395_v54  ;;  %v4028_v25 = vsel %vm3089_vm5, %v3091_v21, %v3087_v17  ;;  %v1417_v55 = vld [vmem:[#allocation17 + $0x1738] sm:$0xff]  ;;  %v1599_v62 = vld [vmem:[#allocation17 + $0x1ce8] sm:$0xff] }
 0x370   :  { %2888 = vmatpush.msrb.mxu0 %v1435_v15  ;;  %2912 = vmatpush.msrb.mxu1 %v1459_v63  ;;  %v3109_v34 = vmul.f32 1.0614054, %v4028_v25  ;;  %v1415_v57 = vld [vmem:[#allocation17 + $0x1728] sm:$0xff]  ;;  %v1477_v54 = vld [vmem:[#allocation17 + $0x1918] sm:$0xff] }
 0x371   :  { %2929 = vmatpush.msra.mxu2 %v1497_v7  ;;  %2873 = vmatpush.msrb.mxu3 %v1393_v1  ;;  %v1533_v15 = vld [vmem:[#allocation17 + $0x1ad8] sm:$0xff]  ;;  %v1475_v1 = vld [vmem:[#allocation17 + $0x1908] sm:$0xff] }
 0x372   :  { %2889 = vmatpush.msrb.mxu0 %v1433_v32  ;;  %2913 = vmatpush.msrb.mxu1 %v1457_v58  ;;  %v3111_v49 = vadd.f32 -1.4531521, %v3109_v34  ;;  %v1597_v63 = vld [vmem:[#allocation17 + $0x1cd8] sm:$0xff]  ;;  %v1531_v37 = vld [vmem:[#allocation17 + $0x1ac8] sm:$0xff] }
 0x373   :  { %2930 = vmatpush.msra.mxu2 %v1495_v11  ;;  %2874 = vmatpush.msrb.mxu3 %v1391_v12  ;;  %v1413_v7 = vld [vmem:[#allocation17 + $0x1718] sm:$0xff]  ;;  %v1411_v58 = vld [vmem:[#allocation17 + $0x1708] sm:$0xff]  ;;  %v3251_v12 = vld.sshfl [vmem:[#allocation1 + $0x8] sm:$0xff pattern:$0x73625140] }
 0x374   :  { %2890 = vmatpush.msrb.mxu0 %v1431_v16  ;;  %2914 = vmatpush.msrb.mxu1 %v1455_v6  ;;  %v3113_v51 = vmul.f32 %v3111_v49, %v4028_v25  ;;  %v1633_v32 = vld [vmem:[#allocation17 + $0x1df8] sm:$0xff]  ;;  %v3127_v16 = vsub.f32 0.0, %v3999_v39  ;;  %v1631_v17 = vld [vmem:[#allocation17 + $0x1de8] sm:$0xff] }
 0x375   :  { %2931 = vmatpush.msra.mxu2 %v1493_v3  ;;  %2875 = vmatpush.msrb.mxu3 %v1389_v18  ;;  %v1569_v6 = vld [vmem:[#allocation17 + $0x1bf8] sm:$0xff]  ;;  %v1527_v3 = vld [vmem:[#allocation17 + $0x1aa8] sm:$0xff] }
 0x376   :  { %2891 = vmatpush.msrb.mxu0 %v1429_v22  ;;  %2915 = vmatpush.msrb.mxu1 %v1453_v59  ;;  %v3115_v0 = vadd.f32 1.4214138, %v3113_v51  ;;  %v1567_v18 = vld [vmem:[#allocation17 + $0x1be8] sm:$0xff]  ;;  %v1629_v59 = vld [vmem:[#allocation17 + $0x1dd8] sm:$0xff] }
 0x377   :  { %2932 = vmatpush.msra.mxu2 %v1491_v5  ;;  %2876 = vmatpush.msrb.mxu3 %v1387_v23  ;;  %v1591_v21 = vld [vmem:[#allocation17 + $0x1ca8] sm:$0xff]  ;;  %v1525_v5 = vld [vmem:[#allocation17 + $0x1a98] sm:$0xff]  ;;  %v3129_v23 = vmul.f32 %v3127_v16, %v3999_v39 }
 0x378   :  { %2892 = vmatpush.msrb.mxu0 %v1427_v26  ;;  %2916 = vmatpush.msrb.mxu1 %v1451_v27  ;;  %v3117_v11 = vmul.f32 %v3115_v0, %v4028_v25  ;;  %v3252_v26 = vld.sshfl [vmem:[#allocation1] sm:$0xff pattern:$0x73625140]  ;;  %v1565_v27 = vld [vmem:[#allocation17 + $0x1bd8] sm:$0xff] }
 0x379   :  { %2933 = vmatpush.msra.mxu2 %v1489_v28  ;;  %2877 = vmatpush.msrb.mxu3 %v1385_v31  ;;  %v1589_v28 = vld [vmem:[#allocation17 + $0x1c98] sm:$0xff]  ;;  %v1627_v31 = vld [vmem:[#allocation17 + $0x1dc8] sm:$0xff]  ;;  %v3131_v39 = vmul.f32 1.442695, %v3129_v23 }
 0x37a   :  { %2893 = vmatpush.msrb.mxu0 %v1425_v30  ;;  %2917 = vmatpush.msrb.mxu1 %v1449_v29  ;;  %v3119_v22 = vadd.f32 -0.28449672, %v3117_v11  ;;  %v1523_v30 = vld [vmem:[#allocation17 + $0x1a88] sm:$0xff]  ;;  %v1609_v16 = vld [vmem:[#allocation17 + $0x1d38] sm:$0xff] }
 0x37b   :  { %2934 = vmatpush.msra.mxu2 %v1487_v61  ;;  %2878 = vmatpush.msrb.mxu3 %v1383_v35  ;;  %v1587_v29 = vld [vmem:[#allocation17 + $0x1c88] sm:$0xff]  ;;  %v1625_v61 = vld [vmem:[#allocation17 + $0x1db8] sm:$0xff]  ;;  %3245 = vpow2.f32 %v3131_v39  ;;  %v3256_v39 = vld.sshfl [vmem:[#allocation1 + $0x18] sm:$0xff pattern:$0x73625140] }
 0x37c   :  { %2894 = vmatpush.msrb.mxu0 %v1423_v10  ;;  %2918 = vmatpush.msrb.mxu1 %v1447_v56  ;;  %v3121_v34 = vmul.f32 %v3119_v22, %v4028_v25  ;;  %v1521_v35 = vld [vmem:[#allocation17 + $0x1a78] sm:$0xff]  ;;  %v1579_v51 = vld [vmem:[#allocation17 + $0x1c48] sm:$0xff] }
 0x37d   :  { %2935 = vmatpush.msra.mxu2 %v1485_v4  ;;  %2879 = vmatpush.msrb.mxu3 %v1381_v36  ;;  %v1561_v10 = vld [vmem:[#allocation17 + $0x1bb8] sm:$0xff]  ;;  %v1623_v4 = vld [vmem:[#allocation17 + $0x1da8] sm:$0xff] }
 0x37e   :  { %2895 = vmatpush.msrb.mxu0 %v1421_v38  ;;  %2919 = vmatpush.msrb.mxu1 %v1445_v45  ;;  %v1585_v56 = vld [vmem:[#allocation17 + $0x1c78] sm:$0xff]  ;;  %v1519_v36 = vld [vmem:[#allocation17 + $0x1a68] sm:$0xff]  ;;  %v3123_v49 = vadd.f32 0.2548296, %v3121_v34 }
 0x37f   :  { %2936 = vmatpush.msra.mxu2 %v1483_v41  ;;  %2880 = vmatpush.msrb.mxu3 %v1379_v42  ;;  %v1559_v38 = vld [vmem:[#allocation17 + $0x1ba8] sm:$0xff]  ;;  %v1621_v41 = vld [vmem:[#allocation17 + $0x1d98] sm:$0xff] }
 0x380   :  { %2896 = vmatpush.msrb.mxu0 %v1419_v43  ;;  %2920 = vmatpush.msrb.mxu1 %v1443_v19  ;;  %v1583_v45 = vld [vmem:[#allocation17 + $0x1c68] sm:$0xff]  ;;  %v1517_v42 = vld [vmem:[#allocation17 + $0x1a58] sm:$0xff] }
 0x381   :  { %2937 = vmatpush.msra.mxu2 %v1481_v44  ;;  %2881 = vmatmul.f32.vlgmr.msrb.gmra.mxu3 %v3969_v53  ;;  %v1595_v53 = vld [vmem:[#allocation17 + $0x1cc8] sm:$0xff]  ;;  %v1557_v43 = vld [vmem:[#allocation17 + $0x1b98] sm:$0xff] }
 0x382   :  { %2945 = vmatpush.msra.mxu3 %v1537_v48  ;;  %2985 = vmatpush.msra.mxu1 %v1601_v46  ;;  %v1581_v19 = vld [vmem:[#allocation17 + $0x1c58] sm:$0xff]  ;;  %v1619_v44 = vld [vmem:[#allocation17 + $0x1d88] sm:$0xff] }
 0x383   :  { %2897 = vmatpush.msrb.mxu0 %v1417_v55  ;;  %2938 = vmatpush.msra.mxu2 %v1479_v24  ;;  %v1515_v48 = vld [vmem:[#allocation17 + $0x1a48] sm:$0xff]  ;;  %v3125_v55 = vmul.f32 %v3123_v49, %v4028_v25  ;;  %v1617_v24 = vld [vmem:[#allocation17 + $0x1d78] sm:$0xff] }
 0x384   :  { %2946 = vmatpush.msra.mxu3 %v1535_v52  ;;  %2986 = vmatpush.msra.mxu1 %v1599_v62  ;;  %v1555_v46 = vld [vmem:[#allocation17 + $0x1b88] sm:$0xff]  ;;  %v1513_v52 = vld [vmem:[#allocation17 + $0x1a38] sm:$0xff] }
 0x385   :  { %2898 = vmatpush.msrb.mxu0 %v1415_v57  ;;  %2939 = vmatpush.msra.mxu2 %v1477_v54  ;;  %v1553_v62 = vld [vmem:[#allocation17 + $0x1b78] sm:$0xff]  ;;  %v1615_v54 = vld [vmem:[#allocation17 + $0x1d68] sm:$0xff] }
 0x386   :  { %2947 = vmatpush.msra.mxu3 %v1533_v15  ;;  %2987 = vmatpush.msra.mxu1 %v1597_v63  ;;  %v1577_v57 = vld [vmem:[#allocation17 + $0x1c38] sm:$0xff]  ;;  %v1511_v15 = vld [vmem:[#allocation17 + $0x1a28] sm:$0xff]  ;;  %v3246_v63 = vpop.eup %3245 }
 0x387   :  { %2899 = vmatpush.msrb.mxu0 %v1413_v7  ;;  %2940 = vmatpush.msra.mxu2 %v1475_v1  ;;  %v1551_v0 = vld [vmem:[#allocation17 + $0x1b68] sm:$0xff]  ;;  %v3135_v1 = vmul.f32 %v3246_v63, %v3125_v55  ;;  %v1613_v25 = vld [vmem:[#allocation17 + $0x1d58] sm:$0xff] }
 0x388   :  { %2941 = vmatmul.f32.vlgmr.msra.gmra.mxu2 %v3251_v12  ;;  %2948 = vmatpush.msra.mxu3 %v1531_v37  ;;  %v1575_v7 = vld [vmem:[#allocation17 + $0x1c28] sm:$0xff]  ;;  %v1509_v37 = vld [vmem:[#allocation17 + $0x1a18] sm:$0xff] }
 0x389   :  { %2988 = vmatpush.msra.mxu1 %v1595_v53  ;;  %3005 = vmatpush.msrb.mxu2 %v1633_v32  ;;  %v1549_v53 = vld [vmem:[#allocation17 + $0x1b58] sm:$0xff]  ;;  %v1547_v11 = vld [vmem:[#allocation17 + $0x1b48] sm:$0xff] }
 0x38a   :  { %2900 = vmatpush.msrb.mxu0 %v1411_v58  ;;  %2949 = vmatpush.msra.mxu3 %v1529_v9  ;;  %v1573_v32 = vld [vmem:[#allocation17 + $0x1c18] sm:$0xff]  ;;  %v1611_v58 = vld [vmem:[#allocation17 + $0x1d48] sm:$0xff] }
 0x38b   :  { %2901 = vmatmul.f32.vlgmr.msrb.gmra.mxu0 %v3972_v8  ;;  %2989 = vmatpush.msra.mxu1 %v1593_v2  ;;  %v1563_v8 = vld [vmem:[#allocation17 + $0x1bc8] sm:$0xff]  ;;  %v3137_v2 = vsub.f32 1.0, %v3135_v1  ;;  %v1605_v23 = vld [vmem:[#allocation17 + $0x1d18] sm:$0xff] }
 0x38c   :  { %2965 = vmatpush.msra.mxu0 %v1569_v6  ;;  %3006 = vmatpush.msrb.mxu2 %v1631_v17  ;;  %v1507_v9 = vld [vmem:[#allocation17 + $0x1a08] sm:$0xff]  ;;  %v1665_v6 = vld [vmem:[#allocation17 + $0x1ef8] sm:$0xff] }
 0x38d   :  { %2921 = vmatmul.f32.vlgmr.msrb.gmra.mxu1 %v3252_v26  ;;  %2950 = vmatpush.msra.mxu3 %v1527_v3  ;;  %v1571_v12 = vld [vmem:[#allocation17 + $0x1c08] sm:$0xff]  ;;  %v1545_v17 = vld [vmem:[#allocation17 + $0x1b38] sm:$0xff]  ;;  %v3071_v3 = vsel %vm3069_vm6, 1.0, %v3602_v40 }
 0x38e   :  { %2966 = vmatpush.msra.mxu0 %v1567_v18  ;;  %2990 = vmatpush.msra.mxu1 %v1591_v21  ;;  %v3253_v18 = vld.sshfl [vmem:[#allocation1 + $0x10] sm:$0xff pattern:$0x73625140]  ;;  %v1607_v21 = vld [vmem:[#allocation17 + $0x1d28] sm:$0xff] }
 0x38f   :  { %3007 = vmatpush.msrb.mxu2 %v1629_v59  ;;  %2951 = vmatpush.msra.mxu3 %v1525_v5  ;;  %v1663_v22 = vld [vmem:[#allocation17 + $0x1ee8] sm:$0xff]  ;;  %v3139_v59 = vmul.f32 %v3137_v2, %v3071_v3  ;;  %v1661_v26 = vld [vmem:[#allocation17 + $0x1ed8] sm:$0xff] }
 0x390   :  { %2967 = vmatpush.msra.mxu0 %v1565_v27  ;;  %2991 = vmatpush.msra.mxu1 %v1589_v28  ;;  %v3254_v5 = vld.sshfl [vmem:[#allocation1 + $0x20] sm:$0xff pattern:$0x73625140]  ;;  %v1541_v27 = vld [vmem:[#allocation17 + $0x1b18] sm:$0xff] }
 0x391   :  { %3008 = vmatpush.msrb.mxu2 %v1627_v31  ;;  %2952 = vmatpush.msra.mxu3 %v1523_v30  ;;  %v1603_v28 = vld [vmem:[#allocation17 + $0x1d08] sm:$0xff]  ;;  %v3141_v30 = vadd.f32 1.0, %v3139_v59  ;;  %v1697_v34 = vld [vmem:[#allocation17 + $0x1ff8] sm:$0xff] }
 0x392   :  { %2968 = vmatpush.msra.mxu0 %v1563_v8  ;;  %2992 = vmatpush.msra.mxu1 %v1587_v29  ;;  %v1659_v31 = vld [vmem:[#allocation17 + $0x1ec8] sm:$0xff]  ;;  %v3065_v29 = vmul.f32 0.5, %v3991_v14  ;;  %v1677_v55 = vld [vmem:[#allocation17 + $0x1f58] sm:$0xff] }
 0x393   :  { %3009 = vmatpush.msrb.mxu2 %v1625_v61  ;;  %2953 = vmatpush.msra.mxu3 %v1521_v35  ;;  %v1539_v8 = vld [vmem:[#allocation17 + $0x1b08] sm:$0xff]  ;;  %v3255_v61 = vld.sshfl [vmem:[#allocation1 + $0x28] sm:$0xff pattern:$0x73625140] }
 0x394   :  { %2969 = vmatpush.msra.mxu0 %v1561_v10  ;;  %2993 = vmatpush.msra.mxu1 %v1585_v56  ;;  %v3143_v35 = vmul.f32 %v3141_v30, %v3065_v29  ;;  %v1655_v10 = vld [vmem:[#allocation17 + $0x1ea8] sm:$0xff] }
 0x395   :  { %3010 = vmatpush.msrb.mxu2 %v1623_v4  ;;  %2954 = vmatpush.msra.mxu3 %v1519_v36  ;;  %v1695_v56 = vld [vmem:[#allocation17 + $0x1fe8] sm:$0xff]  ;;  %v1693_v4 = vld [vmem:[#allocation17 + $0x1fd8] sm:$0xff] }
 0x396   :  { %2970 = vmatpush.msra.mxu0 %v1559_v38  ;;  %2994 = vmatpush.msra.mxu1 %v1583_v45  ;;  %v1651_v14 = vld [vmem:[#allocation17 + $0x1e88] sm:$0xff]  ;;  %v1649_v38 = vld [vmem:[#allocation17 + $0x1e78] sm:$0xff] }
 0x397   :  { %3011 = vmatpush.msrb.mxu2 %v1621_v41  ;;  %2955 = vmatpush.msra.mxu3 %v1517_v42  ;;  %v1691_v36 = vld [vmem:[#allocation17 + $0x1fc8] sm:$0xff]  ;;  %v1689_v45 = vld [vmem:[#allocation17 + $0x1fb8] sm:$0xff] }
 0x398   :  { %2971 = vmatpush.msra.mxu0 %v1557_v43  ;;  %2995 = vmatpush.msra.mxu1 %v1581_v19  ;;  %v1687_v49 = vld [vmem:[#allocation17 + $0x1fa8] sm:$0xff]  ;;  %v1645_v41 = vld [vmem:[#allocation17 + $0x1e58] sm:$0xff] }
 0x399   :  { %3012 = vmatpush.msrb.mxu2 %v1619_v44  ;;  %2956 = vmatpush.msra.mxu3 %v1515_v48  ;;  %v1685_v42 = vld [vmem:[#allocation17 + $0x1f98] sm:$0xff]  ;;  %v1643_v43 = vld [vmem:[#allocation17 + $0x1e48] sm:$0xff] }
 0x39a   :  { %2972 = vmatpush.msra.mxu0 %v1555_v46  ;;  %2996 = vmatpush.msra.mxu1 %v1579_v51  ;;  %v1683_v19 = vld [vmem:[#allocation17 + $0x1f88] sm:$0xff]  ;;  %v1681_v44 = vld [vmem:[#allocation17 + $0x1f78] sm:$0xff] }
 0x39b   :  { %3013 = vmatpush.msrb.mxu2 %v1617_v24  ;;  %2957 = vmatpush.msra.mxu3 %v1513_v52  ;;  %v1639_v48 = vld [vmem:[#allocation17 + $0x1e28] sm:$0xff]  ;;  %v1637_v51 = vld [vmem:[#allocation17 + $0x1e18] sm:$0xff] }
 0x39c   :  { %2973 = vmatpush.msra.mxu0 %v1553_v62  ;;  %2997 = vmatpush.msra.mxu1 %v1577_v57  ;;  %v1679_v46 = vld [vmem:[#allocation17 + $0x1f68] sm:$0xff]  ;;  %v1673_v62 = vld [vmem:[#allocation17 + $0x1f38] sm:$0xff] }
 0x39d   :  { %3014 = vmatpush.msrb.mxu2 %v1615_v54  ;;  %2958 = vmatpush.msra.mxu3 %v1511_v15  ;;  %v1635_v24 = vld [vmem:[#allocation17 + $0x1e08] sm:$0xff]  ;;  %v3257_v57 = vld.sshfl [vmem:[#allocation1 + $0x30] sm:$0xff pattern:$0x73625140] }
 0x39e   :  { %2974 = vmatpush.msra.mxu0 %v1551_v0  ;;  %2998 = vmatpush.msra.mxu1 %v1575_v7  ;;  %v1675_v52 = vld [vmem:[#allocation17 + $0x1f48] sm:$0xff]  ;;  %v1669_v15 = vld [vmem:[#allocation17 + $0x1f18] sm:$0xff]  ;;  %v3258_v0 = vld.sshfl [vmem:[#allocation1 + $0x38] sm:$0xff pattern:$0x73625140] }
 0x39f   :  { %3015 = vmatpush.msrb.mxu2 %v1613_v25  ;;  %2959 = vmatpush.msra.mxu3 %v1509_v37  ;;  %v1671_v54 = vld [vmem:[#allocation17 + $0x1f28] sm:$0xff]  ;;  %v3259_v7 = vld [vmem:[#allocation19] sm:$0x3]  ;;  %v2442_v25 = vpop.f32.mrf.mxu1 }
 0x3a0   :  { %2975 = vmatpush.msra.mxu0 %v1549_v53  ;;  %2999 = vmatpush.msra.mxu1 %v1573_v32  ;;  %v1667_v63 = vld [vmem:[#allocation17 + $0x1f08] sm:$0xff]  ;;  %v1701_v1 = vperm.slane %v3259_v7, 1  ;;  %v2462_v53 = vpop.f32.mrf.mxu2 }
 0x3a1   :  { %3016 = vmatpush.msrb.mxu2 %v1611_v58  ;;  %2960 = vmatpush.msra.mxu3 %v1507_v9  ;;  %v2482_v58 = vpop.f32.mrf.mxu3 }
 0x3a2   :  { %2976 = vmatpush.msra.mxu0 %v1547_v11  ;;  %3000 = vmatpush.msra.mxu1 %v1571_v12  ;;  %v2443_v37 = vadd.f32 %v2442_v25, %v1701_v1  ;;  %v2502_v11 = vpop.f32.mrf.mxu0 }
 0x3a3   :  { %3017 = vmatpush.msrb.mxu2 %v1609_v16  ;;  %2961 = vmatmul.f32.vlgmr.msra.gmra.mxu3 %v3253_v18 }
 0x3a4   :  { %3001 = vmatmul.f32.vlgmr.msra.gmra.mxu1 %v3254_v5  ;;  %3025 = vmatpush.msrb.mxu3 %v1665_v6  ;;  %v2463_v32 = vadd.f32 %v2462_v53, %v2443_v37 }
 0x3a5   :  { %3160 = vmatpush.xpose.msrb.mxu1 %v3946_v33  ;;  %2977 = vmatpush.msra.mxu0 %v1545_v17  ;;  %v1657_v33 = vld [vmem:[#allocation17 + $0x1eb8] sm:$0xff] }
 0x3a6   :  { %3018 = vmatpush.msrb.mxu2 %v1607_v21  ;;  %3026 = vmatpush.msrb.mxu3 %v1663_v22  ;;  %v2483_v9 = vadd.f32 %v2482_v58, %v2463_v32 }
 0x3a7   :  { %2978 = vmatpush.msra.mxu0 %v1543_v50  ;;  %v2522_v2 = vpop.f32.mrf.mxu1 }
 0x3a8   :  { %3019 = vmatpush.msrb.mxu2 %v1605_v23  ;;  %3027 = vmatpush.msrb.mxu3 %v1661_v26  ;;  %v2503_v12 = vadd.f32 %v2502_v11, %v2483_v9  ;;  %v2542_v6 = vpop.f32.mrf.mxu2 }
 0x3a9   :  { %3161 = vmatpush.xpose.msrb.mxu1 %v3939_v47  ;;  %2979 = vmatpush.msra.mxu0 %v1541_v27  ;;  %v1653_v47 = vld [vmem:[#allocation17 + $0x1e98] sm:$0xff]  ;;  %v2562_v3 = vpop.f32.mrf.mxu3 }
 0x3aa   :  { %3020 = vmatpush.msrb.mxu2 %v1603_v28  ;;  %3028 = vmatpush.msrb.mxu3 %v1659_v31  ;;  %v2523_v16 = vadd.f32 %v2522_v2, %v2503_v12  ;;  %v2582_v21 = vpop.f32.mrf.mxu0 }
 0x3ab   :  { %3021 = vmatmul.f32.vlgmr.msrb.gmra.mxu2 %v3255_v61  ;;  %2980 = vmatpush.msra.mxu0 %v1539_v8 }
 0x3ac   :  { %3180 = vmatpush.xpose.msra.mxu2 %v3952_v60  ;;  %2981 = vmatmul.f32.vlgmr.msra.gmra.mxu0 %v3256_v39  ;;  %v1647_v60 = vld [vmem:[#allocation17 + $0x1e68] sm:$0xff]  ;;  %v2543_v17 = vadd.f32 %v2542_v6, %v2523_v16 }
 0x3ad   :  { %3029 = vmatpush.msrb.mxu3 %v1657_v33  ;;  %3045 = vmatpush.msrb.mxu0 %v1697_v34 }
 0x3ae   :  { %3162 = vmatmul.f32.vlgmr.msrb.gmra.mxu1 %v3143_v35  ;;  %v2563_v18 = vadd.f32 %v2562_v3, %v2543_v17 }
 0x3af   :  { %3030 = vmatpush.msrb.mxu3 %v1655_v10  ;;  %3046 = vmatpush.msrb.mxu0 %v1695_v56  ;;  %v2602_v59 = vpop.f32.mrf.mxu1 }
 0x3b0   :  { %3181 = vmatpush.xpose.msra.mxu2 %v3942_v20  ;;  %v1641_v20 = vld [vmem:[#allocation17 + $0x1e38] sm:$0xff]  ;;  %v2583_v22 = vadd.f32 %v2582_v21, %v2563_v18  ;;  %v2622_v50 = vpop.f32.mrf.mxu2 }
 0x3b1   :  { %3031 = vmatpush.msrb.mxu3 %v1653_v47  ;;  %3047 = vmatpush.msrb.mxu0 %v1693_v4  ;;  %v2642_v23 = vpop.f32.mrf.mxu3 }
 0x3b2   :  { %v2603_v5 = vadd.f32 %v2602_v59, %v2583_v22  ;;  %v2662_v28 = vpop.f32.mrf.mxu0 }
 0x3b3   :  { %3032 = vmatpush.msrb.mxu3 %v1651_v14  ;;  %3048 = vmatpush.msrb.mxu0 %v1691_v36 }
 0x3b4   :  { %v2623_v26 = vadd.f32 %v2622_v50, %v2603_v5 }
 0x3b5   :  { %3033 = vmatpush.msrb.mxu3 %v1649_v38  ;;  %3049 = vmatpush.msrb.mxu0 %v1689_v45 }
 0x3b6   :  { %v2643_v27 = vadd.f32 %v2642_v23, %v2623_v26 }
 0x3b7   :  { %3034 = vmatpush.msrb.mxu3 %v1647_v60  ;;  %3050 = vmatpush.msrb.mxu0 %v1687_v49  ;;  %v2682_v30 = vpop.f32.mrf.mxu1 }
 0x3b8   :  { %v2663_v31 = vadd.f32 %v2662_v28, %v2643_v27  ;;  %v2702_v29 = vpop.f32.mrf.mxu2 }
 0x3b9   :  { %3035 = vmatpush.msrb.mxu3 %v1645_v41  ;;  %3051 = vmatpush.msrb.mxu0 %v1685_v42 }
 0x3ba   :  { %v2683_v8 = vadd.f32 %v2682_v30, %v2663_v31 }
 0x3bb   :  { %3036 = vmatpush.msrb.mxu3 %v1643_v43  ;;  %3052 = vmatpush.msrb.mxu0 %v1683_v19 }
 0x3bc   :  { %v2703_v34 = vadd.f32 %v2702_v29, %v2683_v8 }
 0x3bd   :  { %3037 = vmatpush.msrb.mxu3 %v1641_v20  ;;  %3053 = vmatpush.msrb.mxu0 %v1681_v44 }
 0x3bf   :  { %3038 = vmatpush.msrb.mxu3 %v1639_v48  ;;  %3054 = vmatpush.msrb.mxu0 %v1679_v46 }
 0x3c0   :  { %v2722_v33 = vpop.f32.mrf.mxu3 }
 0x3c1   :  { %3039 = vmatpush.msrb.mxu3 %v1637_v51  ;;  %3055 = vmatpush.msrb.mxu0 %v1677_v55  ;;  %v2723_v61 = vadd.f32 %v2722_v33, %v2703_v34 }
 0x3c3   :  { %3040 = vmatpush.msrb.mxu3 %v1635_v24  ;;  %3056 = vmatpush.msrb.mxu0 %v1675_v52 }
 0x3c4   :  { %3041 = vmatmul.f32.vlgmr.msrb.gmra.mxu3 %v3257_v57  ;;  %v2742_v35 = vpop.f32.mrf.mxu0 }
 0x3c5   :  { %3057 = vmatpush.msrb.mxu0 %v1673_v62  ;;  %v2743_v39 = vadd.f32 %v2742_v35, %v2723_v61 }
 0x3c6   :  { %v2762_v10 = vpop.f32.mrf.mxu1 }
 0x3c7   :  { %3058 = vmatpush.msrb.mxu0 %v1671_v54  ;;  %v2763_v56 = vadd.f32 %v2762_v10, %v2743_v39  ;;  %v2782_v47 = vpop.f32.mrf.mxu2 }
 0x3c9   :  { %3059 = vmatpush.msrb.mxu0 %v1669_v15  ;;  %v2783_v14 = vadd.f32 %v2782_v47, %v2763_v56 }
 0x3cb   :  { %3060 = vmatpush.msrb.mxu0 %v1667_v63 }
 0x3cc   :  { %3061 = vmatmul.f32.vlgmr.msrb.gmra.mxu0 %v3258_v0 }
 0x3e2   :  { %v2802_v4 = vpop.f32.mrf.mxu3 }
 0x3e3   :  { %v2803_v36 = vadd.f32 %v2802_v4, %v2783_v14 }
 0x3e6   :  { %v2822_v38 = vpop.f32.mrf.mxu0 }
 0x3e7   :  { %v2823_v45 = vadd.f32 %v2822_v38, %v2803_v36  ;;  %v3145_v36 = vperm.slane %v3955_v13, 0 }
 0x3e8   :  { %v2842_v60 = vpop.f32.mrf.mxu1 }
 0x3e9   :  { %v2843_v49 = vadd.f32 %v2842_v60, %v2823_v45  ;;  %v2862_v41 = vpop.f32.mrf.mxu2 }
 0x3eb   :  { %v2863_v43 = vadd.f32 %v2862_v41, %v2843_v49 }
 0x404   :  { %v2882_v42 = vpop.f32.mrf.mxu3 }
 0x405   :  { %v2883_v19 = vadd.f32 %v2882_v42, %v2863_v43 }
 0x408   :  { %v2902_v20 = vpop.f32.mrf.mxu0 }
 0x409   :  { %v2903_v44 = vadd.f32 %v2902_v20, %v2883_v19 }
 0x40a   :  { %v2922_v48 = vpop.f32.mrf.mxu1 }
 0x40b   :  { %v2923_v46 = vadd.f32 %v2922_v48, %v2903_v44  ;;  %v2942_v51 = vpop.f32.mrf.mxu2 }
 0x40d   :  { %v2943_v24 = vadd.f32 %v2942_v51, %v2923_v46 }
 0x421   :  { %v3002_v54 = vpop.f32.mrf.mxu1 }
 0x426   :  { %v2962_v55 = vpop.f32.mrf.mxu3 }
 0x427   :  { %v2963_v52 = vadd.f32 %v2962_v55, %v2943_v24 }
 0x429   :  { %v2982_v62 = vpop.f32.mrf.mxu0 }
 0x42a   :  { %v2983_v57 = vadd.f32 %v2982_v62, %v2963_v52 }
 0x42b   :  { %v3163_v14 = vpop.f32.mrf.mxu1 }
 0x42c   :  { %v3003_v15 = vadd.f32 %v3002_v54, %v2983_v57  ;;  %v3164_v38 = vadd.f32 %v3163_v14, %v3145_v36 }
 0x42e   :  { %v3022_v63 = vpop.f32.mrf.mxu2 }
 0x42f   :  { %v3023_v0 = vadd.f32 %v3022_v63, %v3003_v15 }
 0x447   :  { %v3042_v7 = vpop.f32.mrf.mxu3 }
 0x448   :  { %v3043_v1 = vadd.f32 %v3042_v7, %v3023_v0 }
 0x449   :  { %v3062_v25 = vpop.f32.mrf.mxu0 }
 0x44a   :  { %v3063_v37 = vadd.f32 %v3062_v25, %v3043_v1 }
 0x44c   :  { %v3068_v53 = vmul.f32 0.70710677, %v3063_v37  ;;  %v3066_v56 = vmul.f32 0.5, %v3063_v37 }
 0x44e   :  { %v3074_v32 = vand.u32 2147483647, %v3068_v53  ;;  %vm3070_vm11 = vcmp.ge.f32.partialorder %v3068_v53, 0.0 }
 0x44f   :  { %v3072_v39 = vsel %vm3070_vm11, 1.0, %v3602_v40 }
 0x450   :  { %v3076_v58 = vmul.f32 0.3275911, %v3074_v32  ;;  %v3128_v59 = vsub.f32 0.0, %v3074_v32 }
 0x452   :  { %v3078_v9 = vadd.f32 1.0, %v3076_v58  ;;  %v3130_v23 = vmul.f32 %v3128_v59, %v3074_v32 }
 0x454   :  { %3247 = vrcp.f32 %v3078_v9  ;;  %v3105_v16 = vand.u32 2147483648, %v3078_v9  ;;  %v3103_v17 = vand.u32 2147483647, %v3078_v9  ;;  %vm3099_vm8 = vweird.f32 %v3078_v9 }
 0x455   :  { %v3133_v28 = vmul.f32 1.442695, %v3130_v23 }
 0x456   :  { %v3106_v18 = vor.u32 1.1754944e-38, %v3105_v16  ;;  %vm3104_vm10 = vcmp.eq.f32.partialorder %v3103_v17, 8.507059e+37 }
 0x457   :  { %3249 = vpow2.f32 %v3133_v28 }
 0x45a   :  { %v3248_v11 = vpop.eup %3247 }
 0x45b   :  { %v3095_v12 = vmul.f32 %v3248_v11, %v3078_v9  ;;  %vm3100_vm7 = vweird.f32 %v3248_v11 }
 0x45c   :  { %vm3101_vm9 = vmor %vm3099_vm8, %vm3100_vm7 }
 0x45d   :  { %v3096_v2 = vsub.f32 1.0, %v3095_v12  ;;  %v3250_v34 = vpop.eup %3249 }
 0x45f   :  { %v3097_v6 = vmul.f32 %v3248_v11, %v3096_v2 }
 0x461   :  { %v3098_v3 = vadd.f32 %v3248_v11, %v3097_v6 }
 0x463   :  { %v3102_v21 = vsel %vm3101_vm9, %v3248_v11, %v3098_v3 }
 0x464   :  { %v3107_v22 = vsel %vm3104_vm10, %v3106_v18, %v3102_v21 }
 0x465   :  { %v3110_v5 = vmul.f32 1.0614054, %v3107_v22 }
 0x467   :  { %v3112_v50 = vadd.f32 -1.4531521, %v3110_v5 }
 0x469   :  { %v3114_v26 = vmul.f32 %v3112_v50, %v3107_v22 }
 0x46b   :  { %v3116_v27 = vadd.f32 1.4214138, %v3114_v26 }
 0x46d   :  { %v3118_v31 = vmul.f32 %v3116_v27, %v3107_v22 }
 0x46f   :  { %v3120_v30 = vadd.f32 -0.28449672, %v3118_v31 }
 0x471   :  { %v3122_v8 = vmul.f32 %v3120_v30, %v3107_v22 }
 0x473   :  { %v3124_v29 = vadd.f32 0.2548296, %v3122_v8 }
 0x475   :  { %v3126_v33 = vmul.f32 %v3124_v29, %v3107_v22 }
 0x477   :  { %v3136_v61 = vmul.f32 %v3250_v34, %v3126_v33 }
 0x479   :  { %v3138_v35 = vsub.f32 1.0, %v3136_v61 }
 0x47b   :  { %v3140_v10 = vmul.f32 %v3138_v35, %v3072_v39 }
 0x47d   :  { %v3142_v47 = vadd.f32 1.0, %v3140_v10 }
 0x47f   :  { %v3144_v4 = vmul.f32 %v3142_v47, %v3066_v56 }
 0x481   :  { %3182 = vmatmul.f32.vlgmr.msra.gmra.mxu2 %v3144_v4 }
 0x504   :  { %v3183_v45 = vpop.f32.mrf.mxu2 }
 0x505   :  { %v3184_v60 = vadd.f32 %v3183_v45, %v3164_v38 }
 0x507   :  { %3187 = vst.msk [vmem:[#allocation22] sm:$0x3] %vm3186_vm12, %v3184_v60 }
 0x508   :  { %3198 = dma.vmem_to_hbm [thread:$0]  %s3194_s24, 32, %s3196_s27, [#allocation4]  }
 0x509   :  { %3586 = dma.done.wait [#allocation4], 32  }
 0x50a   :  { %3587 = vsyncadd [#allocation4], 4294967264 }
 0x50b   :  { %3203 = vsyncpa [#allocation3], 1 }
 0x50c   :  { %3204 = vsyncpa [#allocation6], 1 }
 0x50d   :  { %3205 = vsyncpa [#allocation9], 1 }
 0x50e   :  { %3206 = vsyncpa [#allocation12], 1 }
 0x50f   :  { %3207 = vsyncpa [#allocation15], 1 }
 0x510   :  { %3208 = vsyncpa [#allocation18], 1 }
 0x511   :  { %3209 = vsyncpa [#allocation21], 1 }
 0x512   :  { %3210 = vsyncpa [#allocation4], 1 }

</bundles_post_ra>
